<compile_context>
chip_gen: v7x
topology: tpu7x:2x2x1
jax: 0.10.0
libtpu: 0.0.40
codegen_flags: <defaults>
</compile_context>

<pallas_src>
import functools
import math

import jax
import jax.numpy as jnp
from jax import lax
from jax.experimental import pallas as pl
from jax.experimental.pallas import tpu as pltpu

EPS = 1e-5  # nn.LayerNorm default eps


# --------------------------------------------------------------------------
# Stage A: LayerNorm + relu(W_weight) + GRU input projections (both dirs)
# Rows = a tile of batch*seq.
# --------------------------------------------------------------------------
def _pre_kernel(x_ref, gamma_ref, beta_ref, wg_ref, bg_ref, ww_ref, bw_ref,
                wih_ref, bih_ref, gxf_ref, gxb_ref, wx_ref):
    x = x_ref[...].astype(jnp.float32)
    mean = jnp.mean(x, axis=-1, keepdims=True)
    xc = x - mean
    var = jnp.mean(xc * xc, axis=-1, keepdims=True)
    normed = xc * lax.rsqrt(var + EPS)
    normed = normed * gamma_ref[...] + beta_ref[...]

    # relu-gate branch
    wx = jnp.dot(normed, ww_ref[...], preferred_element_type=jnp.float32)
    wx_ref[...] = jnp.maximum(wx + bw_ref[...], 0.0).astype(wx_ref.dtype)

    # GRU input projections hoisted out of the sequential recurrence.
    gru_x = jnp.dot(normed, wg_ref[...],
                    preferred_element_type=jnp.float32) + bg_ref[...]
    gxf = jnp.dot(gru_x, wih_ref[0],
                  preferred_element_type=jnp.float32) + bih_ref[0]
    gxb = jnp.dot(gru_x, wih_ref[1],
                  preferred_element_type=jnp.float32) + bih_ref[1]
    gxf_ref[...] = gxf.astype(gxf_ref.dtype)
    gxb_ref[...] = gxb.astype(gxb_ref.dtype)


# --------------------------------------------------------------------------
# Stage B: bidirectional GRU recurrence, both directions fused per grid step,
# time-chunked. Only h @ W_hh remains in the serial path (gate order r, z, n).
# Hidden states live in VMEM scratch, reset at chunk 0.
# --------------------------------------------------------------------------
def _gru_kernel(gxf_ref, gxb_ref, whh_ref, bhh_ref, outf_ref, outb_ref,
                hf_ref, hb_ref, *, hidden, chunk):
    @pl.when(pl.program_id(0) == 0)
    def _():
        hf_ref[...] = jnp.zeros_like(hf_ref)
        hb_ref[...] = jnp.zeros_like(hb_ref)

    nb = hf_ref.shape[0]
    whh_f = whh_ref[0]
    whh_b = whh_ref[1]
    # hoist bias broadcasts out of the unrolled loop
    bhh_f = jnp.broadcast_to(bhh_ref[0], (nb, 3 * hidden))
    bhh_b = jnp.broadcast_to(bhh_ref[1], (nb, 3 * hidden))

    def cell(gx, h, whh, bhh):
        gh = jnp.dot(h, whh, preferred_element_type=jnp.float32) + bhh
        r = jax.nn.sigmoid(gx[:, :hidden] + gh[:, :hidden])
        z = jax.nn.sigmoid(gx[:, hidden:2 * hidden] + gh[:, hidden:2 * hidden])
        n = jnp.tanh(gx[:, 2 * hidden:] + r * gh[:, 2 * hidden:])
        return (1.0 - z) * n + z * h

    hf = hf_ref[...]
    hb = hb_ref[...]
    # fully unrolled (chunk is a small static int); static indices -> dense slices
    for t in range(chunk):
        hf = cell(gxf_ref[:, t, :].astype(jnp.float32), hf, whh_f, bhh_f)
        outf_ref[:, t, :] = hf.astype(outf_ref.dtype)

        tb = chunk - 1 - t                      # backward dir runs reversed in-chunk
        hb = cell(gxb_ref[:, tb, :].astype(jnp.float32), hb, whh_b, bhh_b)
        outb_ref[:, tb, :] = hb.astype(outb_ref.dtype)

    hf_ref[...] = hf
    hb_ref[...] = hb


# --------------------------------------------------------------------------
# Stage C: gru_linear (split fwd/bwd halves) * relu-gate -> out_proj -> residual
# --------------------------------------------------------------------------
def _post_kernel(resf_ref, resb_ref, wx_ref, x_ref, wlf_ref, wlb_ref, bl_ref,
                 wo_ref, bo_ref, out_ref):
    res_out = (jnp.dot(resf_ref[...], wlf_ref[...],
                       preferred_element_type=jnp.float32)
               + jnp.dot(resb_ref[...], wlb_ref[...],
                         preferred_element_type=jnp.float32)
               + bl_ref[...])
    gated = res_out * wx_ref[...]
    out = jnp.dot(gated, wo_ref[...],
                  preferred_element_type=jnp.float32) + bo_ref[...]
    out_ref[...] = (out + x_ref[...]).astype(out_ref.dtype)


# --------------------------------------------------------------------------
# Wrapper
# --------------------------------------------------------------------------
def gru_residual_forward(x, y, params, *, row_tile=256, time_chunk=16):
    del y  # unused by the module's forward
    B, T, H = x.shape
    N = B * T
    xf = x.reshape(N, H)

    # ---- stage A: row-tiled, pipelined --------------------------------------
    tr = min(row_tile, N)
    n_row_blocks = pl.cdiv(N, tr)

    def row(width):
        return pl.BlockSpec((tr, width), lambda i: (i, 0))

    def const2(shape):
        return pl.BlockSpec(shape, lambda i: (0, 0))

    def const3(shape):
        return pl.BlockSpec(shape, lambda i: (0, 0, 0))

    gxf, gxb, wx = pl.pallas_call(
        _pre_kernel,
        out_shape=(jax.ShapeDtypeStruct((N, 3 * H), jnp.float32),
                   jax.ShapeDtypeStruct((N, 3 * H), jnp.float32),
                   jax.ShapeDtypeStruct((N, H), jnp.float32)),
        grid=(n_row_blocks,),
        in_specs=[row(H),
                  const2((1, H)), const2((1, H)),
                  const2((H, H)), const2((1, H)),
                  const2((H, H)), const2((1, H)),
                  const3((2, H, 3 * H)), const3((2, 1, 3 * H))],
        out_specs=[row(3 * H), row(3 * H), row(H)],
        compiler_params=pltpu.CompilerParams(
            dimension_semantics=("parallel",)),
    )(xf, params["ln_gamma"], params["ln_beta"],
      params["w_gru"], params["b_gru"],
      params["w_weight"], params["b_weight"],
      params["w_ih"], params["b_ih"])

    # ---- stage B: fused-direction GRU recurrence, time-chunked --------------
    C = time_chunk
    if T < C or T % C != 0:
        C = max(math.gcd(T, C), 1)
    n_chunks = T // C

    gxf_b = gxf.reshape(B, T, 3 * H)   # free reshape, no transpose
    gxb_b = gxb.reshape(B, T, 3 * H)

    resf, resb = pl.pallas_call(
        functools.partial(_gru_kernel, hidden=H, chunk=C),
        out_shape=(jax.ShapeDtypeStruct((B, T, H), jnp.float32),
                   jax.ShapeDtypeStruct((B, T, H), jnp.float32)),
        grid=(n_chunks,),
        in_specs=[
            pl.BlockSpec((B, C, 3 * H), lambda i: (0, i, 0)),
            pl.BlockSpec((B, C, 3 * H), lambda i: (0, n_chunks - 1 - i, 0)),
            pl.BlockSpec((2, H, 3 * H), lambda i: (0, 0, 0)),
            pl.BlockSpec((2, 1, 3 * H), lambda i: (0, 0, 0)),
        ],
        out_specs=[
            pl.BlockSpec((B, C, H), lambda i: (0, i, 0)),
            pl.BlockSpec((B, C, H), lambda i: (0, n_chunks - 1 - i, 0)),
        ],
        scratch_shapes=[pltpu.VMEM((B, H), jnp.float32),
                        pltpu.VMEM((B, H), jnp.float32)],
        compiler_params=pltpu.CompilerParams(
            dimension_semantics=("arbitrary",)),
    )(gxf_b, gxb_b, params["w_hh"], params["b_hh"])

    # ---- stage C: row-tiled, residual aliased to output ---------------------
    resf_flat = resf.reshape(N, H)     # free reshapes, no transpose/concat
    resb_flat = resb.reshape(N, H)
    wl = params["w_gru_linear"]
    wl_f, wl_b = wl[:H], wl[H:]

    out = pl.pallas_call(
        _post_kernel,
        out_shape=jax.ShapeDtypeStruct((N, H), jnp.float32),
        grid=(n_row_blocks,),
        in_specs=[row(H), row(H), row(H), row(H),
                  const2((H, H)), const2((H, H)), const2((1, H)),
                  const2((H, H)), const2((1, H))],
        out_specs=row(H),
        input_output_aliases={3: 0},   # residual input xf reuses the output buffer
        compiler_params=pltpu.CompilerParams(
            dimension_semantics=("parallel",)),
    )(resf_flat, resb_flat, wx, xf, wl_f, wl_b,
      params["b_gru_linear"], params["w_out"], params["b_out"])

    return out.reshape(B, T, H)


# --------------------------------------------------------------------------
# Deterministic synthetic parameters
# --------------------------------------------------------------------------
def make_params(key, H):
    ks = jax.random.split(key, 8)

    def xavier(k, fin, fout):
        lim = math.sqrt(6.0 / (fin + fout))
        return jax.random.uniform(k, (fin, fout), jnp.float32, -lim, lim)

    u = 1.0 / math.sqrt(H)
    return dict(
        ln_gamma=jnp.ones((1, H), jnp.float32),
        ln_beta=jnp.zeros((1, H), jnp.float32),
        w_gru=xavier(ks[0], H, H),
        b_gru=jnp.zeros((1, H), jnp.float32),
        w_weight=xavier(ks[1], H, H),
        b_weight=jnp.zeros((1, H), jnp.float32),
        # GRU: (2 directions, in/hidden, 3*H) with gate order (r, z, n)
        w_ih=jax.random.uniform(ks[2], (2, H, 3 * H), jnp.float32, -u, u),
        w_hh=jax.random.uniform(ks[3], (2, H, 3 * H), jnp.float32, -u, u),
        b_ih=jax.random.uniform(ks[4], (2, 1, 3 * H), jnp.float32, -u, u),
        b_hh=jax.random.uniform(ks[5], (2, 1, 3 * H), jnp.float32, -u, u),
        w_gru_linear=xavier(ks[6], 2 * H, H),
        b_gru_linear=jnp.zeros((1, H), jnp.float32),
        w_out=xavier(ks[7], H, H),
        b_out=jnp.zeros((1, H), jnp.float32),
    )


# --------------------------------------------------------------------------
# Pure-JAX reference (mirrors the torch forward) for a correctness check
# --------------------------------------------------------------------------
def ref_forward(x, params):
    B, T, H = x.shape
    mean = x.mean(-1, keepdims=True)
    var = ((x - mean) ** 2).mean(-1, keepdims=True)
    normed = (x - mean) / jnp.sqrt(var + EPS)
    normed = normed * params["ln_gamma"][0] + params["ln_beta"][0]

    gru_x = normed @ params["w_gru"] + params["b_gru"][0]
    weight_x = jax.nn.relu(normed @ params["w_weight"] + params["b_weight"][0])

    def run_dir(d, xs):  # xs: (T, B, H)
        wih, whh = params["w_ih"][d], params["w_hh"][d]
        bih, bhh = params["b_ih"][d, 0], params["b_hh"][d, 0]

        def step(h, x_t):
            gx = x_t @ wih + bih
            gh = h @ whh + bhh
            r = jax.nn.sigmoid(gx[:, :H] + gh[:, :H])
            z = jax.nn.sigmoid(gx[:, H:2 * H] + gh[:, H:2 * H])
            n = jnp.tanh(gx[:, 2 * H:] + r * gh[:, 2 * H:])
            hn = (1.0 - z) * n + z * h
            return hn, hn

        _, ys = lax.scan(step, jnp.zeros((B, H), jnp.float32), xs)
        return ys

    xs = gru_x.transpose(1, 0, 2)
    fwd = run_dir(0, xs)
    bwd = run_dir(1, xs[::-1])[::-1]
    res = jnp.concatenate([fwd, bwd], axis=-1).transpose(1, 0, 2)  # (B, T, 2H)

    res_out = res @ params["w_gru_linear"] + params["b_gru_linear"][0]
    out = (res_out * weight_x) @ params["w_out"] + params["b_out"][0]
    return out + x


if __name__ == "__main__":
    B, T, H = 2, 8, 128  # small demo shapes
    key = jax.random.PRNGKey(0)
    k_p, k_x, k_y = jax.random.split(key, 3)

    params = make_params(k_p, H)
    x = jax.random.normal(k_x, (B, T, H), jnp.float32)
    y = jax.random.normal(k_y, (B, T, H), jnp.float32)  # unused by forward

    forward = jax.jit(gru_residual_forward)
    out = jax.block_until_ready(forward(x, y, params))

    ref = ref_forward(x, params)
    assert out.shape == (B, T, H)
    assert jnp.allclose(out, ref, atol=1e-3, rtol=1e-3), "mismatch vs reference"

    print("KERNEL_OK")
</pallas_src>

<mosaic_0001>
module attributes {stable_mosaic.version = 11 : i64} {
  func.func @_pre_kernel(%arg0: i32, %arg1: memref<16x128xf32, #tpu.memory_space<vmem>>, %arg2: memref<1x128xf32, #tpu.memory_space<vmem>>, %arg3: memref<1x128xf32, #tpu.memory_space<vmem>>, %arg4: memref<128x128xf32, #tpu.memory_space<vmem>>, %arg5: memref<1x128xf32, #tpu.memory_space<vmem>>, %arg6: memref<128x128xf32, #tpu.memory_space<vmem>>, %arg7: memref<1x128xf32, #tpu.memory_space<vmem>>, %arg8: memref<2x128x384xf32, #tpu.memory_space<vmem>>, %arg9: memref<2x1x384xf32, #tpu.memory_space<vmem>>, %arg10: memref<16x384xf32, #tpu.memory_space<vmem>>, %arg11: memref<16x384xf32, #tpu.memory_space<vmem>>, %arg12: memref<16x128xf32, #tpu.memory_space<vmem>>) attributes {dimension_semantics = [#tpu.dimension_semantics<parallel>], iteration_bounds = array<i64: 1>, scalar_prefetch = 0 : i64, scratch_operands = 0 : i64, tpu.core_type = #tpu.core_type<tc>, window_params = [{transform_indices = @transform_0, window_bounds = array<i64: 16, 128>}, {pipeline_mode = #tpu.pipeline_mode<synchronous>, transform_indices = @transform_1, window_bounds = array<i64: 1, 128>}, {pipeline_mode = #tpu.pipeline_mode<synchronous>, transform_indices = @transform_2, window_bounds = array<i64: 1, 128>}, {pipeline_mode = #tpu.pipeline_mode<synchronous>, transform_indices = @transform_3, window_bounds = array<i64: 128, 128>}, {pipeline_mode = #tpu.pipeline_mode<synchronous>, transform_indices = @transform_4, window_bounds = array<i64: 1, 128>}, {pipeline_mode = #tpu.pipeline_mode<synchronous>, transform_indices = @transform_5, window_bounds = array<i64: 128, 128>}, {pipeline_mode = #tpu.pipeline_mode<synchronous>, transform_indices = @transform_6, window_bounds = array<i64: 1, 128>}, {pipeline_mode = #tpu.pipeline_mode<synchronous>, transform_indices = @transform_7, window_bounds = array<i64: 2, 128, 384>}, {pipeline_mode = #tpu.pipeline_mode<synchronous>, transform_indices = @transform_8, window_bounds = array<i64: 2, 1, 384>}, {transform_indices = @transform_9, window_bounds = array<i64: 16, 384>}, {transform_indices = @transform_10, window_bounds = array<i64: 16, 384>}, {transform_indices = @transform_11, window_bounds = array<i64: 16, 128>}]} {
    %c0 = arith.constant 0 : index
    %c0_0 = arith.constant 0 : index
    %0 = vector.load %arg1[%c0, %c0_0] : memref<16x128xf32, #tpu.memory_space<vmem>>, vector<16x128xf32>
    %cst = arith.constant dense<0.000000e+00> : vector<16xf32>
    %1 = vector.multi_reduction <add>, %0, %cst [1] : vector<16x128xf32> to vector<16xf32>
    %2 = vector.shape_cast %1 : vector<16xf32> to vector<16x1xf32>
    %cst_1 = arith.constant 1.280000e+02 : f32
    %3 = vector.broadcast %cst_1 : f32 to vector<16x1xf32>
    %4 = arith.divf %2, %3 : vector<16x1xf32>
    %5 = vector.broadcast %4 : vector<16x1xf32> to vector<16x128xf32>
    %6 = arith.subf %0, %5 : vector<16x128xf32>
    %7 = arith.mulf %6, %6 : vector<16x128xf32>
    %cst_2 = arith.constant dense<0.000000e+00> : vector<16xf32>
    %8 = vector.multi_reduction <add>, %7, %cst_2 [1] : vector<16x128xf32> to vector<16xf32>
    %9 = vector.shape_cast %8 : vector<16xf32> to vector<16x1xf32>
    %cst_3 = arith.constant 1.280000e+02 : f32
    %10 = vector.broadcast %cst_3 : f32 to vector<16x1xf32>
    %11 = arith.divf %9, %10 : vector<16x1xf32>
    %cst_4 = arith.constant 9.99999974E-6 : f32
    %12 = vector.broadcast %cst_4 : f32 to vector<16x1xf32>
    %13 = arith.addf %11, %12 : vector<16x1xf32>
    %14 = math.rsqrt %13 : vector<16x1xf32>
    %15 = vector.broadcast %14 : vector<16x1xf32> to vector<16x128xf32>
    %16 = arith.mulf %6, %15 : vector<16x128xf32>
    %c0_5 = arith.constant 0 : index
    %c0_6 = arith.constant 0 : index
    %17 = vector.load %arg2[%c0_5, %c0_6] : memref<1x128xf32, #tpu.memory_space<vmem>>, vector<1x128xf32>
    %18 = vector.broadcast %17 : vector<1x128xf32> to vector<16x128xf32>
    %19 = arith.mulf %16, %18 : vector<16x128xf32>
    %c0_7 = arith.constant 0 : index
    %c0_8 = arith.constant 0 : index
    %20 = vector.load %arg3[%c0_7, %c0_8] : memref<1x128xf32, #tpu.memory_space<vmem>>, vector<1x128xf32>
    %21 = vector.broadcast %20 : vector<1x128xf32> to vector<16x128xf32>
    %22 = arith.addf %19, %21 : vector<16x128xf32>
    %c0_9 = arith.constant 0 : index
    %c0_10 = arith.constant 0 : index
    %23 = vector.load %arg6[%c0_9, %c0_10] : memref<128x128xf32, #tpu.memory_space<vmem>>, vector<128x128xf32>
    %cst_11 = arith.constant dense<0.000000e+00> : vector<16x128xf32>
    %24 = tpu.matmul %22, %23, %cst_11 {dimension_numbers = #tpu.dot_dimension_numbers<[1], [0], [0], [1], [0, 0, 1, 1], [], []>} : vector<16x128xf32>, vector<128x128xf32>, vector<16x128xf32> -> vector<16x128xf32>
    %c0_12 = arith.constant 0 : index
    %c0_13 = arith.constant 0 : index
    %25 = vector.load %arg7[%c0_12, %c0_13] : memref<1x128xf32, #tpu.memory_space<vmem>>, vector<1x128xf32>
    %26 = vector.broadcast %25 : vector<1x128xf32> to vector<16x128xf32>
    %27 = arith.addf %24, %26 : vector<16x128xf32>
    %cst_14 = arith.constant 0.000000e+00 : f32
    %28 = vector.broadcast %cst_14 : f32 to vector<16x128xf32>
    %29 = arith.maximumf %27, %28 : vector<16x128xf32>
    %c0_15 = arith.constant 0 : index
    %c0_16 = arith.constant 0 : index
    %30 = vector.load %arg12[%c0_15, %c0_16] : memref<16x128xf32, #tpu.memory_space<vmem>>, vector<16x128xf32>
    tpu.vector_store %arg12[%c0_15, %c0_16], %29 {strides = array<i32>} : memref<16x128xf32, #tpu.memory_space<vmem>>, vector<16x128xf32>,
    %c0_17 = arith.constant 0 : index
    %c0_18 = arith.constant 0 : index
    %31 = vector.load %arg4[%c0_17, %c0_18] : memref<128x128xf32, #tpu.memory_space<vmem>>, vector<128x128xf32>
    %cst_19 = arith.constant dense<0.000000e+00> : vector<16x128xf32>
    %32 = tpu.matmul %22, %31, %cst_19 {dimension_numbers = #tpu.dot_dimension_numbers<[1], [0], [0], [1], [0, 0, 1, 1], [], []>} : vector<16x128xf32>, vector<128x128xf32>, vector<16x128xf32> -> vector<16x128xf32>
    %c0_20 = arith.constant 0 : index
    %c0_21 = arith.constant 0 : index
    %33 = vector.load %arg5[%c0_20, %c0_21] : memref<1x128xf32, #tpu.memory_space<vmem>>, vector<1x128xf32>
    %34 = vector.broadcast %33 : vector<1x128xf32> to vector<16x128xf32>
    %35 = arith.addf %32, %34 : vector<16x128xf32>
    %c0_22 = arith.constant 0 : index
    %c0_23 = arith.constant 0 : index
    %c0_24 = arith.constant 0 : index
    %36 = vector.load %arg8[%c0_22, %c0_23, %c0_24] : memref<2x128x384xf32, #tpu.memory_space<vmem>>, vector<1x128x384xf32>
    %37 = vector.shape_cast %36 : vector<1x128x384xf32> to vector<128x384xf32>
    %cst_25 = arith.constant dense<0.000000e+00> : vector<16x384xf32>
    %38 = tpu.matmul %35, %37, %cst_25 {dimension_numbers = #tpu.dot_dimension_numbers<[1], [0], [0], [1], [0, 0, 1, 1], [], []>} : vector<16x128xf32>, vector<128x384xf32>, vector<16x384xf32> -> vector<16x384xf32>
    %c0_26 = arith.constant 0 : index
    %c0_27 = arith.constant 0 : index
    %c0_28 = arith.constant 0 : index
    %39 = vector.load %arg9[%c0_26, %c0_27, %c0_28] : memref<2x1x384xf32, #tpu.memory_space<vmem>>, vector<1x1x384xf32>
    %40 = vector.shape_cast %39 : vector<1x1x384xf32> to vector<1x384xf32>
    %41 = vector.broadcast %40 : vector<1x384xf32> to vector<16x384xf32>
    %42 = arith.addf %38, %41 : vector<16x384xf32>
    %c1 = arith.constant 1 : index
    %c0_29 = arith.constant 0 : index
    %c0_30 = arith.constant 0 : index
    %43 = vector.load %arg8[%c1, %c0_29, %c0_30] : memref<2x128x384xf32, #tpu.memory_space<vmem>>, vector<1x128x384xf32>
    %44 = vector.shape_cast %43 : vector<1x128x384xf32> to vector<128x384xf32>
    %cst_31 = arith.constant dense<0.000000e+00> : vector<16x384xf32>
    %45 = tpu.matmul %35, %44, %cst_31 {dimension_numbers = #tpu.dot_dimension_numbers<[1], [0], [0], [1], [0, 0, 1, 1], [], []>} : vector<16x128xf32>, vector<128x384xf32>, vector<16x384xf32> -> vector<16x384xf32>
    %c1_32 = arith.constant 1 : index
    %c0_33 = arith.constant 0 : index
    %c0_34 = arith.constant 0 : index
    %46 = vector.load %arg9[%c1_32, %c0_33, %c0_34] : memref<2x1x384xf32, #tpu.memory_space<vmem>>, vector<1x1x384xf32>
    %47 = vector.shape_cast %46 : vector<1x1x384xf32> to vector<1x384xf32>
    %48 = vector.broadcast %47 : vector<1x384xf32> to vector<16x384xf32>
    %49 = arith.addf %45, %48 : vector<16x384xf32>
    %c0_35 = arith.constant 0 : index
    %c0_36 = arith.constant 0 : index
    %50 = vector.load %arg10[%c0_35, %c0_36] : memref<16x384xf32, #tpu.memory_space<vmem>>, vector<16x384xf32>
    tpu.vector_store %arg10[%c0_35, %c0_36], %42 {strides = array<i32>} : memref<16x384xf32, #tpu.memory_space<vmem>>, vector<16x384xf32>,
    %c0_37 = arith.constant 0 : index
    %c0_38 = arith.constant 0 : index
    %51 = vector.load %arg11[%c0_37, %c0_38] : memref<16x384xf32, #tpu.memory_space<vmem>>, vector<16x384xf32>
    tpu.vector_store %arg11[%c0_37, %c0_38], %49 {strides = array<i32>} : memref<16x384xf32, #tpu.memory_space<vmem>>, vector<16x384xf32>,
    return
  }
  func.func @transform_0(%arg0: i32) -> (i32, i32) {
    %c0_i32 = arith.constant 0 : i32
    %c0_i32_0 = arith.constant 0 : i32
    return %arg0, %c0_i32 : i32, i32
  }
  func.func @transform_1(%arg0: i32) -> (i32, i32) {
    %c0_i32 = arith.constant 0 : i32
    %c0_i32_0 = arith.constant 0 : i32
    %c0_i32_1 = arith.constant 0 : i32
    return %c0_i32, %c0_i32_0 : i32, i32
  }
  func.func @transform_2(%arg0: i32) -> (i32, i32) {
    %c0_i32 = arith.constant 0 : i32
    %c0_i32_0 = arith.constant 0 : i32
    %c0_i32_1 = arith.constant 0 : i32
    return %c0_i32, %c0_i32_0 : i32, i32
  }
  func.func @transform_3(%arg0: i32) -> (i32, i32) {
    %c0_i32 = arith.constant 0 : i32
    %c0_i32_0 = arith.constant 0 : i32
    %c0_i32_1 = arith.constant 0 : i32
    return %c0_i32, %c0_i32_0 : i32, i32
  }
  func.func @transform_4(%arg0: i32) -> (i32, i32) {
    %c0_i32 = arith.constant 0 : i32
    %c0_i32_0 = arith.constant 0 : i32
    %c0_i32_1 = arith.constant 0 : i32
    return %c0_i32, %c0_i32_0 : i32, i32
  }
  func.func @transform_5(%arg0: i32) -> (i32, i32) {
    %c0_i32 = arith.constant 0 : i32
    %c0_i32_0 = arith.constant 0 : i32
    %c0_i32_1 = arith.constant 0 : i32
    return %c0_i32, %c0_i32_0 : i32, i32
  }
  func.func @transform_6(%arg0: i32) -> (i32, i32) {
    %c0_i32 = arith.constant 0 : i32
    %c0_i32_0 = arith.constant 0 : i32
    %c0_i32_1 = arith.constant 0 : i32
    return %c0_i32, %c0_i32_0 : i32, i32
  }
  func.func @transform_7(%arg0: i32) -> (i32, i32, i32) {
    %c0_i32 = arith.constant 0 : i32
    %c0_i32_0 = arith.constant 0 : i32
    %c0_i32_1 = arith.constant 0 : i32
    %c0_i32_2 = arith.constant 0 : i32
    return %c0_i32, %c0_i32_0, %c0_i32_1 : i32, i32, i32
  }
  func.func @transform_8(%arg0: i32) -> (i32, i32, i32) {
    %c0_i32 = arith.constant 0 : i32
    %c0_i32_0 = arith.constant 0 : i32
    %c0_i32_1 = arith.constant 0 : i32
    %c0_i32_2 = arith.constant 0 : i32
    return %c0_i32, %c0_i32_0, %c0_i32_1 : i32, i32, i32
  }
  func.func @transform_9(%arg0: i32) -> (i32, i32) {
    %c0_i32 = arith.constant 0 : i32
    %c0_i32_0 = arith.constant 0 : i32
    return %arg0, %c0_i32 : i32, i32
  }
  func.func @transform_10(%arg0: i32) -> (i32, i32) {
    %c0_i32 = arith.constant 0 : i32
    %c0_i32_0 = arith.constant 0 : i32
    return %arg0, %c0_i32 : i32, i32
  }
  func.func @transform_11(%arg0: i32) -> (i32, i32) {
    %c0_i32 = arith.constant 0 : i32
    %c0_i32_0 = arith.constant 0 : i32
    return %arg0, %c0_i32 : i32, i32
  }
}

module attributes {stable_mosaic.version = 11 : i64} {
  func.func @_gru_kernel(%arg0: i32, %arg1: memref<2x8x384xf32, #tpu.memory_space<vmem>>, %arg2: memref<2x8x384xf32, #tpu.memory_space<vmem>>, %arg3: memref<2x128x384xf32, #tpu.memory_space<vmem>>, %arg4: memref<2x1x384xf32, #tpu.memory_space<vmem>>, %arg5: memref<2x8x128xf32, #tpu.memory_space<vmem>>, %arg6: memref<2x8x128xf32, #tpu.memory_space<vmem>>, %arg7: memref<2x128xf32, #tpu.memory_space<vmem>>, %arg8: memref<2x128xf32, #tpu.memory_space<vmem>>) attributes {dimension_semantics = [#tpu.dimension_semantics<arbitrary>], iteration_bounds = array<i64: 1>, scalar_prefetch = 0 : i64, scratch_operands = 2 : i64, tpu.core_type = #tpu.core_type<tc>, window_params = [{transform_indices = @transform_0, window_bounds = array<i64: 2, 8, 384>}, {transform_indices = @transform_1, window_bounds = array<i64: 2, 8, 384>}, {pipeline_mode = #tpu.pipeline_mode<synchronous>, transform_indices = @transform_2, window_bounds = array<i64: 2, 128, 384>}, {pipeline_mode = #tpu.pipeline_mode<synchronous>, transform_indices = @transform_3, window_bounds = array<i64: 2, 1, 384>}, {transform_indices = @transform_4, window_bounds = array<i64: 2, 8, 128>}, {transform_indices = @transform_5, window_bounds = array<i64: 2, 8, 128>}]} {
    %c0_i32 = arith.constant 0 : i32
    %0 = arith.cmpi eq, %arg0, %c0_i32 : i32
    %1 = arith.extui %0 : i1 to i32
    %c0_i32_0 = arith.constant 0 : i32
    %2 = arith.cmpi ne, %1, %c0_i32_0 : i32
    scf.if %2 {
      %cst_172 = arith.constant 0.000000e+00 : f32
      %547 = vector.broadcast %cst_172 : f32 to vector<2x128xf32>
      %c0_173 = arith.constant 0 : index
      %c0_174 = arith.constant 0 : index
      %548 = vector.load %arg7[%c0_173, %c0_174] : memref<2x128xf32, #tpu.memory_space<vmem>>, vector<2x128xf32>
      tpu.vector_store %arg7[%c0_173, %c0_174], %547 {strides = array<i32>} : memref<2x128xf32, #tpu.memory_space<vmem>>, vector<2x128xf32>,
      %cst_175 = arith.constant 0.000000e+00 : f32
      %549 = vector.broadcast %cst_175 : f32 to vector<2x128xf32>
      %c0_176 = arith.constant 0 : index
      %c0_177 = arith.constant 0 : index
      %550 = vector.load %arg8[%c0_176, %c0_177] : memref<2x128xf32, #tpu.memory_space<vmem>>, vector<2x128xf32>
      tpu.vector_store %arg8[%c0_176, %c0_177], %549 {strides = array<i32>} : memref<2x128xf32, #tpu.memory_space<vmem>>, vector<2x128xf32>,
    } else {
    }
    %c0 = arith.constant 0 : index
    %c0_1 = arith.constant 0 : index
    %c0_2 = arith.constant 0 : index
    %3 = vector.load %arg3[%c0, %c0_1, %c0_2] : memref<2x128x384xf32, #tpu.memory_space<vmem>>, vector<1x128x384xf32>
    %4 = vector.shape_cast %3 : vector<1x128x384xf32> to vector<128x384xf32>
    %c1 = arith.constant 1 : index
    %c0_3 = arith.constant 0 : index
    %c0_4 = arith.constant 0 : index
    %5 = vector.load %arg3[%c1, %c0_3, %c0_4] : memref<2x128x384xf32, #tpu.memory_space<vmem>>, vector<1x128x384xf32>
    %6 = vector.shape_cast %5 : vector<1x128x384xf32> to vector<128x384xf32>
    %c0_5 = arith.constant 0 : index
    %c0_6 = arith.constant 0 : index
    %c0_7 = arith.constant 0 : index
    %7 = vector.load %arg4[%c0_5, %c0_6, %c0_7] : memref<2x1x384xf32, #tpu.memory_space<vmem>>, vector<1x1x384xf32>
    %8 = vector.shape_cast %7 : vector<1x1x384xf32> to vector<1x384xf32>
    %9 = vector.shape_cast %8 : vector<1x384xf32> to vector<1x384xf32>
    %10 = vector.broadcast %9 : vector<1x384xf32> to vector<2x384xf32>
    %c1_8 = arith.constant 1 : index
    %c0_9 = arith.constant 0 : index
    %c0_10 = arith.constant 0 : index
    %11 = vector.load %arg4[%c1_8, %c0_9, %c0_10] : memref<2x1x384xf32, #tpu.memory_space<vmem>>, vector<1x1x384xf32>
    %12 = vector.shape_cast %11 : vector<1x1x384xf32> to vector<1x384xf32>
    %13 = vector.shape_cast %12 : vector<1x384xf32> to vector<1x384xf32>
    %14 = vector.broadcast %13 : vector<1x384xf32> to vector<2x384xf32>
    %c0_11 = arith.constant 0 : index
    %c0_12 = arith.constant 0 : index
    %15 = vector.load %arg7[%c0_11, %c0_12] : memref<2x128xf32, #tpu.memory_space<vmem>>, vector<2x128xf32>
    %c0_13 = arith.constant 0 : index
    %c0_14 = arith.constant 0 : index
    %16 = vector.load %arg8[%c0_13, %c0_14] : memref<2x128xf32, #tpu.memory_space<vmem>>, vector<2x128xf32>
    %c0_15 = arith.constant 0 : index
    %c0_16 = arith.constant 0 : index
    %c0_17 = arith.constant 0 : index
    %17 = vector.load %arg1[%c0_15, %c0_16, %c0_17] : memref<2x8x384xf32, #tpu.memory_space<vmem>>, vector<2x1x384xf32>
    %18 = vector.shape_cast %17 : vector<2x1x384xf32> to vector<2x384xf32>
    %cst = arith.constant dense<0.000000e+00> : vector<2x384xf32>
    %19 = tpu.matmul %15, %4, %cst {dimension_numbers = #tpu.dot_dimension_numbers<[1], [0], [0], [1], [0, 0, 1, 1], [], []>} : vector<2x128xf32>, vector<128x384xf32>, vector<2x384xf32> -> vector<2x384xf32>
    %20 = arith.addf %19, %10 : vector<2x384xf32>
    %21 = vector.extract_strided_slice %18 {offsets = [0, 0], sizes = [2, 128], strides = [1, 1]} : vector<2x384xf32> to vector<2x128xf32>
    %22 = vector.extract_strided_slice %20 {offsets = [0, 0], sizes = [2, 128], strides = [1, 1]} : vector<2x384xf32> to vector<2x128xf32>
    %23 = arith.addf %21, %22 : vector<2x128xf32>
    %24 = arith.negf %23 : vector<2x128xf32>
    %25 = math.exp %24 : vector<2x128xf32>
    %cst_18 = arith.constant 1.000000e+00 : f32
    %26 = vector.broadcast %cst_18 : f32 to vector<2x128xf32>
    %27 = arith.addf %26, %25 : vector<2x128xf32>
    %28 = arith.divf %26, %27 : vector<2x128xf32>
    %29 = vector.extract_strided_slice %18 {offsets = [0, 128], sizes = [2, 128], strides = [1, 1]} : vector<2x384xf32> to vector<2x128xf32>
    %30 = vector.extract_strided_slice %20 {offsets = [0, 128], sizes = [2, 128], strides = [1, 1]} : vector<2x384xf32> to vector<2x128xf32>
    %31 = arith.addf %29, %30 : vector<2x128xf32>
    %32 = arith.negf %31 : vector<2x128xf32>
    %33 = math.exp %32 : vector<2x128xf32>
    %cst_19 = arith.constant 1.000000e+00 : f32
    %34 = vector.broadcast %cst_19 : f32 to vector<2x128xf32>
    %35 = arith.addf %34, %33 : vector<2x128xf32>
    %36 = arith.divf %34, %35 : vector<2x128xf32>
    %37 = vector.extract_strided_slice %18 {offsets = [0, 256], sizes = [2, 128], strides = [1, 1]} : vector<2x384xf32> to vector<2x128xf32>
    %38 = vector.extract_strided_slice %20 {offsets = [0, 256], sizes = [2, 128], strides = [1, 1]} : vector<2x384xf32> to vector<2x128xf32>
    %39 = arith.mulf %28, %38 : vector<2x128xf32>
    %40 = arith.addf %37, %39 : vector<2x128xf32>
    %41 = math.tanh %40 : vector<2x128xf32>
    %cst_20 = arith.constant 1.000000e+00 : f32
    %42 = vector.broadcast %cst_20 : f32 to vector<2x128xf32>
    %43 = arith.subf %42, %36 : vector<2x128xf32>
    %44 = arith.mulf %43, %41 : vector<2x128xf32>
    %45 = arith.mulf %36, %15 : vector<2x128xf32>
    %46 = arith.addf %44, %45 : vector<2x128xf32>
    %c0_21 = arith.constant 0 : index
    %c0_22 = arith.constant 0 : index
    %c0_23 = arith.constant 0 : index
    %47 = vector.load %arg5[%c0_21, %c0_22, %c0_23] : memref<2x8x128xf32, #tpu.memory_space<vmem>>, vector<2x1x128xf32>
    %48 = vector.shape_cast %47 : vector<2x1x128xf32> to vector<2x128xf32>
    %49 = vector.shape_cast %46 : vector<2x128xf32> to vector<2x1x128xf32>
    tpu.vector_store %arg5[%c0_21, %c0_22, %c0_23], %49 {strides = array<i32>} : memref<2x8x128xf32, #tpu.memory_space<vmem>>, vector<2x1x128xf32>,
    %c0_24 = arith.constant 0 : index
    %c7 = arith.constant 7 : index
    %c0_25 = arith.constant 0 : index
    %50 = vector.load %arg2[%c0_24, %c7, %c0_25] : memref<2x8x384xf32, #tpu.memory_space<vmem>>, vector<2x1x384xf32>
    %51 = vector.shape_cast %50 : vector<2x1x384xf32> to vector<2x384xf32>
    %cst_26 = arith.constant dense<0.000000e+00> : vector<2x384xf32>
    %52 = tpu.matmul %16, %6, %cst_26 {dimension_numbers = #tpu.dot_dimension_numbers<[1], [0], [0], [1], [0, 0, 1, 1], [], []>} : vector<2x128xf32>, vector<128x384xf32>, vector<2x384xf32> -> vector<2x384xf32>
    %53 = arith.addf %52, %14 : vector<2x384xf32>
    %54 = vector.extract_strided_slice %51 {offsets = [0, 0], sizes = [2, 128], strides = [1, 1]} : vector<2x384xf32> to vector<2x128xf32>
    %55 = vector.extract_strided_slice %53 {offsets = [0, 0], sizes = [2, 128], strides = [1, 1]} : vector<2x384xf32> to vector<2x128xf32>
    %56 = arith.addf %54, %55 : vector<2x128xf32>
    %57 = arith.negf %56 : vector<2x128xf32>
    %58 = math.exp %57 : vector<2x128xf32>
    %cst_27 = arith.constant 1.000000e+00 : f32
    %59 = vector.broadcast %cst_27 : f32 to vector<2x128xf32>
    %60 = arith.addf %59, %58 : vector<2x128xf32>
    %61 = arith.divf %59, %60 : vector<2x128xf32>
    %62 = vector.extract_strided_slice %51 {offsets = [0, 128], sizes = [2, 128], strides = [1, 1]} : vector<2x384xf32> to vector<2x128xf32>
    %63 = vector.extract_strided_slice %53 {offsets = [0, 128], sizes = [2, 128], strides = [1, 1]} : vector<2x384xf32> to vector<2x128xf32>
    %64 = arith.addf %62, %63 : vector<2x128xf32>
    %65 = arith.negf %64 : vector<2x128xf32>
    %66 = math.exp %65 : vector<2x128xf32>
    %cst_28 = arith.constant 1.000000e+00 : f32
    %67 = vector.broadcast %cst_28 : f32 to vector<2x128xf32>
    %68 = arith.addf %67, %66 : vector<2x128xf32>
    %69 = arith.divf %67, %68 : vector<2x128xf32>
    %70 = vector.extract_strided_slice %51 {offsets = [0, 256], sizes = [2, 128], strides = [1, 1]} : vector<2x384xf32> to vector<2x128xf32>
    %71 = vector.extract_strided_slice %53 {offsets = [0, 256], sizes = [2, 128], strides = [1, 1]} : vector<2x384xf32> to vector<2x128xf32>
    %72 = arith.mulf %61, %71 : vector<2x128xf32>
    %73 = arith.addf %70, %72 : vector<2x128xf32>
    %74 = math.tanh %73 : vector<2x128xf32>
    %cst_29 = arith.constant 1.000000e+00 : f32
    %75 = vector.broadcast %cst_29 : f32 to vector<2x128xf32>
    %76 = arith.subf %75, %69 : vector<2x128xf32>
    %77 = arith.mulf %76, %74 : vector<2x128xf32>
    %78 = arith.mulf %69, %16 : vector<2x128xf32>
    %79 = arith.addf %77, %78 : vector<2x128xf32>
    %c0_30 = arith.constant 0 : index
    %c7_31 = arith.constant 7 : index
    %c0_32 = arith.constant 0 : index
    %80 = vector.load %arg6[%c0_30, %c7_31, %c0_32] : memref<2x8x128xf32, #tpu.memory_space<vmem>>, vector<2x1x128xf32>
    %81 = vector.shape_cast %80 : vector<2x1x128xf32> to vector<2x128xf32>
    %82 = vector.shape_cast %79 : vector<2x128xf32> to vector<2x1x128xf32>
    tpu.vector_store %arg6[%c0_30, %c7_31, %c0_32], %82 {strides = array<i32>} : memref<2x8x128xf32, #tpu.memory_space<vmem>>, vector<2x1x128xf32>,
    %c0_33 = arith.constant 0 : index
    %c1_34 = arith.constant 1 : index
    %c0_35 = arith.constant 0 : index
    %83 = vector.load %arg1[%c0_33, %c1_34, %c0_35] : memref<2x8x384xf32, #tpu.memory_space<vmem>>, vector<2x1x384xf32>
    %84 = vector.shape_cast %83 : vector<2x1x384xf32> to vector<2x384xf32>
    %cst_36 = arith.constant dense<0.000000e+00> : vector<2x384xf32>
    %85 = tpu.matmul %46, %4, %cst_36 {dimension_numbers = #tpu.dot_dimension_numbers<[1], [0], [0], [1], [0, 0, 1, 1], [], []>} : vector<2x128xf32>, vector<128x384xf32>, vector<2x384xf32> -> vector<2x384xf32>
    %86 = arith.addf %85, %10 : vector<2x384xf32>
    %87 = vector.extract_strided_slice %84 {offsets = [0, 0], sizes = [2, 128], strides = [1, 1]} : vector<2x384xf32> to vector<2x128xf32>
    %88 = vector.extract_strided_slice %86 {offsets = [0, 0], sizes = [2, 128], strides = [1, 1]} : vector<2x384xf32> to vector<2x128xf32>
    %89 = arith.addf %87, %88 : vector<2x128xf32>
    %90 = arith.negf %89 : vector<2x128xf32>
    %91 = math.exp %90 : vector<2x128xf32>
    %cst_37 = arith.constant 1.000000e+00 : f32
    %92 = vector.broadcast %cst_37 : f32 to vector<2x128xf32>
    %93 = arith.addf %92, %91 : vector<2x128xf32>
    %94 = arith.divf %92, %93 : vector<2x128xf32>
    %95 = vector.extract_strided_slice %84 {offsets = [0, 128], sizes = [2, 128], strides = [1, 1]} : vector<2x384xf32> to vector<2x128xf32>
    %96 = vector.extract_strided_slice %86 {offsets = [0, 128], sizes = [2, 128], strides = [1, 1]} : vector<2x384xf32> to vector<2x128xf32>
    %97 = arith.addf %95, %96 : vector<2x128xf32>
    %98 = arith.negf %97 : vector<2x128xf32>
    %99 = math.exp %98 : vector<2x128xf32>
    %cst_38 = arith.constant 1.000000e+00 : f32
    %100 = vector.broadcast %cst_38 : f32 to vector<2x128xf32>
    %101 = arith.addf %100, %99 : vector<2x128xf32>
    %102 = arith.divf %100, %101 : vector<2x128xf32>
    %103 = vector.extract_strided_slice %84 {offsets = [0, 256], sizes = [2, 128], strides = [1, 1]} : vector<2x384xf32> to vector<2x128xf32>
    %104 = vector.extract_strided_slice %86 {offsets = [0, 256], sizes = [2, 128], strides = [1, 1]} : vector<2x384xf32> to vector<2x128xf32>
    %105 = arith.mulf %94, %104 : vector<2x128xf32>
    %106 = arith.addf %103, %105 : vector<2x128xf32>
    %107 = math.tanh %106 : vector<2x128xf32>
    %cst_39 = arith.constant 1.000000e+00 : f32
    %108 = vector.broadcast %cst_39 : f32 to vector<2x128xf32>
    %109 = arith.subf %108, %102 : vector<2x128xf32>
    %110 = arith.mulf %109, %107 : vector<2x128xf32>
    %111 = arith.mulf %102, %46 : vector<2x128xf32>
    %112 = arith.addf %110, %111 : vector<2x128xf32>
    %c0_40 = arith.constant 0 : index
    %c1_41 = arith.constant 1 : index
    %c0_42 = arith.constant 0 : index
    %113 = vector.load %arg5[%c0_40, %c1_41, %c0_42] : memref<2x8x128xf32, #tpu.memory_space<vmem>>, vector<2x1x128xf32>
    %114 = vector.shape_cast %113 : vector<2x1x128xf32> to vector<2x128xf32>
    %115 = vector.shape_cast %112 : vector<2x128xf32> to vector<2x1x128xf32>
    tpu.vector_store %arg5[%c0_40, %c1_41, %c0_42], %115 {strides = array<i32>} : memref<2x8x128xf32, #tpu.memory_space<vmem>>, vector<2x1x128xf32>,
    %c0_43 = arith.constant 0 : index
    %c6 = arith.constant 6 : index
    %c0_44 = arith.constant 0 : index
    %116 = vector.load %arg2[%c0_43, %c6, %c0_44] : memref<2x8x384xf32, #tpu.memory_space<vmem>>, vector<2x1x384xf32>
    %117 = vector.shape_cast %116 : vector<2x1x384xf32> to vector<2x384xf32>
    %cst_45 = arith.constant dense<0.000000e+00> : vector<2x384xf32>
    %118 = tpu.matmul %79, %6, %cst_45 {dimension_numbers = #tpu.dot_dimension_numbers<[1], [0], [0], [1], [0, 0, 1, 1], [], []>} : vector<2x128xf32>, vector<128x384xf32>, vector<2x384xf32> -> vector<2x384xf32>
    %119 = arith.addf %118, %14 : vector<2x384xf32>
    %120 = vector.extract_strided_slice %117 {offsets = [0, 0], sizes = [2, 128], strides = [1, 1]} : vector<2x384xf32> to vector<2x128xf32>
    %121 = vector.extract_strided_slice %119 {offsets = [0, 0], sizes = [2, 128], strides = [1, 1]} : vector<2x384xf32> to vector<2x128xf32>
    %122 = arith.addf %120, %121 : vector<2x128xf32>
    %123 = arith.negf %122 : vector<2x128xf32>
    %124 = math.exp %123 : vector<2x128xf32>
    %cst_46 = arith.constant 1.000000e+00 : f32
    %125 = vector.broadcast %cst_46 : f32 to vector<2x128xf32>
    %126 = arith.addf %125, %124 : vector<2x128xf32>
    %127 = arith.divf %125, %126 : vector<2x128xf32>
    %128 = vector.extract_strided_slice %117 {offsets = [0, 128], sizes = [2, 128], strides = [1, 1]} : vector<2x384xf32> to vector<2x128xf32>
    %129 = vector.extract_strided_slice %119 {offsets = [0, 128], sizes = [2, 128], strides = [1, 1]} : vector<2x384xf32> to vector<2x128xf32>
    %130 = arith.addf %128, %129 : vector<2x128xf32>
    %131 = arith.negf %130 : vector<2x128xf32>
    %132 = math.exp %131 : vector<2x128xf32>
    %cst_47 = arith.constant 1.000000e+00 : f32
    %133 = vector.broadcast %cst_47 : f32 to vector<2x128xf32>
    %134 = arith.addf %133, %132 : vector<2x128xf32>
    %135 = arith.divf %133, %134 : vector<2x128xf32>
    %136 = vector.extract_strided_slice %117 {offsets = [0, 256], sizes = [2, 128], strides = [1, 1]} : vector<2x384xf32> to vector<2x128xf32>
    %137 = vector.extract_strided_slice %119 {offsets = [0, 256], sizes = [2, 128], strides = [1, 1]} : vector<2x384xf32> to vector<2x128xf32>
    %138 = arith.mulf %127, %137 : vector<2x128xf32>
    %139 = arith.addf %136, %138 : vector<2x128xf32>
    %140 = math.tanh %139 : vector<2x128xf32>
    %cst_48 = arith.constant 1.000000e+00 : f32
    %141 = vector.broadcast %cst_48 : f32 to vector<2x128xf32>
    %142 = arith.subf %141, %135 : vector<2x128xf32>
    %143 = arith.mulf %142, %140 : vector<2x128xf32>
    %144 = arith.mulf %135, %79 : vector<2x128xf32>
    %145 = arith.addf %143, %144 : vector<2x128xf32>
    %c0_49 = arith.constant 0 : index
    %c6_50 = arith.constant 6 : index
    %c0_51 = arith.constant 0 : index
    %146 = vector.load %arg6[%c0_49, %c6_50, %c0_51] : memref<2x8x128xf32, #tpu.memory_space<vmem>>, vector<2x1x128xf32>
    %147 = vector.shape_cast %146 : vector<2x1x128xf32> to vector<2x128xf32>
    %148 = vector.shape_cast %145 : vector<2x128xf32> to vector<2x1x128xf32>
    tpu.vector_store %arg6[%c0_49, %c6_50, %c0_51], %148 {strides = array<i32>} : memref<2x8x128xf32, #tpu.memory_space<vmem>>, vector<2x1x128xf32>,
    %c0_52 = arith.constant 0 : index
    %c2 = arith.constant 2 : index
    %c0_53 = arith.constant 0 : index
    %149 = vector.load %arg1[%c0_52, %c2, %c0_53] : memref<2x8x384xf32, #tpu.memory_space<vmem>>, vector<2x1x384xf32>
    %150 = vector.shape_cast %149 : vector<2x1x384xf32> to vector<2x384xf32>
    %cst_54 = arith.constant dense<0.000000e+00> : vector<2x384xf32>
    %151 = tpu.matmul %112, %4, %cst_54 {dimension_numbers = #tpu.dot_dimension_numbers<[1], [0], [0], [1], [0, 0, 1, 1], [], []>} : vector<2x128xf32>, vector<128x384xf32>, vector<2x384xf32> -> vector<2x384xf32>
    %152 = arith.addf %151, %10 : vector<2x384xf32>
    %153 = vector.extract_strided_slice %150 {offsets = [0, 0], sizes = [2, 128], strides = [1, 1]} : vector<2x384xf32> to vector<2x128xf32>
    %154 = vector.extract_strided_slice %152 {offsets = [0, 0], sizes = [2, 128], strides = [1, 1]} : vector<2x384xf32> to vector<2x128xf32>
    %155 = arith.addf %153, %154 : vector<2x128xf32>
    %156 = arith.negf %155 : vector<2x128xf32>
    %157 = math.exp %156 : vector<2x128xf32>
    %cst_55 = arith.constant 1.000000e+00 : f32
    %158 = vector.broadcast %cst_55 : f32 to vector<2x128xf32>
    %159 = arith.addf %158, %157 : vector<2x128xf32>
    %160 = arith.divf %158, %159 : vector<2x128xf32>
    %161 = vector.extract_strided_slice %150 {offsets = [0, 128], sizes = [2, 128], strides = [1, 1]} : vector<2x384xf32> to vector<2x128xf32>
    %162 = vector.extract_strided_slice %152 {offsets = [0, 128], sizes = [2, 128], strides = [1, 1]} : vector<2x384xf32> to vector<2x128xf32>
    %163 = arith.addf %161, %162 : vector<2x128xf32>
    %164 = arith.negf %163 : vector<2x128xf32>
    %165 = math.exp %164 : vector<2x128xf32>
    %cst_56 = arith.constant 1.000000e+00 : f32
    %166 = vector.broadcast %cst_56 : f32 to vector<2x128xf32>
    %167 = arith.addf %166, %165 : vector<2x128xf32>
    %168 = arith.divf %166, %167 : vector<2x128xf32>
    %169 = vector.extract_strided_slice %150 {offsets = [0, 256], sizes = [2, 128], strides = [1, 1]} : vector<2x384xf32> to vector<2x128xf32>
    %170 = vector.extract_strided_slice %152 {offsets = [0, 256], sizes = [2, 128], strides = [1, 1]} : vector<2x384xf32> to vector<2x128xf32>
    %171 = arith.mulf %160, %170 : vector<2x128xf32>
    %172 = arith.addf %169, %171 : vector<2x128xf32>
    %173 = math.tanh %172 : vector<2x128xf32>
    %cst_57 = arith.constant 1.000000e+00 : f32
    %174 = vector.broadcast %cst_57 : f32 to vector<2x128xf32>
    %175 = arith.subf %174, %168 : vector<2x128xf32>
    %176 = arith.mulf %175, %173 : vector<2x128xf32>
    %177 = arith.mulf %168, %112 : vector<2x128xf32>
    %178 = arith.addf %176, %177 : vector<2x128xf32>
    %c0_58 = arith.constant 0 : index
    %c2_59 = arith.constant 2 : index
    %c0_60 = arith.constant 0 : index
    %179 = vector.load %arg5[%c0_58, %c2_59, %c0_60] : memref<2x8x128xf32, #tpu.memory_space<vmem>>, vector<2x1x128xf32>
    %180 = vector.shape_cast %179 : vector<2x1x128xf32> to vector<2x128xf32>
    %181 = vector.shape_cast %178 : vector<2x128xf32> to vector<2x1x128xf32>
    tpu.vector_store %arg5[%c0_58, %c2_59, %c0_60], %181 {strides = array<i32>} : memref<2x8x128xf32, #tpu.memory_space<vmem>>, vector<2x1x128xf32>,
    %c0_61 = arith.constant 0 : index
    %c5 = arith.constant 5 : index
    %c0_62 = arith.constant 0 : index
    %182 = vector.load %arg2[%c0_61, %c5, %c0_62] : memref<2x8x384xf32, #tpu.memory_space<vmem>>, vector<2x1x384xf32>
    %183 = vector.shape_cast %182 : vector<2x1x384xf32> to vector<2x384xf32>
    %cst_63 = arith.constant dense<0.000000e+00> : vector<2x384xf32>
    %184 = tpu.matmul %145, %6, %cst_63 {dimension_numbers = #tpu.dot_dimension_numbers<[1], [0], [0], [1], [0, 0, 1, 1], [], []>} : vector<2x128xf32>, vector<128x384xf32>, vector<2x384xf32> -> vector<2x384xf32>
    %185 = arith.addf %184, %14 : vector<2x384xf32>
    %186 = vector.extract_strided_slice %183 {offsets = [0, 0], sizes = [2, 128], strides = [1, 1]} : vector<2x384xf32> to vector<2x128xf32>
    %187 = vector.extract_strided_slice %185 {offsets = [0, 0], sizes = [2, 128], strides = [1, 1]} : vector<2x384xf32> to vector<2x128xf32>
    %188 = arith.addf %186, %187 : vector<2x128xf32>
    %189 = arith.negf %188 : vector<2x128xf32>
    %190 = math.exp %189 : vector<2x128xf32>
    %cst_64 = arith.constant 1.000000e+00 : f32
    %191 = vector.broadcast %cst_64 : f32 to vector<2x128xf32>
    %192 = arith.addf %191, %190 : vector<2x128xf32>
    %193 = arith.divf %191, %192 : vector<2x128xf32>
    %194 = vector.extract_strided_slice %183 {offsets = [0, 128], sizes = [2, 128], strides = [1, 1]} : vector<2x384xf32> to vector<2x128xf32>
    %195 = vector.extract_strided_slice %185 {offsets = [0, 128], sizes = [2, 128], strides = [1, 1]} : vector<2x384xf32> to vector<2x128xf32>
    %196 = arith.addf %194, %195 : vector<2x128xf32>
    %197 = arith.negf %196 : vector<2x128xf32>
    %198 = math.exp %197 : vector<2x128xf32>
    %cst_65 = arith.constant 1.000000e+00 : f32
    %199 = vector.broadcast %cst_65 : f32 to vector<2x128xf32>
    %200 = arith.addf %199, %198 : vector<2x128xf32>
    %201 = arith.divf %199, %200 : vector<2x128xf32>
    %202 = vector.extract_strided_slice %183 {offsets = [0, 256], sizes = [2, 128], strides = [1, 1]} : vector<2x384xf32> to vector<2x128xf32>
    %203 = vector.extract_strided_slice %185 {offsets = [0, 256], sizes = [2, 128], strides = [1, 1]} : vector<2x384xf32> to vector<2x128xf32>
    %204 = arith.mulf %193, %203 : vector<2x128xf32>
    %205 = arith.addf %202, %204 : vector<2x128xf32>
    %206 = math.tanh %205 : vector<2x128xf32>
    %cst_66 = arith.constant 1.000000e+00 : f32
    %207 = vector.broadcast %cst_66 : f32 to vector<2x128xf32>
    %208 = arith.subf %207, %201 : vector<2x128xf32>
    %209 = arith.mulf %208, %206 : vector<2x128xf32>
    %210 = arith.mulf %201, %145 : vector<2x128xf32>
    %211 = arith.addf %209, %210 : vector<2x128xf32>
    %c0_67 = arith.constant 0 : index
    %c5_68 = arith.constant 5 : index
    %c0_69 = arith.constant 0 : index
    %212 = vector.load %arg6[%c0_67, %c5_68, %c0_69] : memref<2x8x128xf32, #tpu.memory_space<vmem>>, vector<2x1x128xf32>
    %213 = vector.shape_cast %212 : vector<2x1x128xf32> to vector<2x128xf32>
    %214 = vector.shape_cast %211 : vector<2x128xf32> to vector<2x1x128xf32>
    tpu.vector_store %arg6[%c0_67, %c5_68, %c0_69], %214 {strides = array<i32>} : memref<2x8x128xf32, #tpu.memory_space<vmem>>, vector<2x1x128xf32>,
    %c0_70 = arith.constant 0 : index
    %c3 = arith.constant 3 : index
    %c0_71 = arith.constant 0 : index
    %215 = vector.load %arg1[%c0_70, %c3, %c0_71] : memref<2x8x384xf32, #tpu.memory_space<vmem>>, vector<2x1x384xf32>
    %216 = vector.shape_cast %215 : vector<2x1x384xf32> to vector<2x384xf32>
    %cst_72 = arith.constant dense<0.000000e+00> : vector<2x384xf32>
    %217 = tpu.matmul %178, %4, %cst_72 {dimension_numbers = #tpu.dot_dimension_numbers<[1], [0], [0], [1], [0, 0, 1, 1], [], []>} : vector<2x128xf32>, vector<128x384xf32>, vector<2x384xf32> -> vector<2x384xf32>
    %218 = arith.addf %217, %10 : vector<2x384xf32>
    %219 = vector.extract_strided_slice %216 {offsets = [0, 0], sizes = [2, 128], strides = [1, 1]} : vector<2x384xf32> to vector<2x128xf32>
    %220 = vector.extract_strided_slice %218 {offsets = [0, 0], sizes = [2, 128], strides = [1, 1]} : vector<2x384xf32> to vector<2x128xf32>
    %221 = arith.addf %219, %220 : vector<2x128xf32>
    %222 = arith.negf %221 : vector<2x128xf32>
    %223 = math.exp %222 : vector<2x128xf32>
    %cst_73 = arith.constant 1.000000e+00 : f32
    %224 = vector.broadcast %cst_73 : f32 to vector<2x128xf32>
    %225 = arith.addf %224, %223 : vector<2x128xf32>
    %226 = arith.divf %224, %225 : vector<2x128xf32>
    %227 = vector.extract_strided_slice %216 {offsets = [0, 128], sizes = [2, 128], strides = [1, 1]} : vector<2x384xf32> to vector<2x128xf32>
    %228 = vector.extract_strided_slice %218 {offsets = [0, 128], sizes = [2, 128], strides = [1, 1]} : vector<2x384xf32> to vector<2x128xf32>
    %229 = arith.addf %227, %228 : vector<2x128xf32>
    %230 = arith.negf %229 : vector<2x128xf32>
    %231 = math.exp %230 : vector<2x128xf32>
    %cst_74 = arith.constant 1.000000e+00 : f32
    %232 = vector.broadcast %cst_74 : f32 to vector<2x128xf32>
    %233 = arith.addf %232, %231 : vector<2x128xf32>
    %234 = arith.divf %232, %233 : vector<2x128xf32>
    %235 = vector.extract_strided_slice %216 {offsets = [0, 256], sizes = [2, 128], strides = [1, 1]} : vector<2x384xf32> to vector<2x128xf32>
    %236 = vector.extract_strided_slice %218 {offsets = [0, 256], sizes = [2, 128], strides = [1, 1]} : vector<2x384xf32> to vector<2x128xf32>
    %237 = arith.mulf %226, %236 : vector<2x128xf32>
    %238 = arith.addf %235, %237 : vector<2x128xf32>
    %239 = math.tanh %238 : vector<2x128xf32>
    %cst_75 = arith.constant 1.000000e+00 : f32
    %240 = vector.broadcast %cst_75 : f32 to vector<2x128xf32>
    %241 = arith.subf %240, %234 : vector<2x128xf32>
    %242 = arith.mulf %241, %239 : vector<2x128xf32>
    %243 = arith.mulf %234, %178 : vector<2x128xf32>
    %244 = arith.addf %242, %243 : vector<2x128xf32>
    %c0_76 = arith.constant 0 : index
    %c3_77 = arith.constant 3 : index
    %c0_78 = arith.constant 0 : index
    %245 = vector.load %arg5[%c0_76, %c3_77, %c0_78] : memref<2x8x128xf32, #tpu.memory_space<vmem>>, vector<2x1x128xf32>
    %246 = vector.shape_cast %245 : vector<2x1x128xf32> to vector<2x128xf32>
    %247 = vector.shape_cast %244 : vector<2x128xf32> to vector<2x1x128xf32>
    tpu.vector_store %arg5[%c0_76, %c3_77, %c0_78], %247 {strides = array<i32>} : memref<2x8x128xf32, #tpu.memory_space<vmem>>, vector<2x1x128xf32>,
    %c0_79 = arith.constant 0 : index
    %c4 = arith.constant 4 : index
    %c0_80 = arith.constant 0 : index
    %248 = vector.load %arg2[%c0_79, %c4, %c0_80] : memref<2x8x384xf32, #tpu.memory_space<vmem>>, vector<2x1x384xf32>
    %249 = vector.shape_cast %248 : vector<2x1x384xf32> to vector<2x384xf32>
    %cst_81 = arith.constant dense<0.000000e+00> : vector<2x384xf32>
    %250 = tpu.matmul %211, %6, %cst_81 {dimension_numbers = #tpu.dot_dimension_numbers<[1], [0], [0], [1], [0, 0, 1, 1], [], []>} : vector<2x128xf32>, vector<128x384xf32>, vector<2x384xf32> -> vector<2x384xf32>
    %251 = arith.addf %250, %14 : vector<2x384xf32>
    %252 = vector.extract_strided_slice %249 {offsets = [0, 0], sizes = [2, 128], strides = [1, 1]} : vector<2x384xf32> to vector<2x128xf32>
    %253 = vector.extract_strided_slice %251 {offsets = [0, 0], sizes = [2, 128], strides = [1, 1]} : vector<2x384xf32> to vector<2x128xf32>
    %254 = arith.addf %252, %253 : vector<2x128xf32>
    %255 = arith.negf %254 : vector<2x128xf32>
    %256 = math.exp %255 : vector<2x128xf32>
    %cst_82 = arith.constant 1.000000e+00 : f32
    %257 = vector.broadcast %cst_82 : f32 to vector<2x128xf32>
    %258 = arith.addf %257, %256 : vector<2x128xf32>
    %259 = arith.divf %257, %258 : vector<2x128xf32>
    %260 = vector.extract_strided_slice %249 {offsets = [0, 128], sizes = [2, 128], strides = [1, 1]} : vector<2x384xf32> to vector<2x128xf32>
    %261 = vector.extract_strided_slice %251 {offsets = [0, 128], sizes = [2, 128], strides = [1, 1]} : vector<2x384xf32> to vector<2x128xf32>
    %262 = arith.addf %260, %261 : vector<2x128xf32>
    %263 = arith.negf %262 : vector<2x128xf32>
    %264 = math.exp %263 : vector<2x128xf32>
    %cst_83 = arith.constant 1.000000e+00 : f32
    %265 = vector.broadcast %cst_83 : f32 to vector<2x128xf32>
    %266 = arith.addf %265, %264 : vector<2x128xf32>
    %267 = arith.divf %265, %266 : vector<2x128xf32>
    %268 = vector.extract_strided_slice %249 {offsets = [0, 256], sizes = [2, 128], strides = [1, 1]} : vector<2x384xf32> to vector<2x128xf32>
    %269 = vector.extract_strided_slice %251 {offsets = [0, 256], sizes = [2, 128], strides = [1, 1]} : vector<2x384xf32> to vector<2x128xf32>
    %270 = arith.mulf %259, %269 : vector<2x128xf32>
    %271 = arith.addf %268, %270 : vector<2x128xf32>
    %272 = math.tanh %271 : vector<2x128xf32>
    %cst_84 = arith.constant 1.000000e+00 : f32
    %273 = vector.broadcast %cst_84 : f32 to vector<2x128xf32>
    %274 = arith.subf %273, %267 : vector<2x128xf32>
    %275 = arith.mulf %274, %272 : vector<2x128xf32>
    %276 = arith.mulf %267, %211 : vector<2x128xf32>
    %277 = arith.addf %275, %276 : vector<2x128xf32>
    %c0_85 = arith.constant 0 : index
    %c4_86 = arith.constant 4 : index
    %c0_87 = arith.constant 0 : index
    %278 = vector.load %arg6[%c0_85, %c4_86, %c0_87] : memref<2x8x128xf32, #tpu.memory_space<vmem>>, vector<2x1x128xf32>
    %279 = vector.shape_cast %278 : vector<2x1x128xf32> to vector<2x128xf32>
    %280 = vector.shape_cast %277 : vector<2x128xf32> to vector<2x1x128xf32>
    tpu.vector_store %arg6[%c0_85, %c4_86, %c0_87], %280 {strides = array<i32>} : memref<2x8x128xf32, #tpu.memory_space<vmem>>, vector<2x1x128xf32>,
    %c0_88 = arith.constant 0 : index
    %c4_89 = arith.constant 4 : index
    %c0_90 = arith.constant 0 : index
    %281 = vector.load %arg1[%c0_88, %c4_89, %c0_90] : memref<2x8x384xf32, #tpu.memory_space<vmem>>, vector<2x1x384xf32>
    %282 = vector.shape_cast %281 : vector<2x1x384xf32> to vector<2x384xf32>
    %cst_91 = arith.constant dense<0.000000e+00> : vector<2x384xf32>
    %283 = tpu.matmul %244, %4, %cst_91 {dimension_numbers = #tpu.dot_dimension_numbers<[1], [0], [0], [1], [0, 0, 1, 1], [], []>} : vector<2x128xf32>, vector<128x384xf32>, vector<2x384xf32> -> vector<2x384xf32>
    %284 = arith.addf %283, %10 : vector<2x384xf32>
    %285 = vector.extract_strided_slice %282 {offsets = [0, 0], sizes = [2, 128], strides = [1, 1]} : vector<2x384xf32> to vector<2x128xf32>
    %286 = vector.extract_strided_slice %284 {offsets = [0, 0], sizes = [2, 128], strides = [1, 1]} : vector<2x384xf32> to vector<2x128xf32>
    %287 = arith.addf %285, %286 : vector<2x128xf32>
    %288 = arith.negf %287 : vector<2x128xf32>
    %289 = math.exp %288 : vector<2x128xf32>
    %cst_92 = arith.constant 1.000000e+00 : f32
    %290 = vector.broadcast %cst_92 : f32 to vector<2x128xf32>
    %291 = arith.addf %290, %289 : vector<2x128xf32>
    %292 = arith.divf %290, %291 : vector<2x128xf32>
    %293 = vector.extract_strided_slice %282 {offsets = [0, 128], sizes = [2, 128], strides = [1, 1]} : vector<2x384xf32> to vector<2x128xf32>
    %294 = vector.extract_strided_slice %284 {offsets = [0, 128], sizes = [2, 128], strides = [1, 1]} : vector<2x384xf32> to vector<2x128xf32>
    %295 = arith.addf %293, %294 : vector<2x128xf32>
    %296 = arith.negf %295 : vector<2x128xf32>
    %297 = math.exp %296 : vector<2x128xf32>
    %cst_93 = arith.constant 1.000000e+00 : f32
    %298 = vector.broadcast %cst_93 : f32 to vector<2x128xf32>
    %299 = arith.addf %298, %297 : vector<2x128xf32>
    %300 = arith.divf %298, %299 : vector<2x128xf32>
    %301 = vector.extract_strided_slice %282 {offsets = [0, 256], sizes = [2, 128], strides = [1, 1]} : vector<2x384xf32> to vector<2x128xf32>
    %302 = vector.extract_strided_slice %284 {offsets = [0, 256], sizes = [2, 128], strides = [1, 1]} : vector<2x384xf32> to vector<2x128xf32>
    %303 = arith.mulf %292, %302 : vector<2x128xf32>
    %304 = arith.addf %301, %303 : vector<2x128xf32>
    %305 = math.tanh %304 : vector<2x128xf32>
    %cst_94 = arith.constant 1.000000e+00 : f32
    %306 = vector.broadcast %cst_94 : f32 to vector<2x128xf32>
    %307 = arith.subf %306, %300 : vector<2x128xf32>
    %308 = arith.mulf %307, %305 : vector<2x128xf32>
    %309 = arith.mulf %300, %244 : vector<2x128xf32>
    %310 = arith.addf %308, %309 : vector<2x128xf32>
    %c0_95 = arith.constant 0 : index
    %c4_96 = arith.constant 4 : index
    %c0_97 = arith.constant 0 : index
    %311 = vector.load %arg5[%c0_95, %c4_96, %c0_97] : memref<2x8x128xf32, #tpu.memory_space<vmem>>, vector<2x1x128xf32>
    %312 = vector.shape_cast %311 : vector<2x1x128xf32> to vector<2x128xf32>
    %313 = vector.shape_cast %310 : vector<2x128xf32> to vector<2x1x128xf32>
    tpu.vector_store %arg5[%c0_95, %c4_96, %c0_97], %313 {strides = array<i32>} : memref<2x8x128xf32, #tpu.memory_space<vmem>>, vector<2x1x128xf32>,
    %c0_98 = arith.constant 0 : index
    %c3_99 = arith.constant 3 : index
    %c0_100 = arith.constant 0 : index
    %314 = vector.load %arg2[%c0_98, %c3_99, %c0_100] : memref<2x8x384xf32, #tpu.memory_space<vmem>>, vector<2x1x384xf32>
    %315 = vector.shape_cast %314 : vector<2x1x384xf32> to vector<2x384xf32>
    %cst_101 = arith.constant dense<0.000000e+00> : vector<2x384xf32>
    %316 = tpu.matmul %277, %6, %cst_101 {dimension_numbers = #tpu.dot_dimension_numbers<[1], [0], [0], [1], [0, 0, 1, 1], [], []>} : vector<2x128xf32>, vector<128x384xf32>, vector<2x384xf32> -> vector<2x384xf32>
    %317 = arith.addf %316, %14 : vector<2x384xf32>
    %318 = vector.extract_strided_slice %315 {offsets = [0, 0], sizes = [2, 128], strides = [1, 1]} : vector<2x384xf32> to vector<2x128xf32>
    %319 = vector.extract_strided_slice %317 {offsets = [0, 0], sizes = [2, 128], strides = [1, 1]} : vector<2x384xf32> to vector<2x128xf32>
    %320 = arith.addf %318, %319 : vector<2x128xf32>
    %321 = arith.negf %320 : vector<2x128xf32>
    %322 = math.exp %321 : vector<2x128xf32>
    %cst_102 = arith.constant 1.000000e+00 : f32
    %323 = vector.broadcast %cst_102 : f32 to vector<2x128xf32>
    %324 = arith.addf %323, %322 : vector<2x128xf32>
    %325 = arith.divf %323, %324 : vector<2x128xf32>
    %326 = vector.extract_strided_slice %315 {offsets = [0, 128], sizes = [2, 128], strides = [1, 1]} : vector<2x384xf32> to vector<2x128xf32>
    %327 = vector.extract_strided_slice %317 {offsets = [0, 128], sizes = [2, 128], strides = [1, 1]} : vector<2x384xf32> to vector<2x128xf32>
    %328 = arith.addf %326, %327 : vector<2x128xf32>
    %329 = arith.negf %328 : vector<2x128xf32>
    %330 = math.exp %329 : vector<2x128xf32>
    %cst_103 = arith.constant 1.000000e+00 : f32
    %331 = vector.broadcast %cst_103 : f32 to vector<2x128xf32>
    %332 = arith.addf %331, %330 : vector<2x128xf32>
    %333 = arith.divf %331, %332 : vector<2x128xf32>
    %334 = vector.extract_strided_slice %315 {offsets = [0, 256], sizes = [2, 128], strides = [1, 1]} : vector<2x384xf32> to vector<2x128xf32>
    %335 = vector.extract_strided_slice %317 {offsets = [0, 256], sizes = [2, 128], strides = [1, 1]} : vector<2x384xf32> to vector<2x128xf32>
    %336 = arith.mulf %325, %335 : vector<2x128xf32>
    %337 = arith.addf %334, %336 : vector<2x128xf32>
    %338 = math.tanh %337 : vector<2x128xf32>
    %cst_104 = arith.constant 1.000000e+00 : f32
    %339 = vector.broadcast %cst_104 : f32 to vector<2x128xf32>
    %340 = arith.subf %339, %333 : vector<2x128xf32>
    %341 = arith.mulf %340, %338 : vector<2x128xf32>
    %342 = arith.mulf %333, %277 : vector<2x128xf32>
    %343 = arith.addf %341, %342 : vector<2x128xf32>
    %c0_105 = arith.constant 0 : index
    %c3_106 = arith.constant 3 : index
    %c0_107 = arith.constant 0 : index
    %344 = vector.load %arg6[%c0_105, %c3_106, %c0_107] : memref<2x8x128xf32, #tpu.memory_space<vmem>>, vector<2x1x128xf32>
    %345 = vector.shape_cast %344 : vector<2x1x128xf32> to vector<2x128xf32>
    %346 = vector.shape_cast %343 : vector<2x128xf32> to vector<2x1x128xf32>
    tpu.vector_store %arg6[%c0_105, %c3_106, %c0_107], %346 {strides = array<i32>} : memref<2x8x128xf32, #tpu.memory_space<vmem>>, vector<2x1x128xf32>,
    %c0_108 = arith.constant 0 : index
    %c5_109 = arith.constant 5 : index
    %c0_110 = arith.constant 0 : index
    %347 = vector.load %arg1[%c0_108, %c5_109, %c0_110] : memref<2x8x384xf32, #tpu.memory_space<vmem>>, vector<2x1x384xf32>
    %348 = vector.shape_cast %347 : vector<2x1x384xf32> to vector<2x384xf32>
    %cst_111 = arith.constant dense<0.000000e+00> : vector<2x384xf32>
    %349 = tpu.matmul %310, %4, %cst_111 {dimension_numbers = #tpu.dot_dimension_numbers<[1], [0], [0], [1], [0, 0, 1, 1], [], []>} : vector<2x128xf32>, vector<128x384xf32>, vector<2x384xf32> -> vector<2x384xf32>
    %350 = arith.addf %349, %10 : vector<2x384xf32>
    %351 = vector.extract_strided_slice %348 {offsets = [0, 0], sizes = [2, 128], strides = [1, 1]} : vector<2x384xf32> to vector<2x128xf32>
    %352 = vector.extract_strided_slice %350 {offsets = [0, 0], sizes = [2, 128], strides = [1, 1]} : vector<2x384xf32> to vector<2x128xf32>
    %353 = arith.addf %351, %352 : vector<2x128xf32>
    %354 = arith.negf %353 : vector<2x128xf32>
    %355 = math.exp %354 : vector<2x128xf32>
    %cst_112 = arith.constant 1.000000e+00 : f32
    %356 = vector.broadcast %cst_112 : f32 to vector<2x128xf32>
    %357 = arith.addf %356, %355 : vector<2x128xf32>
    %358 = arith.divf %356, %357 : vector<2x128xf32>
    %359 = vector.extract_strided_slice %348 {offsets = [0, 128], sizes = [2, 128], strides = [1, 1]} : vector<2x384xf32> to vector<2x128xf32>
    %360 = vector.extract_strided_slice %350 {offsets = [0, 128], sizes = [2, 128], strides = [1, 1]} : vector<2x384xf32> to vector<2x128xf32>
    %361 = arith.addf %359, %360 : vector<2x128xf32>
    %362 = arith.negf %361 : vector<2x128xf32>
    %363 = math.exp %362 : vector<2x128xf32>
    %cst_113 = arith.constant 1.000000e+00 : f32
    %364 = vector.broadcast %cst_113 : f32 to vector<2x128xf32>
    %365 = arith.addf %364, %363 : vector<2x128xf32>
    %366 = arith.divf %364, %365 : vector<2x128xf32>
    %367 = vector.extract_strided_slice %348 {offsets = [0, 256], sizes = [2, 128], strides = [1, 1]} : vector<2x384xf32> to vector<2x128xf32>
    %368 = vector.extract_strided_slice %350 {offsets = [0, 256], sizes = [2, 128], strides = [1, 1]} : vector<2x384xf32> to vector<2x128xf32>
    %369 = arith.mulf %358, %368 : vector<2x128xf32>
    %370 = arith.addf %367, %369 : vector<2x128xf32>
    %371 = math.tanh %370 : vector<2x128xf32>
    %cst_114 = arith.constant 1.000000e+00 : f32
    %372 = vector.broadcast %cst_114 : f32 to vector<2x128xf32>
    %373 = arith.subf %372, %366 : vector<2x128xf32>
    %374 = arith.mulf %373, %371 : vector<2x128xf32>
    %375 = arith.mulf %366, %310 : vector<2x128xf32>
    %376 = arith.addf %374, %375 : vector<2x128xf32>
    %c0_115 = arith.constant 0 : index
    %c5_116 = arith.constant 5 : index
    %c0_117 = arith.constant 0 : index
    %377 = vector.load %arg5[%c0_115, %c5_116, %c0_117] : memref<2x8x128xf32, #tpu.memory_space<vmem>>, vector<2x1x128xf32>
    %378 = vector.shape_cast %377 : vector<2x1x128xf32> to vector<2x128xf32>
    %379 = vector.shape_cast %376 : vector<2x128xf32> to vector<2x1x128xf32>
    tpu.vector_store %arg5[%c0_115, %c5_116, %c0_117], %379 {strides = array<i32>} : memref<2x8x128xf32, #tpu.memory_space<vmem>>, vector<2x1x128xf32>,
    %c0_118 = arith.constant 0 : index
    %c2_119 = arith.constant 2 : index
    %c0_120 = arith.constant 0 : index
    %380 = vector.load %arg2[%c0_118, %c2_119, %c0_120] : memref<2x8x384xf32, #tpu.memory_space<vmem>>, vector<2x1x384xf32>
    %381 = vector.shape_cast %380 : vector<2x1x384xf32> to vector<2x384xf32>
    %cst_121 = arith.constant dense<0.000000e+00> : vector<2x384xf32>
    %382 = tpu.matmul %343, %6, %cst_121 {dimension_numbers = #tpu.dot_dimension_numbers<[1], [0], [0], [1], [0, 0, 1, 1], [], []>} : vector<2x128xf32>, vector<128x384xf32>, vector<2x384xf32> -> vector<2x384xf32>
    %383 = arith.addf %382, %14 : vector<2x384xf32>
    %384 = vector.extract_strided_slice %381 {offsets = [0, 0], sizes = [2, 128], strides = [1, 1]} : vector<2x384xf32> to vector<2x128xf32>
    %385 = vector.extract_strided_slice %383 {offsets = [0, 0], sizes = [2, 128], strides = [1, 1]} : vector<2x384xf32> to vector<2x128xf32>
    %386 = arith.addf %384, %385 : vector<2x128xf32>
    %387 = arith.negf %386 : vector<2x128xf32>
    %388 = math.exp %387 : vector<2x128xf32>
    %cst_122 = arith.constant 1.000000e+00 : f32
    %389 = vector.broadcast %cst_122 : f32 to vector<2x128xf32>
    %390 = arith.addf %389, %388 : vector<2x128xf32>
    %391 = arith.divf %389, %390 : vector<2x128xf32>
    %392 = vector.extract_strided_slice %381 {offsets = [0, 128], sizes = [2, 128], strides = [1, 1]} : vector<2x384xf32> to vector<2x128xf32>
    %393 = vector.extract_strided_slice %383 {offsets = [0, 128], sizes = [2, 128], strides = [1, 1]} : vector<2x384xf32> to vector<2x128xf32>
    %394 = arith.addf %392, %393 : vector<2x128xf32>
    %395 = arith.negf %394 : vector<2x128xf32>
    %396 = math.exp %395 : vector<2x128xf32>
    %cst_123 = arith.constant 1.000000e+00 : f32
    %397 = vector.broadcast %cst_123 : f32 to vector<2x128xf32>
    %398 = arith.addf %397, %396 : vector<2x128xf32>
    %399 = arith.divf %397, %398 : vector<2x128xf32>
    %400 = vector.extract_strided_slice %381 {offsets = [0, 256], sizes = [2, 128], strides = [1, 1]} : vector<2x384xf32> to vector<2x128xf32>
    %401 = vector.extract_strided_slice %383 {offsets = [0, 256], sizes = [2, 128], strides = [1, 1]} : vector<2x384xf32> to vector<2x128xf32>
    %402 = arith.mulf %391, %401 : vector<2x128xf32>
    %403 = arith.addf %400, %402 : vector<2x128xf32>
    %404 = math.tanh %403 : vector<2x128xf32>
    %cst_124 = arith.constant 1.000000e+00 : f32
    %405 = vector.broadcast %cst_124 : f32 to vector<2x128xf32>
    %406 = arith.subf %405, %399 : vector<2x128xf32>
    %407 = arith.mulf %406, %404 : vector<2x128xf32>
    %408 = arith.mulf %399, %343 : vector<2x128xf32>
    %409 = arith.addf %407, %408 : vector<2x128xf32>
    %c0_125 = arith.constant 0 : index
    %c2_126 = arith.constant 2 : index
    %c0_127 = arith.constant 0 : index
    %410 = vector.load %arg6[%c0_125, %c2_126, %c0_127] : memref<2x8x128xf32, #tpu.memory_space<vmem>>, vector<2x1x128xf32>
    %411 = vector.shape_cast %410 : vector<2x1x128xf32> to vector<2x128xf32>
    %412 = vector.shape_cast %409 : vector<2x128xf32> to vector<2x1x128xf32>
    tpu.vector_store %arg6[%c0_125, %c2_126, %c0_127], %412 {strides = array<i32>} : memref<2x8x128xf32, #tpu.memory_space<vmem>>, vector<2x1x128xf32>,
    %c0_128 = arith.constant 0 : index
    %c6_129 = arith.constant 6 : index
    %c0_130 = arith.constant 0 : index
    %413 = vector.load %arg1[%c0_128, %c6_129, %c0_130] : memref<2x8x384xf32, #tpu.memory_space<vmem>>, vector<2x1x384xf32>
    %414 = vector.shape_cast %413 : vector<2x1x384xf32> to vector<2x384xf32>
    %cst_131 = arith.constant dense<0.000000e+00> : vector<2x384xf32>
    %415 = tpu.matmul %376, %4, %cst_131 {dimension_numbers = #tpu.dot_dimension_numbers<[1], [0], [0], [1], [0, 0, 1, 1], [], []>} : vector<2x128xf32>, vector<128x384xf32>, vector<2x384xf32> -> vector<2x384xf32>
    %416 = arith.addf %415, %10 : vector<2x384xf32>
    %417 = vector.extract_strided_slice %414 {offsets = [0, 0], sizes = [2, 128], strides = [1, 1]} : vector<2x384xf32> to vector<2x128xf32>
    %418 = vector.extract_strided_slice %416 {offsets = [0, 0], sizes = [2, 128], strides = [1, 1]} : vector<2x384xf32> to vector<2x128xf32>
    %419 = arith.addf %417, %418 : vector<2x128xf32>
    %420 = arith.negf %419 : vector<2x128xf32>
    %421 = math.exp %420 : vector<2x128xf32>
    %cst_132 = arith.constant 1.000000e+00 : f32
    %422 = vector.broadcast %cst_132 : f32 to vector<2x128xf32>
    %423 = arith.addf %422, %421 : vector<2x128xf32>
    %424 = arith.divf %422, %423 : vector<2x128xf32>
    %425 = vector.extract_strided_slice %414 {offsets = [0, 128], sizes = [2, 128], strides = [1, 1]} : vector<2x384xf32> to vector<2x128xf32>
    %426 = vector.extract_strided_slice %416 {offsets = [0, 128], sizes = [2, 128], strides = [1, 1]} : vector<2x384xf32> to vector<2x128xf32>
    %427 = arith.addf %425, %426 : vector<2x128xf32>
    %428 = arith.negf %427 : vector<2x128xf32>
    %429 = math.exp %428 : vector<2x128xf32>
    %cst_133 = arith.constant 1.000000e+00 : f32
    %430 = vector.broadcast %cst_133 : f32 to vector<2x128xf32>
    %431 = arith.addf %430, %429 : vector<2x128xf32>
    %432 = arith.divf %430, %431 : vector<2x128xf32>
    %433 = vector.extract_strided_slice %414 {offsets = [0, 256], sizes = [2, 128], strides = [1, 1]} : vector<2x384xf32> to vector<2x128xf32>
    %434 = vector.extract_strided_slice %416 {offsets = [0, 256], sizes = [2, 128], strides = [1, 1]} : vector<2x384xf32> to vector<2x128xf32>
    %435 = arith.mulf %424, %434 : vector<2x128xf32>
    %436 = arith.addf %433, %435 : vector<2x128xf32>
    %437 = math.tanh %436 : vector<2x128xf32>
    %cst_134 = arith.constant 1.000000e+00 : f32
    %438 = vector.broadcast %cst_134 : f32 to vector<2x128xf32>
    %439 = arith.subf %438, %432 : vector<2x128xf32>
    %440 = arith.mulf %439, %437 : vector<2x128xf32>
    %441 = arith.mulf %432, %376 : vector<2x128xf32>
    %442 = arith.addf %440, %441 : vector<2x128xf32>
    %c0_135 = arith.constant 0 : index
    %c6_136 = arith.constant 6 : index
    %c0_137 = arith.constant 0 : index
    %443 = vector.load %arg5[%c0_135, %c6_136, %c0_137] : memref<2x8x128xf32, #tpu.memory_space<vmem>>, vector<2x1x128xf32>
    %444 = vector.shape_cast %443 : vector<2x1x128xf32> to vector<2x128xf32>
    %445 = vector.shape_cast %442 : vector<2x128xf32> to vector<2x1x128xf32>
    tpu.vector_store %arg5[%c0_135, %c6_136, %c0_137], %445 {strides = array<i32>} : memref<2x8x128xf32, #tpu.memory_space<vmem>>, vector<2x1x128xf32>,
    %c0_138 = arith.constant 0 : index
    %c1_139 = arith.constant 1 : index
    %c0_140 = arith.constant 0 : index
    %446 = vector.load %arg2[%c0_138, %c1_139, %c0_140] : memref<2x8x384xf32, #tpu.memory_space<vmem>>, vector<2x1x384xf32>
    %447 = vector.shape_cast %446 : vector<2x1x384xf32> to vector<2x384xf32>
    %cst_141 = arith.constant dense<0.000000e+00> : vector<2x384xf32>
    %448 = tpu.matmul %409, %6, %cst_141 {dimension_numbers = #tpu.dot_dimension_numbers<[1], [0], [0], [1], [0, 0, 1, 1], [], []>} : vector<2x128xf32>, vector<128x384xf32>, vector<2x384xf32> -> vector<2x384xf32>
    %449 = arith.addf %448, %14 : vector<2x384xf32>
    %450 = vector.extract_strided_slice %447 {offsets = [0, 0], sizes = [2, 128], strides = [1, 1]} : vector<2x384xf32> to vector<2x128xf32>
    %451 = vector.extract_strided_slice %449 {offsets = [0, 0], sizes = [2, 128], strides = [1, 1]} : vector<2x384xf32> to vector<2x128xf32>
    %452 = arith.addf %450, %451 : vector<2x128xf32>
    %453 = arith.negf %452 : vector<2x128xf32>
    %454 = math.exp %453 : vector<2x128xf32>
    %cst_142 = arith.constant 1.000000e+00 : f32
    %455 = vector.broadcast %cst_142 : f32 to vector<2x128xf32>
    %456 = arith.addf %455, %454 : vector<2x128xf32>
    %457 = arith.divf %455, %456 : vector<2x128xf32>
    %458 = vector.extract_strided_slice %447 {offsets = [0, 128], sizes = [2, 128], strides = [1, 1]} : vector<2x384xf32> to vector<2x128xf32>
    %459 = vector.extract_strided_slice %449 {offsets = [0, 128], sizes = [2, 128], strides = [1, 1]} : vector<2x384xf32> to vector<2x128xf32>
    %460 = arith.addf %458, %459 : vector<2x128xf32>
    %461 = arith.negf %460 : vector<2x128xf32>
    %462 = math.exp %461 : vector<2x128xf32>
    %cst_143 = arith.constant 1.000000e+00 : f32
    %463 = vector.broadcast %cst_143 : f32 to vector<2x128xf32>
    %464 = arith.addf %463, %462 : vector<2x128xf32>
    %465 = arith.divf %463, %464 : vector<2x128xf32>
    %466 = vector.extract_strided_slice %447 {offsets = [0, 256], sizes = [2, 128], strides = [1, 1]} : vector<2x384xf32> to vector<2x128xf32>
    %467 = vector.extract_strided_slice %449 {offsets = [0, 256], sizes = [2, 128], strides = [1, 1]} : vector<2x384xf32> to vector<2x128xf32>
    %468 = arith.mulf %457, %467 : vector<2x128xf32>
    %469 = arith.addf %466, %468 : vector<2x128xf32>
    %470 = math.tanh %469 : vector<2x128xf32>
    %cst_144 = arith.constant 1.000000e+00 : f32
    %471 = vector.broadcast %cst_144 : f32 to vector<2x128xf32>
    %472 = arith.subf %471, %465 : vector<2x128xf32>
    %473 = arith.mulf %472, %470 : vector<2x128xf32>
    %474 = arith.mulf %465, %409 : vector<2x128xf32>
    %475 = arith.addf %473, %474 : vector<2x128xf32>
    %c0_145 = arith.constant 0 : index
    %c1_146 = arith.constant 1 : index
    %c0_147 = arith.constant 0 : index
    %476 = vector.load %arg6[%c0_145, %c1_146, %c0_147] : memref<2x8x128xf32, #tpu.memory_space<vmem>>, vector<2x1x128xf32>
    %477 = vector.shape_cast %476 : vector<2x1x128xf32> to vector<2x128xf32>
    %478 = vector.shape_cast %475 : vector<2x128xf32> to vector<2x1x128xf32>
    tpu.vector_store %arg6[%c0_145, %c1_146, %c0_147], %478 {strides = array<i32>} : memref<2x8x128xf32, #tpu.memory_space<vmem>>, vector<2x1x128xf32>,
    %c0_148 = arith.constant 0 : index
    %c7_149 = arith.constant 7 : index
    %c0_150 = arith.constant 0 : index
    %479 = vector.load %arg1[%c0_148, %c7_149, %c0_150] : memref<2x8x384xf32, #tpu.memory_space<vmem>>, vector<2x1x384xf32>
    %480 = vector.shape_cast %479 : vector<2x1x384xf32> to vector<2x384xf32>
    %cst_151 = arith.constant dense<0.000000e+00> : vector<2x384xf32>
    %481 = tpu.matmul %442, %4, %cst_151 {dimension_numbers = #tpu.dot_dimension_numbers<[1], [0], [0], [1], [0, 0, 1, 1], [], []>} : vector<2x128xf32>, vector<128x384xf32>, vector<2x384xf32> -> vector<2x384xf32>
    %482 = arith.addf %481, %10 : vector<2x384xf32>
    %483 = vector.extract_strided_slice %480 {offsets = [0, 0], sizes = [2, 128], strides = [1, 1]} : vector<2x384xf32> to vector<2x128xf32>
    %484 = vector.extract_strided_slice %482 {offsets = [0, 0], sizes = [2, 128], strides = [1, 1]} : vector<2x384xf32> to vector<2x128xf32>
    %485 = arith.addf %483, %484 : vector<2x128xf32>
    %486 = arith.negf %485 : vector<2x128xf32>
    %487 = math.exp %486 : vector<2x128xf32>
    %cst_152 = arith.constant 1.000000e+00 : f32
    %488 = vector.broadcast %cst_152 : f32 to vector<2x128xf32>
    %489 = arith.addf %488, %487 : vector<2x128xf32>
    %490 = arith.divf %488, %489 : vector<2x128xf32>
    %491 = vector.extract_strided_slice %480 {offsets = [0, 128], sizes = [2, 128], strides = [1, 1]} : vector<2x384xf32> to vector<2x128xf32>
    %492 = vector.extract_strided_slice %482 {offsets = [0, 128], sizes = [2, 128], strides = [1, 1]} : vector<2x384xf32> to vector<2x128xf32>
    %493 = arith.addf %491, %492 : vector<2x128xf32>
    %494 = arith.negf %493 : vector<2x128xf32>
    %495 = math.exp %494 : vector<2x128xf32>
    %cst_153 = arith.constant 1.000000e+00 : f32
    %496 = vector.broadcast %cst_153 : f32 to vector<2x128xf32>
    %497 = arith.addf %496, %495 : vector<2x128xf32>
    %498 = arith.divf %496, %497 : vector<2x128xf32>
    %499 = vector.extract_strided_slice %480 {offsets = [0, 256], sizes = [2, 128], strides = [1, 1]} : vector<2x384xf32> to vector<2x128xf32>
    %500 = vector.extract_strided_slice %482 {offsets = [0, 256], sizes = [2, 128], strides = [1, 1]} : vector<2x384xf32> to vector<2x128xf32>
    %501 = arith.mulf %490, %500 : vector<2x128xf32>
    %502 = arith.addf %499, %501 : vector<2x128xf32>
    %503 = math.tanh %502 : vector<2x128xf32>
    %cst_154 = arith.constant 1.000000e+00 : f32
    %504 = vector.broadcast %cst_154 : f32 to vector<2x128xf32>
    %505 = arith.subf %504, %498 : vector<2x128xf32>
    %506 = arith.mulf %505, %503 : vector<2x128xf32>
    %507 = arith.mulf %498, %442 : vector<2x128xf32>
    %508 = arith.addf %506, %507 : vector<2x128xf32>
    %c0_155 = arith.constant 0 : index
    %c7_156 = arith.constant 7 : index
    %c0_157 = arith.constant 0 : index
    %509 = vector.load %arg5[%c0_155, %c7_156, %c0_157] : memref<2x8x128xf32, #tpu.memory_space<vmem>>, vector<2x1x128xf32>
    %510 = vector.shape_cast %509 : vector<2x1x128xf32> to vector<2x128xf32>
    %511 = vector.shape_cast %508 : vector<2x128xf32> to vector<2x1x128xf32>
    tpu.vector_store %arg5[%c0_155, %c7_156, %c0_157], %511 {strides = array<i32>} : memref<2x8x128xf32, #tpu.memory_space<vmem>>, vector<2x1x128xf32>,
    %c0_158 = arith.constant 0 : index
    %c0_159 = arith.constant 0 : index
    %c0_160 = arith.constant 0 : index
    %512 = vector.load %arg2[%c0_158, %c0_159, %c0_160] : memref<2x8x384xf32, #tpu.memory_space<vmem>>, vector<2x1x384xf32>
    %513 = vector.shape_cast %512 : vector<2x1x384xf32> to vector<2x384xf32>
    %cst_161 = arith.constant dense<0.000000e+00> : vector<2x384xf32>
    %514 = tpu.matmul %475, %6, %cst_161 {dimension_numbers = #tpu.dot_dimension_numbers<[1], [0], [0], [1], [0, 0, 1, 1], [], []>} : vector<2x128xf32>, vector<128x384xf32>, vector<2x384xf32> -> vector<2x384xf32>
    %515 = arith.addf %514, %14 : vector<2x384xf32>
    %516 = vector.extract_strided_slice %513 {offsets = [0, 0], sizes = [2, 128], strides = [1, 1]} : vector<2x384xf32> to vector<2x128xf32>
    %517 = vector.extract_strided_slice %515 {offsets = [0, 0], sizes = [2, 128], strides = [1, 1]} : vector<2x384xf32> to vector<2x128xf32>
    %518 = arith.addf %516, %517 : vector<2x128xf32>
    %519 = arith.negf %518 : vector<2x128xf32>
    %520 = math.exp %519 : vector<2x128xf32>
    %cst_162 = arith.constant 1.000000e+00 : f32
    %521 = vector.broadcast %cst_162 : f32 to vector<2x128xf32>
    %522 = arith.addf %521, %520 : vector<2x128xf32>
    %523 = arith.divf %521, %522 : vector<2x128xf32>
    %524 = vector.extract_strided_slice %513 {offsets = [0, 128], sizes = [2, 128], strides = [1, 1]} : vector<2x384xf32> to vector<2x128xf32>
    %525 = vector.extract_strided_slice %515 {offsets = [0, 128], sizes = [2, 128], strides = [1, 1]} : vector<2x384xf32> to vector<2x128xf32>
    %526 = arith.addf %524, %525 : vector<2x128xf32>
    %527 = arith.negf %526 : vector<2x128xf32>
    %528 = math.exp %527 : vector<2x128xf32>
    %cst_163 = arith.constant 1.000000e+00 : f32
    %529 = vector.broadcast %cst_163 : f32 to vector<2x128xf32>
    %530 = arith.addf %529, %528 : vector<2x128xf32>
    %531 = arith.divf %529, %530 : vector<2x128xf32>
    %532 = vector.extract_strided_slice %513 {offsets = [0, 256], sizes = [2, 128], strides = [1, 1]} : vector<2x384xf32> to vector<2x128xf32>
    %533 = vector.extract_strided_slice %515 {offsets = [0, 256], sizes = [2, 128], strides = [1, 1]} : vector<2x384xf32> to vector<2x128xf32>
    %534 = arith.mulf %523, %533 : vector<2x128xf32>
    %535 = arith.addf %532, %534 : vector<2x128xf32>
    %536 = math.tanh %535 : vector<2x128xf32>
    %cst_164 = arith.constant 1.000000e+00 : f32
    %537 = vector.broadcast %cst_164 : f32 to vector<2x128xf32>
    %538 = arith.subf %537, %531 : vector<2x128xf32>
    %539 = arith.mulf %538, %536 : vector<2x128xf32>
    %540 = arith.mulf %531, %475 : vector<2x128xf32>
    %541 = arith.addf %539, %540 : vector<2x128xf32>
    %c0_165 = arith.constant 0 : index
    %c0_166 = arith.constant 0 : index
    %c0_167 = arith.constant 0 : index
    %542 = vector.load %arg6[%c0_165, %c0_166, %c0_167] : memref<2x8x128xf32, #tpu.memory_space<vmem>>, vector<2x1x128xf32>
    %543 = vector.shape_cast %542 : vector<2x1x128xf32> to vector<2x128xf32>
    %544 = vector.shape_cast %541 : vector<2x128xf32> to vector<2x1x128xf32>
    tpu.vector_store %arg6[%c0_165, %c0_166, %c0_167], %544 {strides = array<i32>} : memref<2x8x128xf32, #tpu.memory_space<vmem>>, vector<2x1x128xf32>,
    %c0_168 = arith.constant 0 : index
    %c0_169 = arith.constant 0 : index
    %545 = vector.load %arg7[%c0_168, %c0_169] : memref<2x128xf32, #tpu.memory_space<vmem>>, vector<2x128xf32>
    tpu.vector_store %arg7[%c0_168, %c0_169], %508 {strides = array<i32>} : memref<2x128xf32, #tpu.memory_space<vmem>>, vector<2x128xf32>,
    %c0_170 = arith.constant 0 : index
    %c0_171 = arith.constant 0 : index
    %546 = vector.load %arg8[%c0_170, %c0_171] : memref<2x128xf32, #tpu.memory_space<vmem>>, vector<2x128xf32>
    tpu.vector_store %arg8[%c0_170, %c0_171], %541 {strides = array<i32>} : memref<2x128xf32, #tpu.memory_space<vmem>>, vector<2x128xf32>,
    return
  }
  func.func @transform_0(%arg0: i32) -> (i32, i32, i32) {
    %c0_i32 = arith.constant 0 : i32
    %c0_i32_0 = arith.constant 0 : i32
    %c0_i32_1 = arith.constant 0 : i32
    return %c0_i32, %arg0, %c0_i32_0 : i32, i32, i32
  }
  func.func @transform_1(%arg0: i32) -> (i32, i32, i32) {
    %c0_i32 = arith.constant 0 : i32
    %0 = arith.subi %c0_i32, %arg0 : i32
    %c0_i32_0 = arith.constant 0 : i32
    %c0_i32_1 = arith.constant 0 : i32
    %c0_i32_2 = arith.constant 0 : i32
    return %c0_i32_0, %0, %c0_i32_1 : i32, i32, i32
  }
  func.func @transform_2(%arg0: i32) -> (i32, i32, i32) {
    %c0_i32 = arith.constant 0 : i32
    %c0_i32_0 = arith.constant 0 : i32
    %c0_i32_1 = arith.constant 0 : i32
    %c0_i32_2 = arith.constant 0 : i32
    return %c0_i32, %c0_i32_0, %c0_i32_1 : i32, i32, i32
  }
  func.func @transform_3(%arg0: i32) -> (i32, i32, i32) {
    %c0_i32 = arith.constant 0 : i32
    %c0_i32_0 = arith.constant 0 : i32
    %c0_i32_1 = arith.constant 0 : i32
    %c0_i32_2 = arith.constant 0 : i32
    return %c0_i32, %c0_i32_0, %c0_i32_1 : i32, i32, i32
  }
  func.func @transform_4(%arg0: i32) -> (i32, i32, i32) {
    %c0_i32 = arith.constant 0 : i32
    %c0_i32_0 = arith.constant 0 : i32
    %c0_i32_1 = arith.constant 0 : i32
    return %c0_i32, %arg0, %c0_i32_0 : i32, i32, i32
  }
  func.func @transform_5(%arg0: i32) -> (i32, i32, i32) {
    %c0_i32 = arith.constant 0 : i32
    %0 = arith.subi %c0_i32, %arg0 : i32
    %c0_i32_0 = arith.constant 0 : i32
    %c0_i32_1 = arith.constant 0 : i32
    %c0_i32_2 = arith.constant 0 : i32
    return %c0_i32_0, %0, %c0_i32_1 : i32, i32, i32
  }
}

module attributes {stable_mosaic.version = 11 : i64} {
  func.func @_post_kernel(%arg0: i32, %arg1: memref<16x128xf32, #tpu.memory_space<vmem>>, %arg2: memref<16x128xf32, #tpu.memory_space<vmem>>, %arg3: memref<16x128xf32, #tpu.memory_space<vmem>>, %arg4: memref<16x128xf32, #tpu.memory_space<vmem>>, %arg5: memref<128x128xf32, #tpu.memory_space<vmem>>, %arg6: memref<128x128xf32, #tpu.memory_space<vmem>>, %arg7: memref<1x128xf32, #tpu.memory_space<vmem>>, %arg8: memref<128x128xf32, #tpu.memory_space<vmem>>, %arg9: memref<1x128xf32, #tpu.memory_space<vmem>>, %arg10: memref<16x128xf32, #tpu.memory_space<vmem>>) attributes {dimension_semantics = [#tpu.dimension_semantics<parallel>], iteration_bounds = array<i64: 1>, scalar_prefetch = 0 : i64, scratch_operands = 0 : i64, tpu.core_type = #tpu.core_type<tc>, window_params = [{transform_indices = @transform_0, window_bounds = array<i64: 16, 128>}, {transform_indices = @transform_1, window_bounds = array<i64: 16, 128>}, {transform_indices = @transform_2, window_bounds = array<i64: 16, 128>}, {transform_indices = @transform_3, window_bounds = array<i64: 16, 128>}, {pipeline_mode = #tpu.pipeline_mode<synchronous>, transform_indices = @transform_4, window_bounds = array<i64: 128, 128>}, {pipeline_mode = #tpu.pipeline_mode<synchronous>, transform_indices = @transform_5, window_bounds = array<i64: 128, 128>}, {pipeline_mode = #tpu.pipeline_mode<synchronous>, transform_indices = @transform_6, window_bounds = array<i64: 1, 128>}, {pipeline_mode = #tpu.pipeline_mode<synchronous>, transform_indices = @transform_7, window_bounds = array<i64: 128, 128>}, {pipeline_mode = #tpu.pipeline_mode<synchronous>, transform_indices = @transform_8, window_bounds = array<i64: 1, 128>}, {transform_indices = @transform_9, window_bounds = array<i64: 16, 128>}]} {
    %c0 = arith.constant 0 : index
    %c0_0 = arith.constant 0 : index
    %0 = vector.load %arg1[%c0, %c0_0] : memref<16x128xf32, #tpu.memory_space<vmem>>, vector<16x128xf32>
    %c0_1 = arith.constant 0 : index
    %c0_2 = arith.constant 0 : index
    %1 = vector.load %arg5[%c0_1, %c0_2] : memref<128x128xf32, #tpu.memory_space<vmem>>, vector<128x128xf32>
    %cst = arith.constant dense<0.000000e+00> : vector<16x128xf32>
    %2 = tpu.matmul %0, %1, %cst {dimension_numbers = #tpu.dot_dimension_numbers<[1], [0], [0], [1], [0, 0, 1, 1], [], []>} : vector<16x128xf32>, vector<128x128xf32>, vector<16x128xf32> -> vector<16x128xf32>
    %c0_3 = arith.constant 0 : index
    %c0_4 = arith.constant 0 : index
    %3 = vector.load %arg2[%c0_3, %c0_4] : memref<16x128xf32, #tpu.memory_space<vmem>>, vector<16x128xf32>
    %c0_5 = arith.constant 0 : index
    %c0_6 = arith.constant 0 : index
    %4 = vector.load %arg6[%c0_5, %c0_6] : memref<128x128xf32, #tpu.memory_space<vmem>>, vector<128x128xf32>
    %cst_7 = arith.constant dense<0.000000e+00> : vector<16x128xf32>
    %5 = tpu.matmul %3, %4, %cst_7 {dimension_numbers = #tpu.dot_dimension_numbers<[1], [0], [0], [1], [0, 0, 1, 1], [], []>} : vector<16x128xf32>, vector<128x128xf32>, vector<16x128xf32> -> vector<16x128xf32>
    %6 = arith.addf %2, %5 : vector<16x128xf32>
    %c0_8 = arith.constant 0 : index
    %c0_9 = arith.constant 0 : index
    %7 = vector.load %arg7[%c0_8, %c0_9] : memref<1x128xf32, #tpu.memory_space<vmem>>, vector<1x128xf32>
    %8 = vector.broadcast %7 : vector<1x128xf32> to vector<16x128xf32>
    %9 = arith.addf %6, %8 : vector<16x128xf32>
    %c0_10 = arith.constant 0 : index
    %c0_11 = arith.constant 0 : index
    %10 = vector.load %arg3[%c0_10, %c0_11] : memref<16x128xf32, #tpu.memory_space<vmem>>, vector<16x128xf32>
    %11 = arith.mulf %9, %10 : vector<16x128xf32>
    %c0_12 = arith.constant 0 : index
    %c0_13 = arith.constant 0 : index
    %12 = vector.load %arg8[%c0_12, %c0_13] : memref<128x128xf32, #tpu.memory_space<vmem>>, vector<128x128xf32>
    %cst_14 = arith.constant dense<0.000000e+00> : vector<16x128xf32>
    %13 = tpu.matmul %11, %12, %cst_14 {dimension_numbers = #tpu.dot_dimension_numbers<[1], [0], [0], [1], [0, 0, 1, 1], [], []>} : vector<16x128xf32>, vector<128x128xf32>, vector<16x128xf32> -> vector<16x128xf32>
    %c0_15 = arith.constant 0 : index
    %c0_16 = arith.constant 0 : index
    %14 = vector.load %arg9[%c0_15, %c0_16] : memref<1x128xf32, #tpu.memory_space<vmem>>, vector<1x128xf32>
    %15 = vector.broadcast %14 : vector<1x128xf32> to vector<16x128xf32>
    %16 = arith.addf %13, %15 : vector<16x128xf32>
    %c0_17 = arith.constant 0 : index
    %c0_18 = arith.constant 0 : index
    %17 = vector.load %arg4[%c0_17, %c0_18] : memref<16x128xf32, #tpu.memory_space<vmem>>, vector<16x128xf32>
    %18 = arith.addf %16, %17 : vector<16x128xf32>
    %c0_19 = arith.constant 0 : index
    %c0_20 = arith.constant 0 : index
    %19 = vector.load %arg10[%c0_19, %c0_20] : memref<16x128xf32, #tpu.memory_space<vmem>>, vector<16x128xf32>
    tpu.vector_store %arg10[%c0_19, %c0_20], %18 {strides = array<i32>} : memref<16x128xf32, #tpu.memory_space<vmem>>, vector<16x128xf32>,
    return
  }
  func.func @transform_0(%arg0: i32) -> (i32, i32) {
    %c0_i32 = arith.constant 0 : i32
    %c0_i32_0 = arith.constant 0 : i32
    return %arg0, %c0_i32 : i32, i32
  }
  func.func @transform_1(%arg0: i32) -> (i32, i32) {
    %c0_i32 = arith.constant 0 : i32
    %c0_i32_0 = arith.constant 0 : i32
    return %arg0, %c0_i32 : i32, i32
  }
  func.func @transform_2(%arg0: i32) -> (i32, i32) {
    %c0_i32 = arith.constant 0 : i32
    %c0_i32_0 = arith.constant 0 : i32
    return %arg0, %c0_i32 : i32, i32
  }
  func.func @transform_3(%arg0: i32) -> (i32, i32) {
    %c0_i32 = arith.constant 0 : i32
    %c0_i32_0 = arith.constant 0 : i32
    return %arg0, %c0_i32 : i32, i32
  }
  func.func @transform_4(%arg0: i32) -> (i32, i32) {
    %c0_i32 = arith.constant 0 : i32
    %c0_i32_0 = arith.constant 0 : i32
    %c0_i32_1 = arith.constant 0 : i32
    return %c0_i32, %c0_i32_0 : i32, i32
  }
  func.func @transform_5(%arg0: i32) -> (i32, i32) {
    %c0_i32 = arith.constant 0 : i32
    %c0_i32_0 = arith.constant 0 : i32
    %c0_i32_1 = arith.constant 0 : i32
    return %c0_i32, %c0_i32_0 : i32, i32
  }
  func.func @transform_6(%arg0: i32) -> (i32, i32) {
    %c0_i32 = arith.constant 0 : i32
    %c0_i32_0 = arith.constant 0 : i32
    %c0_i32_1 = arith.constant 0 : i32
    return %c0_i32, %c0_i32_0 : i32, i32
  }
  func.func @transform_7(%arg0: i32) -> (i32, i32) {
    %c0_i32 = arith.constant 0 : i32
    %c0_i32_0 = arith.constant 0 : i32
    %c0_i32_1 = arith.constant 0 : i32
    return %c0_i32, %c0_i32_0 : i32, i32
  }
  func.func @transform_8(%arg0: i32) -> (i32, i32) {
    %c0_i32 = arith.constant 0 : i32
    %c0_i32_0 = arith.constant 0 : i32
    %c0_i32_1 = arith.constant 0 : i32
    return %c0_i32, %c0_i32_0 : i32, i32
  }
  func.func @transform_9(%arg0: i32) -> (i32, i32) {
    %c0_i32 = arith.constant 0 : i32
    %c0_i32_0 = arith.constant 0 : i32
    return %arg0, %c0_i32 : i32, i32
  }
}

</mosaic_0001>

<bundles_post_ra>
// kernel: gru_residual_forward.5
= control target key start
LH: loop header
LB: loop body
LE: loop exit
PB: predicated region body
PF: predicated region fallthrough
CT: control target
= control target key end

     0   :  { %s828_s5 = inlined_call_operand.vmem [shape: f32[128,128], index: 5, kind: input, shape index: {}]   ;;  %s829_s1 = inlined_call_operand.vmem [shape: f32[16,128], index: 1, kind: input, shape index: {}]   ;;  %s830_s7 = inlined_call_operand.vmem [shape: f32[128,128], index: 7, kind: input, shape index: {}]   ;;  %s831_s4 = inlined_call_operand.vmem [shape: f32[128,128], index: 4, kind: input, shape index: {}]   ;;  %s832_s0 = inlined_call_operand.vmem [shape: f32[16,128], index: 0, kind: input, shape index: {}]   ;;  %s833_s6 = inlined_call_operand.vmem [shape: f32[1,128], index: 6, kind: input, shape index: {}]   ;;  %s834_s2 = inlined_call_operand.vmem [shape: f32[16,128], index: 2, kind: input, shape index: {}]   ;;  %s835_s8 = inlined_call_operand.vmem [shape: f32[1,128], index: 8, kind: input, shape index: {}]   ;;  %s836_s3 = inlined_call_operand.vmem [shape: f32[16,128], index: 3, kind: input, shape index: {}, may-alias: {3,9}]   ;;  %s837_s9 = inlined_call_operand.vmem [shape: f32[16,128], index: 9, kind: output, shape index: {}, may-alias: {3,9}]  }
   0x1   :  { %v52_v0 = vld [vmem:[%s828_s5] sm:$0xff]  ;;  %v53_v1 = vld [vmem:[%s828_s5 + $0x8] sm:$0xff]  ;;  %v54_v2 = vld [vmem:[%s828_s5 + $0x10] sm:$0xff] }
   0x2   :  { %v500_v3 = vpack.c.bf16 %v53_v1, %v52_v0  ;;  %v55_v4 = vld [vmem:[%s828_s5 + $0x18] sm:$0xff]  ;;  %v56_v6 = vld [vmem:[%s828_s5 + $0x20] sm:$0xff]  ;;  %v57_v7 = vld [vmem:[%s828_s5 + $0x28] sm:$0xff] }
   0x3   :  { %v504_v5 = vpack.c.bf16 %v55_v4, %v54_v2  ;;  %v508_v8 = vpack.c.bf16 %v57_v7, %v56_v6  ;;  %v50_v9 = vld [vmem:[%s829_s1] sm:$0xff]  ;;  %v58_v10 = vld [vmem:[%s828_s5 + $0x30] sm:$0xff]  ;;  %v59_v11 = vld [vmem:[%s828_s5 + $0x38] sm:$0xff] }
   0x4   :  { %501 = vmatprep.subr.bf16.mxu0 %v500_v3  ;;  %427 = vmatprep.mubr.f32.mxu0 %v50_v9  ;;  %v512_v12 = vpack.c.bf16 %v59_v11, %v58_v10  ;;  %v60_v13 = vld [vmem:[%s828_s5 + $0x40] sm:$0xff]  ;;  %v61_v14 = vld [vmem:[%s828_s5 + $0x48] sm:$0xff]  ;;  %v233_v17 = vld [vmem:[%s830_s7 + $0x10] sm:$0xff] }
   0x5   :  { %503 = vmatpush3.bf16.msra.mxu0 %v500_v3  ;;  %v231_v15 = vld [vmem:[%s830_s7] sm:$0xff]  ;;  %v232_v16 = vld [vmem:[%s830_s7 + $0x8] sm:$0xff]  ;;  %v516_v18 = vpack.c.bf16 %v61_v14, %v60_v13  ;;  %v62_v19 = vld [vmem:[%s828_s5 + $0x50] sm:$0xff] }
   0x6   :  { %505 = vmatprep.subr.bf16.mxu0 %v504_v5  ;;  %v564_v20 = vpack.c.bf16 %v232_v16, %v231_v15  ;;  %v234_v21 = vld [vmem:[%s830_s7 + $0x18] sm:$0xff]  ;;  %v235_v24 = vld [vmem:[%s830_s7 + $0x20] sm:$0xff]  ;;  %v236_v25 = vld [vmem:[%s830_s7 + $0x28] sm:$0xff] }
   0x7   :  { %v63_v22 = vld [vmem:[%s828_s5 + $0x58] sm:$0xff]  ;;  %v568_v23 = vpack.c.bf16 %v234_v21, %v233_v17  ;;  %v64_v27 = vld [vmem:[%s828_s5 + $0x60] sm:$0xff]  ;;  %v572_v28 = vpack.c.bf16 %v236_v25, %v235_v24  ;;  %v65_v29 = vld [vmem:[%s828_s5 + $0x68] sm:$0xff] }
   0x8   :  { %565 = vmatprep.subr.bf16.mxu1 %v564_v20  ;;  %v520_v26 = vpack.c.bf16 %v63_v22, %v62_v19  ;;  %v237_v30 = vld [vmem:[%s830_s7 + $0x30] sm:$0xff]  ;;  %v238_v31 = vld [vmem:[%s830_s7 + $0x38] sm:$0xff]  ;;  %v524_v32 = vpack.c.bf16 %v65_v29, %v64_v27  ;;  %v239_v36 = vld [vmem:[%s830_s7 + $0x40] sm:$0xff] }
   0x9   :  { %507 = vmatpush3.bf16.msra.mxu0 %v504_v5  ;;  %567 = vmatpush3.bf16.msra.mxu1 %v564_v20  ;;  %v66_v33 = vld [vmem:[%s828_s5 + $0x70] sm:$0xff]  ;;  %v576_v34 = vpack.c.bf16 %v238_v31, %v237_v30  ;;  %v67_v35 = vld [vmem:[%s828_s5 + $0x78] sm:$0xff]  ;;  %v240_v37 = vld [vmem:[%s830_s7 + $0x48] sm:$0xff] }
   0xa   :  { %509 = vmatprep.subr.bf16.mxu0 %v508_v8  ;;  %569 = vmatprep.subr.bf16.mxu1 %v568_v23  ;;  %v528_v38 = vpack.c.bf16 %v67_v35, %v66_v33  ;;  %v34_v39 = vld [vmem:[%s831_s4] sm:$0xff]  ;;  %v580_v40 = vpack.c.bf16 %v240_v37, %v239_v36  ;;  %v35_v41 = vld [vmem:[%s831_s4 + $0x8] sm:$0xff]  ;;  %v241_v42 = vld [vmem:[%s830_s7 + $0x50] sm:$0xff] }
   0xb   :  { %v242_v43 = vld [vmem:[%s830_s7 + $0x58] sm:$0xff]  ;;  %v532_v44 = vpack.c.bf16 %v35_v41, %v34_v39  ;;  %v36_v46 = vld [vmem:[%s831_s4 + $0x10] sm:$0xff]  ;;  %v243_v48 = vld [vmem:[%s830_s7 + $0x60] sm:$0xff] }
   0xc   :  { %v584_v45 = vpack.c.bf16 %v242_v43, %v241_v42  ;;  %v37_v47 = vld [vmem:[%s831_s4 + $0x18] sm:$0xff]  ;;  %v244_v49 = vld [vmem:[%s830_s7 + $0x68] sm:$0xff]  ;;  %v32_v52 = vld [vmem:[%s832_s0] sm:$0xff] }
   0xd   :  { %511 = vmatpush3.bf16.msra.mxu0 %v508_v8  ;;  %571 = vmatpush3.bf16.msra.mxu1 %v568_v23  ;;  %v51_v50 = vld [vmem:[%s829_s1 + $0x8] sm:$0xff]  ;;  %v536_v51 = vpack.c.bf16 %v37_v47, %v36_v46  ;;  %v38_v53 = vld [vmem:[%s831_s4 + $0x20] sm:$0xff]  ;;  %v588_v55 = vpack.c.bf16 %v244_v49, %v243_v48  ;;  %v40_v57 = vld [vmem:[%s831_s4 + $0x30] sm:$0xff] }
   0xe   :  { %513 = vmatprep.subr.bf16.mxu0 %v512_v12  ;;  %573 = vmatprep.subr.bf16.mxu1 %v572_v28  ;;  %v39_v54 = vld [vmem:[%s831_s4 + $0x28] sm:$0xff]  ;;  %v41_v58 = vld [vmem:[%s831_s4 + $0x38] sm:$0xff]  ;;  %v42_v60 = vld [vmem:[%s831_s4 + $0x40] sm:$0xff] }
   0xf   :  { %v540_v56 = vpack.c.bf16 %v39_v54, %v38_v53  ;;  %v544_v59 = vpack.c.bf16 %v41_v58, %v40_v57  ;;  %v43_v61 = vld [vmem:[%s831_s4 + $0x48] sm:$0xff]  ;;  %v44_v63 = vld [vmem:[%s831_s4 + $0x50] sm:$0xff]  ;;  %v45_v0 = vld [vmem:[%s831_s4 + $0x58] sm:$0xff] }
  0x10   :  { %v548_v62 = vpack.c.bf16 %v43_v61, %v42_v60  ;;  %v552_v1 = vpack.c.bf16 %v45_v0, %v44_v63  ;;  %v46_v2 = vld [vmem:[%s831_s4 + $0x60] sm:$0xff]  ;;  %v47_v3 = vld [vmem:[%s831_s4 + $0x68] sm:$0xff]  ;;  %v48_v5 = vld [vmem:[%s831_s4 + $0x70] sm:$0xff] }
  0x11   :  { %515 = vmatpush3.bf16.msra.mxu0 %v512_v12  ;;  %575 = vmatpush3.bf16.msra.mxu1 %v572_v28  ;;  %v556_v4 = vpack.c.bf16 %v47_v3, %v46_v2  ;;  %v49_v6 = vld [vmem:[%s831_s4 + $0x78] sm:$0xff]  ;;  %v33_v8 = vld [vmem:[%s832_s0 + $0x8] sm:$0xff]  ;;  %v245_v9 = vld [vmem:[%s830_s7 + $0x70] sm:$0xff] }
  0x12   :  { %517 = vmatprep.subr.bf16.mxu0 %v516_v18  ;;  %577 = vmatprep.subr.bf16.mxu1 %v576_v34  ;;  %v560_v7 = vpack.c.bf16 %v49_v6, %v48_v5  ;;  %v246_v10 = vld [vmem:[%s830_s7 + $0x78] sm:$0xff]  ;;  %v339_v12 = vld [vmem:[%s833_s6] ss:$0 sm:$0xff]  ;;  %v330_v23 = vld [vmem:[%s836_s3 + $0x8] sm:$0xff] }
  0x13   :  { %v592_v11 = vpack.c.bf16 %v246_v10, %v245_v9  ;;  %v227_v16 = vld [vmem:[%s834_s2] sm:$0xff] }
  0x14   :  { %v340_v21 = vld [vmem:[%s835_s8] ss:$0 sm:$0xff] }
  0x15   :  { %519 = vmatpush3.bf16.msra.mxu0 %v516_v18  ;;  %579 = vmatpush3.bf16.msra.mxu1 %v576_v34  ;;  %v228_v18 = vld [vmem:[%s834_s2 + $0x8] sm:$0xff] }
  0x16   :  { %521 = vmatprep.subr.bf16.mxu0 %v520_v26  ;;  %581 = vmatprep.subr.bf16.mxu1 %v580_v40 }
  0x19   :  { %523 = vmatpush3.bf16.msra.mxu0 %v520_v26  ;;  %583 = vmatpush3.bf16.msra.mxu1 %v580_v40  ;;  %v329_v26 = vld [vmem:[%s836_s3] sm:$0xff] }
  0x1a   :  { %525 = vmatprep.subr.bf16.mxu0 %v524_v32  ;;  %585 = vmatprep.subr.bf16.mxu1 %v584_v45 }
  0x1d   :  { %527 = vmatpush3.bf16.msra.mxu0 %v524_v32  ;;  %587 = vmatpush3.bf16.msra.mxu1 %v584_v45 }
  0x1e   :  { %529 = vmatprep.subr.bf16.mxu0 %v528_v38  ;;  %589 = vmatprep.subr.bf16.mxu1 %v588_v55 }
  0x21   :  { %531 = vmatpush3.bf16.msra.mxu0 %v528_v38  ;;  %591 = vmatpush3.bf16.msra.mxu1 %v588_v55 }
  0x22   :  { %533 = vmatprep.subr.bf16.mxu0 %v532_v44  ;;  %593 = vmatprep.subr.bf16.mxu1 %v592_v11 }
  0x24   :  { %428 = vmatmul.mubr.f32.vlgmr.msra.gmra.mrb[0].mxu0 %v51_v50 }
  0x25   :  { %535 = vmatpush3.bf16.msra.mxu0 %v532_v44  ;;  %462 = vmatprep.mubr.f32.mxu0 %v32_v52 }
  0x26   :  { %537 = vmatprep.subr.bf16.mxu0 %v536_v51  ;;  %595 = vmatpush3.bf16.msra.mxu1 %v592_v11 }
  0x29   :  { %539 = vmatpush3.bf16.msra.mxu0 %v536_v51 }
  0x2a   :  { %541 = vmatprep.subr.bf16.mxu0 %v540_v56 }
  0x2d   :  { %543 = vmatpush3.bf16.msra.mxu0 %v540_v56 }
  0x2e   :  { %545 = vmatprep.subr.bf16.mxu0 %v544_v59 }
  0x31   :  { %547 = vmatpush3.bf16.msra.mxu0 %v544_v59 }
  0x32   :  { %549 = vmatprep.subr.bf16.mxu0 %v548_v62 }
  0x35   :  { %551 = vmatpush3.bf16.msra.mxu0 %v548_v62 }
  0x36   :  { %553 = vmatprep.subr.bf16.mxu0 %v552_v1 }
  0x39   :  { %555 = vmatpush3.bf16.msra.mxu0 %v552_v1 }
  0x3a   :  { %557 = vmatprep.subr.bf16.mxu0 %v556_v4 }
  0x3d   :  { %559 = vmatpush3.bf16.msra.mxu0 %v556_v4 }
  0x3e   :  { %561 = vmatprep.subr.bf16.mxu0 %v560_v7 }
  0x41   :  { %563 = vmatpush3.bf16.msra.mxu0 %v560_v7 }
  0x44   :  { %463 = vmatmul.mubr.f32.vlgmr.msra.gmra.mrb[0].mxu0 %v33_v8 }
 0x117   :  { %v464_v13 = vpop.f32.mrb[0].mxu0 }
 0x118   :  { %v226_v14 = vadd.f32 %v464_v13, %v339_v12  ;;  %v209_v15 = vpop.f32.mrb[1].mxu0 }
 0x119   :  { %v225_v17 = vadd.f32 %v339_v12, %v209_v15 }
 0x11a   :  { %v230_v20 = vmul.f32 %v228_v18, %v226_v14 }
 0x11b   :  { %v229_v19 = vmul.f32 %v227_v16, %v225_v17 }
 0x11d   :  { %497 = vmatprep.mubr.f32.mxu1 %v229_v19 }
 0x11e   :  { %498 = vmatmul.mubr.f32.vlgmr.msra.gmra.mrb[0].mxu1 %v230_v20 }
 0x1f1   :  { %v499_v22 = vpop.f32.mrb[0].mxu1 }
 0x1f2   :  { %v326_v24 = vadd.f32 %v499_v22, %v340_v21  ;;  %v320_v25 = vpop.f32.mrb[1].mxu1 }
 0x1f3   :  { %v321_v27 = vadd.f32 %v340_v21, %v320_v25 }
 0x1f4   :  { %v332_v28 = vadd.f32 %v330_v23, %v326_v24 }
 0x1f5   :  { %v331_v29 = vadd.f32 %v329_v26, %v321_v27 }
 0x1f6   :  { %334 = vst [vmem:[%s837_s9 + $0x8] sm:$0xff] %v332_v28 }
 0x1f7   :  { %333 = vst [vmem:[%s837_s9] sm:$0xff] %v331_v29 }

// kernel: gru_residual_forward.3
= control target key start
LH: loop header
LB: loop body
LE: loop exit
PB: predicated region body
PF: predicated region fallthrough
CT: control target
= control target key end

     0   :  { %17 = vsyncpa [#allocation3], 0  ;;  %s1702_s0 = inlined_call_operand.vmem [shape: f32[16,128], index: 0, kind: input, shape index: {}]   ;;  %s1703_s1 = inlined_call_operand.hbm [shape: f32[1,128], index: 1, kind: input, shape index: {}]   ;;  %s1704_s2 = inlined_call_operand.hbm [shape: f32[1,128], index: 2, kind: input, shape index: {}]   ;;  %s1705_s3 = inlined_call_operand.hbm [shape: f32[128,128], index: 3, kind: input, shape index: {}]   ;;  %s1706_s4 = inlined_call_operand.hbm [shape: f32[1,128], index: 4, kind: input, shape index: {}]   ;;  %s1707_s5 = inlined_call_operand.hbm [shape: f32[128,128], index: 5, kind: input, shape index: {}]   ;;  %s1708_s6 = inlined_call_operand.hbm [shape: f32[1,128], index: 6, kind: input, shape index: {}]   ;;  %s1709_s7 = inlined_call_operand.hbm [shape: f32[2,128,384], index: 7, kind: input, shape index: {}]   ;;  %s1710_s8 = inlined_call_operand.hbm [shape: f32[2,1,384], index: 8, kind: input, shape index: {}]   ;;  %s1711_s9 = inlined_call_operand.vmem [shape: f32[16,384], index: 9, kind: output, shape index: {0}]   ;;  %s1712_s10 = inlined_call_operand.vmem [shape: f32[16,384], index: 10, kind: output, shape index: {1}]   ;;  %s1713_s11 = inlined_call_operand.vmem [shape: f32[16,128], index: 11, kind: output, shape index: {2}]  }
   0x1   :  { %18 = vsyncpa [#allocation5], 0 }
   0x2   :  { %19 = vsyncpa [#allocation8], 0 }
   0x3   :  { %20 = vsyncpa [#allocation11], 0 }
   0x4   :  { %21 = vsyncpa [#allocation14], 0  ;;  %s1457_s17 = smov [#allocation4]   ;;  %s1458_s19 = smov [#allocation7]  }
   0x5   :  { %s40_s18 = sshll.u32 %s1457_s17, 4  ;;  %s62_s20 = sshll.u32 %s1458_s19, 4  ;;  %s41_s18 = int_to_ptr.vmem [resolvable:$true] %s40_s18  ;;  %s63_s20 = int_to_ptr.vmem [resolvable:$true] %s62_s20 }
   0x6   :  { %s1271_s23 = scalar_lea.hbm %s1704_s2, 16 }
   0x7   :  { %p1272_p0 = scmp.ne.s32.totalorder %s1704_s2, %s1271_s23  ;;  %p1275_p1 = scmp.lt.u32.totalorder %s1271_s23, %s1704_s2 }
   0x9   :  { %p1277_p2 = pnand %p1275_p1, %p1272_p0 }
   0xb   :  { %1280 = shalt.err (!%p1277_p2)
}
   0xc   :  { %s1281_s28 = scalar_lea.vmem %s41_s18, 16  ;;  %s1285_s29 = scalar_lea.vmem %s41_s18, 32 }
   0xd   :  { %p1282_p3 = scmp.ne.s32.totalorder %s41_s18, %s1281_s28  ;;  %p1286_p4 = scmp.lt.s32.totalorder %s41_s18, %s41_s18 }
   0xe   :  { %p1287_p5 = scmp.lt.s32.totalorder %s1285_s29, %s1281_s28 }
  0x10   :  { %p1288_p6 = por %p1287_p5, %p1286_p4 }
  0x12   :  { %p1289_p7 = pnand %p1288_p6, %p1282_p3 }
  0x14   :  { %1292 = shalt.err (!%p1289_p7)
}
  0x15   :  { %43 = dma.hbm_to_vmem [thread:$0]  %s1704_s2, 16, %s41_s18, [#allocation5]  }
  0x16   :  { %s1293_s15 = scalar_lea.hbm %s1706_s4, 16 }
  0x17   :  { %p1294_p8 = scmp.ne.s32.totalorder %s1706_s4, %s1293_s15  ;;  %p1297_p9 = scmp.lt.u32.totalorder %s1293_s15, %s1706_s4 }
  0x19   :  { %p1299_p10 = pnand %p1297_p9, %p1294_p8 }
  0x1b   :  { %1302 = shalt.err (!%p1299_p10)
}
  0x1c   :  { %s1303_s22 = scalar_lea.vmem %s63_s20, 16  ;;  %s1307_s23 = scalar_lea.vmem %s63_s20, 32 }
  0x1d   :  { %p1304_p11 = scmp.ne.s32.totalorder %s63_s20, %s1303_s22  ;;  %p1308_p12 = scmp.lt.s32.totalorder %s63_s20, %s63_s20 }
  0x1e   :  { %p1309_p13 = scmp.lt.s32.totalorder %s1307_s23, %s1303_s22 }
  0x20   :  { %p1310_p0 = por %p1309_p13, %p1308_p12 }
  0x22   :  { %p1311_p1 = pnand %p1310_p0, %p1304_p11 }
  0x24   :  { %1314 = shalt.err (!%p1311_p1)
}
  0x25   :  { %65 = dma.hbm_to_vmem [thread:$0]  %s1706_s4, 16, %s63_s20, [#allocation8]  }
  0x26   :  { %s1459_s24 = smov [#allocation10]   ;;  %s1460_s26 = smov [#allocation2]  }
  0x27   :  { %s84_s25 = sshll.u32 %s1459_s24, 4  ;;  %s30_s27 = sshll.u32 %s1460_s26, 4  ;;  %s85_s25 = int_to_ptr.vmem [resolvable:$true] %s84_s25  ;;  %s31_s27 = int_to_ptr.vmem [resolvable:$true] %s30_s27 }
  0x28   :  { %s1315_s30 = scalar_lea.hbm %s1708_s6, 16 }
  0x29   :  { %p1316_p2 = scmp.ne.s32.totalorder %s1708_s6, %s1315_s30  ;;  %p1319_p3 = scmp.lt.u32.totalorder %s1315_s30, %s1708_s6 }
  0x2b   :  { %p1321_p4 = pnand %p1319_p3, %p1316_p2 }
  0x2d   :  { %1324 = shalt.err (!%p1321_p4)
}
  0x2e   :  { %s1325_s4 = scalar_lea.vmem %s85_s25, 16  ;;  %s1329_s20 = scalar_lea.vmem %s85_s25, 32 }
  0x2f   :  { %p1326_p5 = scmp.ne.s32.totalorder %s85_s25, %s1325_s4  ;;  %p1330_p6 = scmp.lt.s32.totalorder %s85_s25, %s85_s25 }
  0x30   :  { %p1331_p7 = scmp.lt.s32.totalorder %s1329_s20, %s1325_s4 }
  0x32   :  { %p1332_p8 = por %p1331_p7, %p1330_p6 }
  0x34   :  { %p1333_p9 = pnand %p1332_p8, %p1326_p5 }
  0x36   :  { %1336 = shalt.err (!%p1333_p9)
}
  0x37   :  { %87 = dma.hbm_to_vmem [thread:$0]  %s1708_s6, 16, %s85_s25, [#allocation11]  }
  0x38   :  { %s1337_s22 = scalar_lea.hbm %s1703_s1, 16 }
  0x39   :  { %p1338_p10 = scmp.ne.s32.totalorder %s1703_s1, %s1337_s22  ;;  %p1341_p11 = scmp.lt.u32.totalorder %s1337_s22, %s1703_s1 }
  0x3b   :  { %p1343_p12 = pnand %p1341_p11, %p1338_p10 }
  0x3d   :  { %1346 = shalt.err (!%p1343_p12)
}
  0x3e   :  { %s1347_s26 = scalar_lea.vmem %s31_s27, 16  ;;  %s1351_s28 = scalar_lea.vmem %s31_s27, 32 }
  0x3f   :  { %p1348_p13 = scmp.ne.s32.totalorder %s31_s27, %s1347_s26  ;;  %p1352_p0 = scmp.lt.s32.totalorder %s31_s27, %s31_s27 }
  0x40   :  { %p1353_p1 = scmp.lt.s32.totalorder %s1351_s28, %s1347_s26 }
  0x42   :  { %p1354_p2 = por %p1353_p1, %p1352_p0 }
  0x44   :  { %p1355_p3 = pnand %p1354_p2, %p1348_p13 }
  0x46   :  { %1358 = shalt.err (!%p1355_p3)
}
  0x47   :  { %33 = dma.hbm_to_vmem [thread:$0]  %s1703_s1, 16, %s31_s27, [#allocation3]  }
  0x48   :  { %s1461_s29 = smov [#allocation6]   ;;  %s1359_s14 = scalar_lea.hbm %s1705_s3, 2048 }
  0x49   :  { %s49_s30 = sshll.u32 %s1461_s29, 4  ;;  %p1360_p4 = scmp.ne.s32.totalorder %s1705_s3, %s1359_s14  ;;  %s50_s30 = int_to_ptr.vmem [resolvable:$true] %s49_s30 }
  0x4a   :  { %p1363_p5 = scmp.lt.u32.totalorder %s1359_s14, %s1705_s3 }
  0x4c   :  { %p1365_p6 = pnand %p1363_p5, %p1360_p4 }
  0x4e   :  { %1368 = shalt.err (!%p1365_p6)
}
  0x4f   :  { %s1369_s17 = scalar_lea.vmem %s50_s30, 2048  ;;  %p1374_p8 = scmp.lt.s32.totalorder %s50_s30, %s50_s30 }
  0x50   :  { %p1370_p7 = scmp.ne.s32.totalorder %s50_s30, %s1369_s17  ;;  %p1375_p9 = scmp.lt.s32.totalorder %s1369_s17, %s1369_s17 }
  0x52   :  { %p1376_p10 = por %p1375_p9, %p1374_p8 }
  0x54   :  { %p1377_p11 = pnand %p1376_p10, %p1370_p7 }
  0x56   :  { %1380 = shalt.err (!%p1377_p11)
}
  0x57   :  { %s1462_s1 = smov 128   ;;  %s1463_s27 = smov 8  }
  0x58   :  { %55 = dma.hbm_to_vmem [thread:$0]  %s1705_s3, 2048, %s50_s30, [#allocation5], %s1462_s1, %s1462_s1, %s1463_s27  }
  0x59   :  { %s1464_s22 = smov [#allocation9]   ;;  %s1465_s2 = smov [#allocation12]  }
  0x5a   :  { %s71_s23 = sshll.u32 %s1464_s22, 4  ;;  %s93_s18 = sshll.u32 %s1465_s2, 4  ;;  %s72_s23 = int_to_ptr.vmem [resolvable:$true] %s71_s23  ;;  %s94_s18 = int_to_ptr.vmem [resolvable:$true] %s93_s18 }
  0x5b   :  { %s1381_s28 = scalar_lea.hbm %s1707_s5, 2048 }
  0x5c   :  { %p1382_p12 = scmp.ne.s32.totalorder %s1707_s5, %s1381_s28  ;;  %p1385_p13 = scmp.lt.u32.totalorder %s1381_s28, %s1707_s5 }
  0x5e   :  { %p1387_p0 = pnand %p1385_p13, %p1382_p12 }
  0x60   :  { %1390 = shalt.err (!%p1387_p0)
}
  0x61   :  { %s1391_s3 = scalar_lea.vmem %s72_s23, 2048  ;;  %p1396_p2 = scmp.lt.s32.totalorder %s72_s23, %s72_s23 }
  0x62   :  { %p1392_p1 = scmp.ne.s32.totalorder %s72_s23, %s1391_s3  ;;  %p1397_p3 = scmp.lt.s32.totalorder %s1391_s3, %s1391_s3 }
  0x64   :  { %p1398_p4 = por %p1397_p3, %p1396_p2 }
  0x66   :  { %p1399_p5 = pnand %p1398_p4, %p1392_p1 }
  0x68   :  { %1402 = shalt.err (!%p1399_p5)
}
  0x69   :  { %77 = dma.hbm_to_vmem [thread:$0]  %s1707_s5, 2048, %s72_s23, [#allocation8], %s1462_s1, %s1462_s1, %s1463_s27  }
  0x6a   :  { %s1403_s4 = scalar_lea.hbm %s1709_s7, 12288 }
  0x6b   :  { %p1404_p6 = scmp.ne.s32.totalorder %s1709_s7, %s1403_s4  ;;  %p1407_p7 = scmp.lt.u32.totalorder %s1403_s4, %s1709_s7 }
  0x6d   :  { %p1409_p8 = pnand %p1407_p7, %p1404_p6 }
  0x6f   :  { %1412 = shalt.err (!%p1409_p8)
}
  0x70   :  { %s1413_s21 = scalar_lea.vmem %s94_s18, 12288  ;;  %p1418_p10 = scmp.lt.s32.totalorder %s94_s18, %s94_s18 }
  0x71   :  { %p1414_p9 = scmp.ne.s32.totalorder %s94_s18, %s1413_s21  ;;  %p1419_p11 = scmp.lt.s32.totalorder %s1413_s21, %s1413_s21 }
  0x73   :  { %p1420_p12 = por %p1419_p11, %p1418_p10 }
  0x75   :  { %p1421_p13 = pnand %p1420_p12, %p1414_p9 }
  0x77   :  { %1424 = shalt.err (!%p1421_p13)
}
  0x78   :  { %s1466_s5 = smov 384   ;;  %s1467_s1 = smov 24  }
  0x79   :  { %99 = dma.hbm_to_vmem [thread:$0]  %s1709_s7, 12288, %s94_s18, [#allocation11], %s1466_s5, %s1466_s5, %s1467_s1  }
  0x7a   :  { %s1468_s23 = smov [#allocation13]   ;;  %s1425_s28 = scalar_lea.hbm %s1710_s8, 96 }
  0x7b   :  { %s105_s2 = sshll.u32 %s1468_s23, 4  ;;  %p1426_p0 = scmp.ne.s32.totalorder %s1710_s8, %s1425_s28  ;;  %s106_s2 = int_to_ptr.vmem [resolvable:$true] %s105_s2 }
  0x7c   :  { %p1429_p1 = scmp.lt.u32.totalorder %s1425_s28, %s1710_s8 }
  0x7e   :  { %p1431_p2 = pnand %p1429_p1, %p1426_p0 }
  0x80   :  { %1434 = shalt.err (!%p1431_p2)
}
  0x81   :  { %s1435_s3 = scalar_lea.vmem %s106_s2, 96  ;;  %p1440_p4 = scmp.lt.s32.totalorder %s106_s2, %s106_s2 }
  0x82   :  { %p1436_p3 = scmp.ne.s32.totalorder %s106_s2, %s1435_s3  ;;  %p1441_p5 = scmp.lt.s32.totalorder %s1435_s3, %s1435_s3 }
  0x84   :  { %p1442_p6 = por %p1441_p5, %p1440_p4 }
  0x86   :  { %p1443_p7 = pnand %p1442_p6, %p1436_p3 }
  0x88   :  { %1446 = shalt.err (!%p1443_p7)
}
  0x89   :  { %s1469_s7 = smov 48   ;;  %s1470_s18 = smov 3  }
  0x8a   :  { %111 = dma.hbm_to_vmem [thread:$0]  %s1710_s8, 96, %s106_s2, [#allocation14], %s1469_s7, %s1469_s7, %s1470_s18  }
  0x8b   :  { %1447 = dma.done.wait [#allocation3], 16  }
  0x8c   :  { %1448 = vsyncadd [#allocation3], 4294967280 }
  0x8d   :  { %1449 = dma.done.wait [#allocation5], 2064  }
  0x8e   :  { %1450 = vsyncadd [#allocation5], 4294965232 }
  0x8f   :  { %1451 = dma.done.wait [#allocation8], 2064  }
  0x90   :  { %1452 = vsyncadd [#allocation8], 4294965232 }
  0x91   :  { %1453 = dma.done.wait [#allocation11], 12304  }
  0x92   :  { %1454 = vsyncadd [#allocation11], 4294954992 }
  0x93   :  { %1455 = dma.done.wait [#allocation14], 96  }
  0x94   :  { %1456 = vsyncadd [#allocation14], 4294967200  ;;  %v136_v0 = vld [vmem:[%s1702_s0] sm:$0xff]  ;;  %v137_v1 = vld [vmem:[%s1702_s0 + $0x8] sm:$0xff] }
  0x95   :  { %138 = vadd.xlane.f32.xlu0 %v136_v0  ;;  %v179_v2 = vld [vmem:[#allocation9] sm:$0xff]  ;;  %v180_v3 = vld [vmem:[#allocation9 + $0x8] sm:$0xff]  ;;  %v181_v7 = vld [vmem:[#allocation9 + $0x10] sm:$0xff] }
  0x96   :  { %v281_v4 = vld [vmem:[#allocation6] sm:$0xff]  ;;  %v1060_v5 = vpack.c.bf16 %v180_v3, %v179_v2  ;;  %v282_v6 = vld [vmem:[#allocation6 + $0x8] sm:$0xff]  ;;  %v283_v11 = vld [vmem:[#allocation6 + $0x10] sm:$0xff] }
  0x97   :  { %v182_v8 = vld [vmem:[#allocation9 + $0x18] sm:$0xff]  ;;  %v1092_v9 = vpack.c.bf16 %v282_v6, %v281_v4  ;;  %v183_v22 = vld [vmem:[#allocation9 + $0x20] sm:$0xff]  ;;  %v184_v23 = vld [vmem:[#allocation9 + $0x28] sm:$0xff] }
  0x98   :  { %v1064_v10 = vpack.c.bf16 %v182_v8, %v181_v7  ;;  %v284_v12 = vld [vmem:[#allocation6 + $0x18] sm:$0xff]  ;;  %1061 = vmatprep.subr.bf16.mxu0 %v1060_v5  ;;  %v285_v24 = vld [vmem:[#allocation6 + $0x20] sm:$0xff]  ;;  %v1068_v25 = vpack.c.bf16 %v184_v23, %v183_v22  ;;  %v286_v26 = vld [vmem:[#allocation6 + $0x28] sm:$0xff] }
  0x99   :  { %140 = vadd.xlane.f32.xlu0 %v137_v1  ;;  %v1096_v13 = vpack.c.bf16 %v284_v12, %v283_v11  ;;  %1093 = vmatprep.subr.bf16.mxu1 %v1092_v9  ;;  %v1100_v27 = vpack.c.bf16 %v286_v26, %v285_v24  ;;  %v185_v28 = vld [vmem:[#allocation9 + $0x30] sm:$0xff]  ;;  %v186_v29 = vld [vmem:[#allocation9 + $0x38] sm:$0xff]  ;;  %v187_v34 = vld [vmem:[#allocation9 + $0x40] sm:$0xff] }
  0x9a   :  { %1063 = vmatpush3.bf16.msra.mxu0 %v1060_v5  ;;  %1095 = vmatpush3.bf16.msra.mxu1 %v1092_v9  ;;  %v287_v30 = vld [vmem:[#allocation6 + $0x30] sm:$0xff]  ;;  %v1072_v31 = vpack.c.bf16 %v186_v29, %v185_v28  ;;  %v288_v32 = vld [vmem:[#allocation6 + $0x38] sm:$0xff]  ;;  %v289_v36 = vld [vmem:[#allocation6 + $0x40] sm:$0xff] }
  0x9b   :  { %1065 = vmatprep.subr.bf16.mxu0 %v1064_v10  ;;  %1097 = vmatprep.subr.bf16.mxu1 %v1096_v13  ;;  %v1104_v33 = vpack.c.bf16 %v288_v32, %v287_v30  ;;  %v188_v35 = vld [vmem:[#allocation9 + $0x48] sm:$0xff]  ;;  %v189_v40 = vld [vmem:[#allocation9 + $0x50] sm:$0xff]  ;;  %v190_v41 = vld [vmem:[#allocation9 + $0x58] sm:$0xff] }
  0x9c   :  { %v1076_v37 = vpack.c.bf16 %v188_v35, %v187_v34  ;;  %v290_v38 = vld [vmem:[#allocation6 + $0x48] sm:$0xff]  ;;  %v291_v42 = vld [vmem:[#allocation6 + $0x50] sm:$0xff]  ;;  %v1080_v43 = vpack.c.bf16 %v190_v41, %v189_v40  ;;  %v292_v44 = vld [vmem:[#allocation6 + $0x58] sm:$0xff] }
  0x9d   :  { %v1108_v39 = vpack.c.bf16 %v290_v38, %v289_v36  ;;  %v191_v45 = vld [vmem:[#allocation9 + $0x60] sm:$0xff]  ;;  %v192_v46 = vld [vmem:[#allocation9 + $0x68] sm:$0xff]  ;;  %v1112_v47 = vpack.c.bf16 %v292_v44, %v291_v42  ;;  %v193_v52 = vld [vmem:[#allocation9 + $0x70] sm:$0xff] }
  0x9e   :  { %1067 = vmatpush3.bf16.msra.mxu0 %v1064_v10  ;;  %1099 = vmatpush3.bf16.msra.mxu1 %v1096_v13  ;;  %v293_v48 = vld [vmem:[#allocation6 + $0x60] sm:$0xff]  ;;  %v294_v49 = vld [vmem:[#allocation6 + $0x68] sm:$0xff]  ;;  %v1084_v50 = vpack.c.bf16 %v192_v46, %v191_v45  ;;  %v295_v55 = vld [vmem:[#allocation6 + $0x70] sm:$0xff] }
  0x9f   :  { %1069 = vmatprep.subr.bf16.mxu0 %v1068_v25  ;;  %1101 = vmatprep.subr.bf16.mxu1 %v1100_v27  ;;  %v1116_v51 = vpack.c.bf16 %v294_v49, %v293_v48  ;;  %v194_v53 = vld [vmem:[#allocation9 + $0x78] sm:$0xff]  ;;  %v380_v58 = vld [vmem:[#allocation12 + $0x8] sm:$0xff]  ;;  %v383_v59 = vld [vmem:[#allocation12 + $0x20] sm:$0xff] }
  0xa0   :  { %v1088_v54 = vpack.c.bf16 %v194_v53, %v193_v52  ;;  %v296_v56 = vld [vmem:[#allocation6 + $0x78] sm:$0xff]  ;;  %v1124_v60 = vpack.c.bf16 %v383_v59, %v380_v58  ;;  %v384_v62 = vld [vmem:[#allocation12 + $0x28] sm:$0xff]  ;;  %v395_v29 = vld [vmem:[#allocation12 + $0x80] sm:$0xff] }
  0xa1   :  { %v1120_v57 = vpack.c.bf16 %v296_v56, %v295_v55  ;;  %v381_v61 = vld [vmem:[#allocation12 + $0x10] sm:$0xff]  ;;  %v844_v7 = vld [vmem:[#allocation2] ss:$0 sm:$0xff]  ;;  %v845_v9 = vld [vmem:[#allocation4] ss:$0 sm:$0xff] }
  0xa2   :  { %1071 = vmatpush3.bf16.msra.mxu0 %v1068_v25  ;;  %1103 = vmatpush3.bf16.msra.mxu1 %v1100_v27  ;;  %v1156_v63 = vpack.c.bf16 %v384_v62, %v381_v61  ;;  %v385_v26 = vld [vmem:[#allocation12 + $0x30] sm:$0xff]  ;;  %v392_v28 = vld [vmem:[#allocation12 + $0x68] sm:$0xff]  ;;  %v394_v34 = vld [vmem:[#allocation12 + $0x78] sm:$0xff] }
  0xa3   :  { %1073 = vmatprep.subr.bf16.mxu0 %v1072_v31  ;;  %1105 = vmatprep.subr.bf16.mxu1 %v1104_v33  ;;  %v393_v30 = vld [vmem:[#allocation12 + $0x70] sm:$0xff]  ;;  %v1132_v32 = vpack.c.bf16 %v395_v29, %v392_v28  ;;  %v398_v36 = vld [vmem:[#allocation12 + $0x98] sm:$0xff]  ;;  %v399_v38 = vld [vmem:[#allocation12 + $0xa0] sm:$0xff] }
  0xa4   :  { %v397_v42 = vld [vmem:[#allocation12 + $0x90] sm:$0xff]  ;;  %v404_v45 = vld [vmem:[#allocation12 + $0xc8] sm:$0xff]  ;;  %v407_v46 = vld [vmem:[#allocation12 + $0xe0] sm:$0xff] }
  0xa5   :  { %v408_v48 = vld [vmem:[#allocation12 + $0xe8] sm:$0xff]  ;;  %v406_v52 = vld [vmem:[#allocation12 + $0xd8] sm:$0xff]  ;;  %v413_v55 = vld [vmem:[#allocation12 + $0x110] sm:$0xff] }
  0xa6   :  { %1075 = vmatpush3.bf16.msra.mxu0 %v1072_v31  ;;  %1107 = vmatpush3.bf16.msra.mxu1 %v1104_v33  ;;  %v391_v33 = vld [vmem:[#allocation12 + $0x60] sm:$0xff]  ;;  %v412_v61 = vld [vmem:[#allocation12 + $0x108] sm:$0xff]  ;;  %v600_v28 = vld [vmem:[#allocation12 + $0x198] sm:$0xff] }
  0xa7   :  { %1077 = vmatprep.subr.bf16.mxu0 %v1076_v37  ;;  %1109 = vmatprep.subr.bf16.mxu1 %v1108_v39  ;;  %v1134_v40 = vpack.c.bf16 %v394_v34, %v391_v33  ;;  %v411_v56 = vld [vmem:[#allocation12 + $0x100] sm:$0xff]  ;;  %v847_v29 = vld [vmem:[#allocation7] ss:$0 sm:$0xff] }
  0xaa   :  { %1079 = vmatpush3.bf16.msra.mxu0 %v1076_v37  ;;  %1111 = vmatpush3.bf16.msra.mxu1 %v1108_v39  ;;  %v401_v37 = vld [vmem:[#allocation12 + $0xb0] sm:$0xff]  ;;  %v402_v39 = vld [vmem:[#allocation12 + $0xb8] sm:$0xff] }
  0xab   :  { %1081 = vmatprep.subr.bf16.mxu0 %v1080_v43  ;;  %1113 = vmatprep.subr.bf16.mxu1 %v1112_v47  ;;  %v1136_v41 = vpack.c.bf16 %v401_v37, %v398_v36  ;;  %v1168_v44 = vpack.c.bf16 %v402_v39, %v399_v38  ;;  %v605_v37 = vld [vmem:[#allocation12 + $0x1c0] sm:$0xff]  ;;  %v608_v38 = vld [vmem:[#allocation12 + $0x1d8] sm:$0xff] }
  0xae   :  { %1083 = vmatpush3.bf16.msra.mxu0 %v1080_v43  ;;  %1115 = vmatpush3.bf16.msra.mxu1 %v1112_v47  ;;  %v400_v43 = vld [vmem:[#allocation12 + $0xa8] sm:$0xff]  ;;  %v405_v47 = vld [vmem:[#allocation12 + $0xd0] sm:$0xff] }
  0xaf   :  { %1085 = vmatprep.subr.bf16.mxu0 %v1084_v50  ;;  %1117 = vmatprep.subr.bf16.mxu1 %v1116_v51  ;;  %v1138_v49 = vpack.c.bf16 %v400_v43, %v397_v42  ;;  %v1172_v53 = vpack.c.bf16 %v408_v48, %v405_v47  ;;  %v606_v42 = vld [vmem:[#allocation12 + $0x1c8] sm:$0xff]  ;;  %v613_v47 = vld [vmem:[#allocation12 + $0x200] sm:$0xff] }
  0xb2   :  { %1087 = vmatpush3.bf16.msra.mxu0 %v1084_v50  ;;  %1119 = vmatpush3.bf16.msra.mxu1 %v1116_v51  ;;  %v1140_v50 = vpack.c.bf16 %v407_v46, %v404_v45  ;;  %v403_v51 = vld [vmem:[#allocation12 + $0xc0] sm:$0xff]  ;;  %v610_v46 = vld [vmem:[#allocation12 + $0x1e8] sm:$0xff] }
  0xb3   :  { %1089 = vmatprep.subr.bf16.mxu0 %v1088_v54  ;;  %1121 = vmatprep.subr.bf16.mxu1 %v1120_v57  ;;  %v1142_v58 = vpack.c.bf16 %v406_v52, %v403_v51  ;;  %v614_v51 = vld [vmem:[#allocation12 + $0x208] sm:$0xff] }
  0xb6   :  { %1091 = vmatpush3.bf16.msra.mxu0 %v1088_v54  ;;  %1123 = vmatpush3.bf16.msra.mxu1 %v1120_v57  ;;  %v410_v54 = vld [vmem:[#allocation12 + $0xf8] sm:$0xff] }
  0xb7   :  { %1125 = vmatprep.subr.bf16.mxu0 %v1124_v60  ;;  %1157 = vmatprep.subr.bf16.mxu1 %v1156_v63  ;;  %v414_v57 = vld [vmem:[#allocation12 + $0x118] sm:$0xff]  ;;  %v1144_v59 = vpack.c.bf16 %v413_v55, %v410_v54  ;;  %v409_v60 = vld [vmem:[#allocation12 + $0xf0] sm:$0xff]  ;;  %v609_v54 = vld [vmem:[#allocation12 + $0x1e0] sm:$0xff] }
  0xb8   :  { %v1176_v62 = vpack.c.bf16 %v414_v57, %v411_v56  ;;  %v612_v55 = vld [vmem:[#allocation12 + $0x1f8] sm:$0xff] }
  0xb9   :  { %v616_v57 = vld [vmem:[#allocation12 + $0x218] sm:$0xff] }
 0x122   :  { %v139_v14 = vpop.xlane.xlu0 %138 }
 0x123   :  { %v143_v15 = vmul.f32 0.0078125, %v139_v14  ;;  %v379_v14 = vld [vmem:[#allocation12] sm:$0xff] }
 0x125   :  { %v1634_v16 = vsub.f32 %v136_v0, %v143_v15  ;;  %v382_v15 = vld [vmem:[#allocation12 + $0x18] sm:$0xff] }
 0x126   :  { %v141_v17 = vpop.xlane.xlu0 %140  ;;  %v1126_v23 = vpack.c.bf16 %v382_v15, %v379_v14  ;;  %v423_v14 = vld [vmem:[#allocation12 + $0x160] sm:$0xff] }
 0x127   :  { %v144_v18 = vmul.f32 0.0078125, %v141_v17  ;;  %v147_v19 = vmul.f32 %v1634_v16, %v1634_v16  ;;  %v386_v17 = vld [vmem:[#allocation12 + $0x38] sm:$0xff] }
 0x129   :  { %v1638_v20 = vsub.f32 %v137_v1, %v144_v18  ;;  %149 = vadd.xlane.f32.xlu1 %v147_v19  ;;  %v389_v18 = vld [vmem:[#allocation12 + $0x50] sm:$0xff]  ;;  %v387_v19 = vld [vmem:[#allocation12 + $0x40] sm:$0xff] }
 0x12a   :  { %v1128_v25 = vpack.c.bf16 %v389_v18, %v386_v17  ;;  %v426_v17 = vld [vmem:[#allocation12 + $0x178] sm:$0xff] }
 0x12b   :  { %v148_v21 = vmul.f32 %v1638_v20, %v1638_v20  ;;  %v1184_v18 = vpack.c.bf16 %v426_v17, %v423_v14  ;;  %v632_v14 = vld [vmem:[#allocation12 + $0x298] sm:$0xff] }
 0x12d   :  { %151 = vadd.xlane.f32.xlu1 %v148_v21  ;;  %v390_v21 = vld [vmem:[#allocation12 + $0x58] sm:$0xff] }
 0x12e   :  { %v1160_v27 = vpack.c.bf16 %v390_v21, %v387_v19  ;;  %v598_v19 = vld [vmem:[#allocation12 + $0x188] sm:$0xff]  ;;  %v601_v21 = vld [vmem:[#allocation12 + $0x1a0] sm:$0xff] }
 0x1b6   :  { %v150_v0 = vpop.xlane.xlu1 %149 }
 0x1b7   :  { %v153_v1 = vmul.f32 0.0078125, %v150_v0  ;;  %v419_v0 = vld [vmem:[#allocation12 + $0x140] sm:$0xff] }
 0x1b9   :  { %v155_v2 = vadd.f32 1e-05, %v153_v1  ;;  %v417_v1 = vld [vmem:[#allocation12 + $0x130] sm:$0xff] }
 0x1ba   :  { %v152_v3 = vpop.xlane.xlu1 %151 }
 0x1bb   :  { %1267 = vrsqrt.f32 %v155_v2  ;;  %v154_v4 = vmul.f32 0.0078125, %v152_v3  ;;  %v420_v2 = vld [vmem:[#allocation12 + $0x148] sm:$0xff]  ;;  %v1146_v3 = vpack.c.bf16 %v412_v61, %v409_v60  ;;  %v620_v60 = vld [vmem:[#allocation12 + $0x238] sm:$0xff]  ;;  %v1198_v61 = vpack.c.bf16 %v612_v55, %v609_v54 }
 0x1bd   :  { %v156_v5 = vadd.f32 1e-05, %v154_v4 }
 0x1bf   :  { %1269 = vrsqrt.f32 %v156_v5  ;;  %v415_v5 = vld [vmem:[#allocation12 + $0x120] sm:$0xff] }
 0x1c5   :  { %v1268_v6 = vpop.eup %1267 }
 0x1c6   :  { %v159_v8 = vmul.f32 %v1268_v6, %v1634_v16  ;;  %v388_v16 = vld [vmem:[#allocation12 + $0x48] sm:$0xff]  ;;  %v418_v6 = vld [vmem:[#allocation12 + $0x138] sm:$0xff] }
 0x1c7   :  { %v1130_v31 = vpack.c.bf16 %v388_v16, %v385_v26  ;;  %v846_v16 = vld [vmem:[#allocation10] ss:$0 sm:$0xff] }
 0x1c8   :  { %v168_v10 = vmul.f32 %v844_v7, %v159_v8  ;;  %v422_v8 = vld [vmem:[#allocation12 + $0x158] sm:$0xff] }
 0x1c9   :  { %v1270_v11 = vpop.eup %1269 }
 0x1ca   :  { %v160_v12 = vmul.f32 %v1270_v11, %v1638_v20  ;;  %v177_v13 = vadd.f32 %v845_v9, %v168_v10  ;;  %v396_v20 = vld [vmem:[#allocation12 + $0x88] sm:$0xff]  ;;  %v1150_v10 = vpack.c.bf16 %v418_v6, %v415_v5 }
 0x1cb   :  { %v1164_v35 = vpack.c.bf16 %v396_v20, %v393_v30  ;;  %v626_v5 = vld [vmem:[#allocation12 + $0x268] sm:$0xff] }
 0x1cc   :  { %v169_v22 = vmul.f32 %v844_v7, %v160_v12  ;;  %952 = vmatprep.mubr.f32.mxu0 %v177_v13  ;;  %987 = vmatprep.mubr.f32.mxu1 %v177_v13  ;;  %v1180_v7 = vpack.c.bf16 %v420_v2, %v417_v1  ;;  %v421_v12 = vld [vmem:[#allocation12 + $0x150] sm:$0xff]  ;;  %v424_v13 = vld [vmem:[#allocation12 + $0x168] sm:$0xff] }
 0x1cd   :  { %v1154_v15 = vpack.c.bf16 %v424_v13, %v421_v12  ;;  %v622_v2 = vld [vmem:[#allocation12 + $0x248] sm:$0xff]  ;;  %v631_v12 = vld [vmem:[#allocation12 + $0x290] sm:$0xff]  ;;  %v629_v13 = vld [vmem:[#allocation12 + $0x280] sm:$0xff] }
 0x1ce   :  { %v178_v24 = vadd.f32 %v845_v9, %v169_v22  ;;  %v425_v9 = vld [vmem:[#allocation12 + $0x170] sm:$0xff]  ;;  %v1188_v22 = vpack.c.bf16 %v601_v21, %v598_v19  ;;  %v630_v19 = vld [vmem:[#allocation12 + $0x288] sm:$0xff]  ;;  %v1240_v21 = vpack.c.bf16 %v632_v14, %v629_v13 }
 0x1cf   :  { %v1152_v11 = vpack.c.bf16 %v425_v9, %v422_v8  ;;  %v621_v8 = vld [vmem:[#allocation12 + $0x240] sm:$0xff]  ;;  %v624_v9 = vld [vmem:[#allocation12 + $0x258] sm:$0xff] }
 0x1d0   :  { %953 = vmatmul.mubr.f32.vlgmr.msra.gmra.mrb[0].mxu0 %v178_v24  ;;  %988 = vmatmul.mubr.f32.vlgmr.msra.gmra.mrb[0].mxu1 %v178_v24  ;;  %v602_v24 = vld [vmem:[#allocation12 + $0x1a8] sm:$0xff] }
 0x1d1   :  { %1127 = vmatpush1.bf16.msra.mxu0 %v1126_v23  ;;  %1159 = vmatpush3.bf16.msra.mxu1 %v1156_v63  ;;  %v416_v63 = vld [vmem:[#allocation12 + $0x128] sm:$0xff]  ;;  %v599_v23 = vld [vmem:[#allocation12 + $0x190] sm:$0xff] }
 0x1d2   :  { %1129 = vmatprep.subr.bf16.mxu0 %v1128_v25  ;;  %1161 = vmatprep.subr.bf16.mxu1 %v1160_v27  ;;  %v1148_v4 = vpack.c.bf16 %v419_v0, %v416_v63  ;;  %v1471_v25 = vmov 0.0   ;;  %v1220_v26 = vpack.c.bf16 %v602_v24, %v599_v23  ;;  %v615_v63 = vld [vmem:[#allocation12 + $0x210] sm:$0xff]  ;;  %v618_v0 = vld [vmem:[#allocation12 + $0x228] sm:$0xff]  ;;  %v637_v23 = vld [vmem:[#allocation12 + $0x2c0] sm:$0xff] }
 0x1d3   :  { %508 = vmatprep.mubr.f32.mxu0 %v1471_v25  ;;  %v1202_v6 = vpack.c.bf16 %v618_v0, %v615_v63  ;;  %v635_v24 = vld [vmem:[#allocation12 + $0x2b0] sm:$0xff] }
 0x1d5   :  { %1131 = vmatpush1.bf16.msra.mxu0 %v1130_v31  ;;  %1163 = vmatpush3.bf16.msra.mxu1 %v1160_v27  ;;  %v597_v27 = vld [vmem:[#allocation12 + $0x180] sm:$0xff]  ;;  %v604_v31 = vld [vmem:[#allocation12 + $0x1b8] sm:$0xff] }
 0x1d6   :  { %1133 = vmatprep.subr.bf16.mxu0 %v1132_v32  ;;  %1165 = vmatprep.subr.bf16.mxu1 %v1164_v35  ;;  %v607_v32 = vld [vmem:[#allocation12 + $0x1d0] sm:$0xff]  ;;  %v1190_v36 = vpack.c.bf16 %v600_v28, %v597_v27  ;;  %v633_v28 = vld [vmem:[#allocation12 + $0x2a0] sm:$0xff] }
 0x1d7   :  { %v1192_v45 = vpack.c.bf16 %v607_v32, %v604_v31  ;;  %v643_v31 = vld [vmem:[#allocation12 + $0x2f0] sm:$0xff]  ;;  %v641_v32 = vld [vmem:[#allocation12 + $0x2e0] sm:$0xff] }
 0x1d9   :  { %1135 = vmatpush1.bf16.msra.mxu0 %v1134_v40  ;;  %1167 = vmatpush3.bf16.msra.mxu1 %v1164_v35 }
 0x1da   :  { %1137 = vmatprep.subr.bf16.mxu0 %v1136_v41  ;;  %1169 = vmatprep.subr.bf16.mxu1 %v1168_v44  ;;  %v603_v41 = vld [vmem:[#allocation12 + $0x1b0] sm:$0xff] }
 0x1db   :  { %v1194_v52 = vpack.c.bf16 %v606_v42, %v603_v41  ;;  %v429_v41 = vlaneseq }
 0x1dd   :  { %1139 = vmatpush1.bf16.msra.mxu0 %v1138_v49  ;;  %1171 = vmatpush3.bf16.msra.mxu1 %v1168_v44  ;;  %v1224_v49 = vpack.c.bf16 %v608_v38, %v605_v37  ;;  %v642_v37 = vld [vmem:[#allocation12 + $0x2e8] sm:$0xff]  ;;  %v430_v42 = vshrl.u32 %v429_v41, 7 }
 0x1de   :  { %1141 = vmatprep.subr.bf16.mxu0 %v1140_v50  ;;  %1173 = vmatprep.subr.bf16.mxu1 %v1172_v53  ;;  %v611_v50 = vld [vmem:[#allocation12 + $0x1f0] sm:$0xff] }
 0x1df   :  { %v1228_v56 = vpack.c.bf16 %v614_v51, %v611_v50 }
 0x1e1   :  { %1143 = vmatpush1.bf16.msra.mxu0 %v1142_v58  ;;  %1175 = vmatpush3.bf16.msra.mxu1 %v1172_v53  ;;  %v1196_v53 = vpack.c.bf16 %v613_v47, %v610_v46  ;;  %v619_v58 = vld [vmem:[#allocation12 + $0x230] sm:$0xff]  ;;  %v435_v46 = vsub.s32 1, %v430_v42  ;;  %v439_v47 = vsub.s32 2, %v430_v42 }
 0x1e2   :  { %1145 = vmatprep.subr.bf16.mxu0 %v1144_v59  ;;  %1177 = vmatprep.subr.bf16.mxu1 %v1176_v62  ;;  %v617_v59 = vld [vmem:[#allocation12 + $0x220] sm:$0xff] }
 0x1e3   :  { %v1232_v1 = vpack.c.bf16 %v620_v60, %v617_v59  ;;  %v646_v60 = vld [vmem:[#allocation13 + $0x3] sm:$0x7] }
 0x1e4   :  { %v659_v63 = vrot.slane %v646_v60, %v439_v47 }
 0x1e5   :  { %1147 = vmatpush1.bf16.msra.mxu0 %v1146_v3  ;;  %1179 = vmatpush3.bf16.msra.mxu1 %v1176_v62  ;;  %v1200_v62 = vpack.c.bf16 %v619_v58, %v616_v57  ;;  %v625_v3 = vld [vmem:[#allocation12 + $0x260] sm:$0xff] }
 0x1e6   :  { %1149 = vmatprep.subr.bf16.mxu0 %v1148_v4  ;;  %1181 = vmatprep.subr.bf16.mxu1 %v1180_v7  ;;  %v623_v4 = vld [vmem:[#allocation12 + $0x250] sm:$0xff] }
 0x1e9   :  { %1151 = vmatpush1.bf16.msra.mxu0 %v1150_v10  ;;  %1183 = vmatpush3.bf16.msra.mxu1 %v1180_v7  ;;  %v1204_v7 = vpack.c.bf16 %v625_v3, %v622_v2  ;;  %v1236_v10 = vpack.c.bf16 %v626_v5, %v623_v4 }
 0x1ea   :  { %1153 = vmatprep.subr.bf16.mxu0 %v1152_v11  ;;  %1185 = vmatprep.subr.bf16.mxu1 %v1184_v18  ;;  %v628_v11 = vld [vmem:[#allocation12 + $0x278] sm:$0xff] }
 0x1eb   :  { %v1208_v17 = vpack.c.bf16 %v631_v12, %v628_v11 }
 0x1ed   :  { %1155 = vmatpush1.bf16.msra.mxu0 %v1154_v15  ;;  %1187 = vmatpush3.bf16.msra.mxu1 %v1184_v18  ;;  %v1206_v15 = vpack.c.bf16 %v624_v9, %v621_v8  ;;  %v627_v18 = vld [vmem:[#allocation12 + $0x270] sm:$0xff] }
 0x1ee   :  { %1189 = vmatprep.subr.bf16.mxu0 %v1188_v22  ;;  %1221 = vmatprep.subr.bf16.mxu1 %v1220_v26  ;;  %v634_v22 = vld [vmem:[#allocation12 + $0x2a8] sm:$0xff] }
 0x1ef   :  { %v1212_v27 = vpack.c.bf16 %v637_v23, %v634_v22 }
 0x2a3   :  { %v954_v30 = vpop.f32.mrb[0].mxu0  ;;  %v989_v20 = vpop.f32.mrb[0].mxu1 }
 0x2a4   :  { %v274_v33 = vadd.f32 %v954_v30, %v846_v16  ;;  %v268_v34 = vpop.f32.mrb[1].mxu0  ;;  %v370_v35 = vpop.f32.mrb[1].mxu1  ;;  %v1647_v44 = vadd.f32 %v989_v20, %v847_v29  ;;  %v640_v20 = vld [vmem:[#allocation12 + $0x2d8] sm:$0xff] }
 0x2a5   :  { %v269_v39 = vadd.f32 %v846_v16, %v268_v34  ;;  %v1645_v40 = vadd.f32 %v847_v29, %v370_v35  ;;  %v1210_v16 = vpack.c.bf16 %v630_v19, %v627_v18  ;;  %v636_v29 = vld [vmem:[#allocation12 + $0x2b8] sm:$0xff]  ;;  %v1216_v35 = vpack.c.bf16 %v643_v31, %v640_v20 }
 0x2a6   :  { %v278_v43 = vmax.f32 %v274_v33, 0.0  ;;  %v644_v33 = vld [vmem:[#allocation12 + $0x2f8] sm:$0xff]  ;;  %v1214_v34 = vpack.c.bf16 %v636_v29, %v633_v28 }
 0x2a7   :  { %v277_v48 = vmax.f32 %v269_v39, 0.0  ;;  %509 = vmatmul.mubr.f32.vlgmr.msra.gmra.mrb[2].mxu0 %v1645_v40  ;;  %1022 = vmatprep.mubr.f32.mxu1 %v1645_v40  ;;  %v1248_v38 = vpack.c.bf16 %v644_v33, %v641_v32 }
 0x2a8   :  { %280 = vst [vmem:[%s1713_s11 + $0x8] sm:$0xff] %v278_v43  ;;  %1191 = vmatpush1.bf16.msra.mxu0 %v1190_v36  ;;  %1023 = vmatmul.mubr.f32.vlgmr.msra.gmra.mrb[2].mxu1 %v1647_v44  ;;  %v639_v36 = vld [vmem:[#allocation12 + $0x2d0] sm:$0xff]  ;;  %v431_v43 = vsub.s32 0, %v430_v42 }
 0x2a9   :  { %279 = vst [vmem:[%s1713_s11] sm:$0xff] %v277_v48  ;;  %1223 = vmatpush3.bf16.msra.mxu1 %v1220_v26  ;;  %1057 = vmatprep.mubr.f32.mxu1 %v1645_v40  ;;  %v638_v26 = vld [vmem:[#allocation12 + $0x2c8] sm:$0xff]  ;;  %v1218_v39 = vpack.c.bf16 %v642_v37, %v639_v36 }
 0x2aa   :  { %514 = vmatprep.mubr.f32.mxu0 %v1471_v25  ;;  %1193 = vmatprep.subr.bf16.mxu0 %v1192_v45  ;;  %v1244_v30 = vpack.c.bf16 %v638_v26, %v635_v24  ;;  %v427_v45 = vld [vmem:[#allocation13] sm:$0x7] }
 0x2ab   :  { %515 = vmatmul.mubr.f32.gmra.mrb[4].mxu0 %v1647_v44  ;;  %1225 = vmatprep.subr.bf16.mxu1 %v1224_v49  ;;  %v432_v48 = vrot.slane %v427_v45, %v431_v43  ;;  %v440_v50 = vrot.slane %v427_v45, %v439_v47 }
 0x2ac   :  { %1195 = vmatpush1.bf16.msra.mxu0 %v1194_v52  ;;  %727 = vmatprep.mubr.f32.mxu0 %v1471_v25 }
 0x2ad   :  { %1227 = vmatpush3.bf16.msra.mxu1 %v1224_v49  ;;  %1197 = vmatprep.subr.bf16.mxu0 %v1196_v53  ;;  %v436_v49 = vrot.slane %v427_v45, %v435_v46 }
 0x2ae   :  { %1229 = vmatprep.subr.bf16.mxu1 %v1228_v56 }
 0x2b0   :  { %1199 = vmatpush1.bf16.msra.mxu0 %v1198_v61  ;;  %v651_v61 = vrot.slane %v646_v60, %v431_v43 }
 0x2b1   :  { %1231 = vmatpush3.bf16.msra.mxu1 %v1228_v56  ;;  %1201 = vmatprep.subr.bf16.mxu0 %v1200_v62  ;;  %v655_v62 = vrot.slane %v646_v60, %v435_v46 }
 0x2b2   :  { %1233 = vmatprep.subr.bf16.mxu1 %v1232_v1 }
 0x2b4   :  { %1203 = vmatpush1.bf16.msra.mxu0 %v1202_v6 }
 0x2b5   :  { %1235 = vmatpush3.bf16.msra.mxu1 %v1232_v1  ;;  %1205 = vmatprep.subr.bf16.mxu0 %v1204_v7 }
 0x2b6   :  { %1237 = vmatprep.subr.bf16.mxu1 %v1236_v10 }
 0x2b8   :  { %1207 = vmatpush1.bf16.msra.mxu0 %v1206_v15 }
 0x2b9   :  { %1239 = vmatpush3.bf16.msra.mxu1 %v1236_v10  ;;  %1209 = vmatprep.subr.bf16.mxu0 %v1208_v17 }
 0x2ba   :  { %1241 = vmatprep.subr.bf16.mxu1 %v1240_v21 }
 0x2bc   :  { %1211 = vmatpush1.bf16.msra.mxu0 %v1210_v16 }
 0x2bd   :  { %1243 = vmatpush3.bf16.msra.mxu1 %v1240_v21  ;;  %1213 = vmatprep.subr.bf16.mxu0 %v1212_v27 }
 0x2be   :  { %1245 = vmatprep.subr.bf16.mxu1 %v1244_v30 }
 0x2c0   :  { %1215 = vmatpush1.bf16.msra.mxu0 %v1214_v34 }
 0x2c1   :  { %1247 = vmatpush3.bf16.msra.mxu1 %v1244_v30  ;;  %1217 = vmatprep.subr.bf16.mxu0 %v1216_v35 }
 0x2c2   :  { %1249 = vmatprep.subr.bf16.mxu1 %v1248_v38 }
 0x2c4   :  { %1219 = vmatpush1.bf16.msra.mxu0 %v1218_v39 }
 0x2c5   :  { %1251 = vmatpush3.bf16.msra.mxu1 %v1248_v38 }
 0x2c7   :  { %728 = vmatmul.mubr.f32.vlgmr.msra.gmra.mrb[6].mxu0 %v1645_v40 }
 0x2c8   :  { %1058 = vmatmul.mubr.f32.vlgmr.msra.gmra.mrb[4].mxu1 %v1647_v44  ;;  %733 = vmatprep.mubr.f32.mxu0 %v1471_v25 }
 0x2cb   :  { %734 = vmatmul.mubr.f32.gmra.mrb[8].mxu0 %v1647_v44 }
 0x37a   :  { %v510_v51 = vpop.f32.mrb[2].mxu0 }
 0x37b   :  { %v511_v52 = vadd.f32 %v510_v51, %v432_v48  ;;  %v512_v53 = vpop.f32.mrb[3].mxu0  ;;  %v1024_v54 = vpop.f32.mrb[2].mxu1 }
 0x37c   :  { %v513_v40 = vadd.f32 %v512_v53, %v436_v49  ;;  %v593_v55 = vadd.f32 %v1024_v54, %v440_v50  ;;  %v587_v56 = vpop.f32.mrb[3].mxu1 }
 0x37d   :  { %815 = vst [vmem:[%s1711_s9] sm:$0xff] %v511_v52  ;;  %v588_v25 = vadd.f32 %v587_v56, %v440_v50 }
 0x37e   :  { %816 = vst [vmem:[%s1711_s9 + $0x8] sm:$0xff] %v513_v40  ;;  %820 = vst [vmem:[%s1711_s9 + $0x28] sm:$0xff] %v593_v55  ;;  %v516_v44 = vpop.f32.mrb[4].mxu0 }
 0x37f   :  { %817 = vst [vmem:[%s1711_s9 + $0x10] sm:$0xff] %v588_v25  ;;  %v517_v57 = vadd.f32 %v516_v44, %v432_v48  ;;  %v518_v58 = vpop.f32.mrb[5].mxu0 }
 0x380   :  { %v519_v59 = vadd.f32 %v518_v58, %v436_v49 }
 0x381   :  { %818 = vst [vmem:[%s1711_s9 + $0x18] sm:$0xff] %v517_v57 }
 0x382   :  { %819 = vst [vmem:[%s1711_s9 + $0x20] sm:$0xff] %v519_v59 }
 0x39a   :  { %v729_v0 = vpop.f32.mrb[6].mxu0 }
 0x39b   :  { %v730_v1 = vadd.f32 %v729_v0, %v651_v61  ;;  %v731_v2 = vpop.f32.mrb[7].mxu0  ;;  %v1059_v3 = vpop.f32.mrb[4].mxu1 }
 0x39c   :  { %v732_v4 = vadd.f32 %v731_v2, %v655_v62  ;;  %v812_v5 = vadd.f32 %v1059_v3, %v659_v63  ;;  %v806_v6 = vpop.f32.mrb[5].mxu1 }
 0x39d   :  { %821 = vst [vmem:[%s1712_s10] sm:$0xff] %v730_v1  ;;  %v807_v7 = vadd.f32 %v806_v6, %v659_v63 }
 0x39e   :  { %822 = vst [vmem:[%s1712_s10 + $0x8] sm:$0xff] %v732_v4  ;;  %826 = vst [vmem:[%s1712_s10 + $0x28] sm:$0xff] %v812_v5  ;;  %v735_v8 = vpop.f32.mrb[8].mxu0 }
 0x39f   :  { %823 = vst [vmem:[%s1712_s10 + $0x10] sm:$0xff] %v807_v7  ;;  %v736_v9 = vadd.f32 %v735_v8, %v651_v61  ;;  %v737_v10 = vpop.f32.mrb[9].mxu0 }
 0x3a0   :  { %v738_v11 = vadd.f32 %v737_v10, %v655_v62 }
 0x3a1   :  { %824 = vst [vmem:[%s1712_s10 + $0x18] sm:$0xff] %v736_v9 }
 0x3a2   :  { %825 = vst [vmem:[%s1712_s10 + $0x20] sm:$0xff] %v738_v11 }
 0x3a3   :  { %839 = vsyncpa [#allocation3], 1 }
 0x3a4   :  { %840 = vsyncpa [#allocation5], 1 }
 0x3a5   :  { %841 = vsyncpa [#allocation8], 1 }
 0x3a6   :  { %842 = vsyncpa [#allocation11], 1 }
 0x3a7   :  { %843 = vsyncpa [#allocation14], 1 }

// kernel: gru_residual_forward.4
= control target key start
LH: loop header
LB: loop body
LE: loop exit
PB: predicated region body
PF: predicated region fallthrough
CT: control target
= control target key end

     0   :  { %v8820_v3 = vmov 0.0|0.0   ;;  %v8818_v4 = vmov 0.0   ;;  %vm7144_vm0 = vmmov 0   ;;  %s8812_s2 = inlined_call_operand.vmem [shape: f32[2,128,384], index: 2, kind: input, shape index: {}]   ;;  %s8813_s3 = inlined_call_operand.vmem [shape: f32[2,1,384], index: 3, kind: input, shape index: {}]   ;;  %s8814_s0 = inlined_call_operand.vmem [shape: f32[2,8,384], index: 0, kind: input, shape index: {}]   ;;  %s8815_s1 = inlined_call_operand.vmem [shape: f32[2,8,384], index: 1, kind: input, shape index: {}]   ;;  %s8816_s4 = inlined_call_operand.vmem [shape: f32[2,8,128], index: 4, kind: output, shape index: {0}]   ;;  %s8817_s5 = inlined_call_operand.vmem [shape: f32[2,8,128], index: 5, kind: output, shape index: {1}]  }
   0x1   :  { %v57_v0 = vld [vmem:[%s8812_s2 + $0x8] sm:$0xff]  ;;  %v60_v1 = vld [vmem:[%s8812_s2 + $0x20] sm:$0xff]  ;;  %5954 = vmatprep.subr.bf16.mxu1 %v8820_v3  ;;  %257 = vmatprep.mubr.f32.mxu0 %v8818_v4  ;;  %54 = vst [vmem:[#allocation2] sm:$0x3] %v8818_v4  ;;  %55 = vst [vmem:[#allocation3] sm:$0x3] %v8818_v4 }
   0x2   :  { %v56_v2 = vld [vmem:[%s8812_s2] sm:$0xff]  ;;  %v7189_v5 = vpack.c.bf16 %v60_v1, %v57_v0  ;;  %v59_v6 = vld [vmem:[%s8812_s2 + $0x18] sm:$0xff]  ;;  %v66_v8 = vld [vmem:[%s8812_s2 + $0x50] sm:$0xff]  ;;  %5394 = vmatprep.mubr.msk.f32.mxu1 %vm7144_vm0, %v8818_v4 }
   0x3   :  { %v63_v7 = vld [vmem:[%s8812_s2 + $0x38] sm:$0xff]  ;;  %v7202_v9 = vpack.c.bf16 %v59_v6, %v56_v2  ;;  %v62_v11 = vld [vmem:[%s8812_s2 + $0x30] sm:$0xff]  ;;  %v65_v12 = vld [vmem:[%s8812_s2 + $0x48] sm:$0xff] }
   0x4   :  { %v7204_v10 = vpack.c.bf16 %v66_v8, %v63_v7  ;;  %v69_v13 = vld [vmem:[%s8812_s2 + $0x68] sm:$0xff]  ;;  %5923 = vmatprep.subr.bf16.mxu0 %v7189_v5  ;;  %v72_v14 = vld [vmem:[%s8812_s2 + $0x80] sm:$0xff]  ;;  %v7220_v15 = vpack.c.bf16 %v65_v12, %v62_v11  ;;  %v71_v18 = vld [vmem:[%s8812_s2 + $0x78] sm:$0xff] }
   0x5   :  { %5925 = vmatpush1.bf16.msra.mxu0 %v7202_v9  ;;  %v7223_v16 = vpack.c.bf16 %v72_v14, %v69_v13  ;;  %v68_v17 = vld [vmem:[%s8812_s2 + $0x60] sm:$0xff]  ;;  %v75_v19 = vld [vmem:[%s8812_s2 + $0x98] sm:$0xff]  ;;  %v78_v20 = vld [vmem:[%s8812_s2 + $0xb0] sm:$0xff] }
   0x6   :  { %5927 = vmatprep.subr.bf16.mxu0 %v7204_v10  ;;  %v7238_v21 = vpack.c.bf16 %v71_v18, %v68_v17  ;;  %v7241_v22 = vpack.c.bf16 %v78_v20, %v75_v19  ;;  %v74_v23 = vld [vmem:[%s8812_s2 + $0x90] sm:$0xff]  ;;  %v77_v24 = vld [vmem:[%s8812_s2 + $0xa8] sm:$0xff]  ;;  %v84_v26 = vld [vmem:[%s8812_s2 + $0xe0] sm:$0xff] }
   0x7   :  { %v81_v25 = vld [vmem:[%s8812_s2 + $0xc8] sm:$0xff]  ;;  %v58_v27 = vld [vmem:[%s8812_s2 + $0x10] sm:$0xff]  ;;  %v64_v30 = vld [vmem:[%s8812_s2 + $0x40] sm:$0xff]  ;;  %v7267_v31 = vpack.c.bf16 %v77_v24, %v74_v23 }
   0x8   :  { %8865 = vst [vmem:[#allocation4_spill] sm:$0xff] %v7241_v22  ;;  %v61_v28 = vld [vmem:[%s8812_s2 + $0x28] sm:$0xff]  ;;  %v67_v32 = vld [vmem:[%s8812_s2 + $0x58] sm:$0xff]  ;;  %v7273_v33 = vpack.c.bf16 %v84_v26, %v81_v25  ;;  %v80_v34 = vld [vmem:[%s8812_s2 + $0xc0] sm:$0xff] }
   0x9   :  { %5929 = vmatpush1.bf16.msra.mxu0 %v7220_v15  ;;  %v7261_v29 = vpack.c.bf16 %v61_v28, %v58_v27  ;;  %8866 = vst [vmem:[#allocation5_spill] sm:$0xff] %v7267_v31  ;;  %v83_v35 = vld [vmem:[%s8812_s2 + $0xd8] sm:$0xff]  ;;  %v7285_v37 = vpack.c.bf16 %v67_v32, %v64_v30  ;;  %v90_v38 = vld [vmem:[%s8812_s2 + $0x110] sm:$0xff]  ;;  %v73_v40 = vld [vmem:[%s8812_s2 + $0x88] sm:$0xff] }
   0xa   :  { %5931 = vmatprep.subr.bf16.mxu0 %v7223_v16  ;;  %8867 = vst [vmem:[#allocation6_spill] sm:$0xff] %v7273_v33  ;;  %v87_v36 = vld [vmem:[%s8812_s2 + $0xf8] sm:$0xff]  ;;  %v70_v39 = vld [vmem:[%s8812_s2 + $0x70] sm:$0xff]  ;;  %v7298_v41 = vpack.c.bf16 %v83_v35, %v80_v34  ;;  %v89_v44 = vld [vmem:[%s8812_s2 + $0x108] sm:$0xff] }
   0xb   :  { %5956 = vmatpush3.bf16.msra.mxu1 %v7261_v29  ;;  %v7301_v42 = vpack.c.bf16 %v90_v38, %v87_v36  ;;  %v86_v43 = vld [vmem:[%s8812_s2 + $0xf0] sm:$0xff]  ;;  %v93_v45 = vld [vmem:[%s8812_s2 + $0x128] sm:$0xff]  ;;  %v7313_v46 = vpack.c.bf16 %v73_v40, %v70_v39  ;;  %v96_v47 = vld [vmem:[%s8812_s2 + $0x140] sm:$0xff] }
   0xc   :  { %5957 = vmatprep.subr.bf16.mxu1 %v8820_v3  ;;  %8868 = vst [vmem:[#allocation7_spill] sm:$0xff] %v7298_v41  ;;  %v76_v48 = vld [vmem:[%s8812_s2 + $0xa0] sm:$0xff]  ;;  %v79_v49 = vld [vmem:[%s8812_s2 + $0xb8] sm:$0xff]  ;;  %v7326_v50 = vpack.c.bf16 %v89_v44, %v86_v43  ;;  %v7329_v51 = vpack.c.bf16 %v96_v47, %v93_v45  ;;  %v102_v56 = vld [vmem:[%s8812_s2 + $0x170] sm:$0xff] }
   0xd   :  { %5933 = vmatpush1.bf16.msra.mxu0 %v7238_v21  ;;  %8869 = vst [vmem:[#allocation8_spill] sm:$0xff] %v7301_v42  ;;  %v92_v52 = vld [vmem:[%s8812_s2 + $0x120] sm:$0xff]  ;;  %v95_v53 = vld [vmem:[%s8812_s2 + $0x138] sm:$0xff]  ;;  %v7341_v55 = vpack.c.bf16 %v79_v49, %v76_v48  ;;  %v82_v57 = vld [vmem:[%s8812_s2 + $0xd0] sm:$0xff] }
   0xe   :  { %5935 = vmatprep.subr.bf16.mxu0 %v7241_v22  ;;  %8870 = vst [vmem:[#allocation9_spill] sm:$0xff] %v7326_v50  ;;  %8871 = vst [vmem:[#allocation10_spill] sm:$0xff] %v7329_v51  ;;  %v99_v54 = vld [vmem:[%s8812_s2 + $0x158] sm:$0xff]  ;;  %v85_v58 = vld [vmem:[%s8812_s2 + $0xe8] sm:$0xff]  ;;  %v7354_v59 = vpack.c.bf16 %v95_v53, %v92_v52 }
   0xf   :  { %5959 = vmatpush3.bf16.msra.mxu1 %v7285_v37  ;;  %8872 = vst [vmem:[#allocation11_spill] sm:$0xff] %v7341_v55  ;;  %v7357_v60 = vpack.c.bf16 %v102_v56, %v99_v54  ;;  %v98_v61 = vld [vmem:[%s8812_s2 + $0x150] sm:$0xff]  ;;  %v101_v62 = vld [vmem:[%s8812_s2 + $0x168] sm:$0xff]  ;;  %v7369_v0 = vpack.c.bf16 %v85_v58, %v82_v57  ;;  %v4949_v1 = vld [vmem:[%s8812_s2 + $0x1a0] sm:$0xff] }
  0x10   :  { %5960 = vmatprep.subr.bf16.mxu1 %v8820_v3  ;;  %8873 = vst [vmem:[#allocation12_spill] sm:$0xff] %v7354_v59  ;;  %v4946_v63 = vld [vmem:[%s8812_s2 + $0x188] sm:$0xff]  ;;  %v88_v2 = vld [vmem:[%s8812_s2 + $0x100] sm:$0xff]  ;;  %v91_v6 = vld [vmem:[%s8812_s2 + $0x118] sm:$0xff]  ;;  %v7382_v7 = vpack.c.bf16 %v101_v62, %v98_v61 }
  0x11   :  { %5937 = vmatpush1.bf16.msra.mxu0 %v7267_v31  ;;  %8874 = vst [vmem:[#allocation13_spill] sm:$0xff] %v7357_v60  ;;  %8875 = vst [vmem:[#allocation14_spill] sm:$0xff] %v7369_v0  ;;  %v7385_v8 = vpack.c.bf16 %v4949_v1, %v4946_v63  ;;  %v4945_v11 = vld [vmem:[%s8812_s2 + $0x180] sm:$0xff]  ;;  %v4948_v12 = vld [vmem:[%s8812_s2 + $0x198] sm:$0xff]  ;;  %v7397_v14 = vpack.c.bf16 %v91_v6, %v88_v2 }
  0x12   :  { %5939 = vmatprep.subr.bf16.mxu0 %v7273_v33  ;;  %8876 = vst [vmem:[#allocation15_spill] sm:$0xff] %v7382_v7  ;;  %v4952_v13 = vld [vmem:[%s8812_s2 + $0x1b8] sm:$0xff]  ;;  %v4955_v17 = vld [vmem:[%s8812_s2 + $0x1d0] sm:$0xff]  ;;  %v97_v19 = vld [vmem:[%s8812_s2 + $0x148] sm:$0xff]  ;;  %v7412_v23 = vpack.c.bf16 %v4948_v12, %v4945_v11 }
  0x13   :  { %5962 = vmatpush3.bf16.msra.mxu1 %v7313_v46  ;;  %8877 = vst [vmem:[#allocation16_spill] sm:$0xff] %v7385_v8  ;;  %8878 = vst [vmem:[#allocation17_spill] sm:$0xff] %v7397_v14  ;;  %v94_v18 = vld [vmem:[%s8812_s2 + $0x130] sm:$0xff]  ;;  %v7415_v24 = vpack.c.bf16 %v4955_v17, %v4952_v13  ;;  %v4954_v26 = vld [vmem:[%s8812_s2 + $0x1c8] sm:$0xff] }
  0x14   :  { %5963 = vmatprep.subr.bf16.mxu1 %v8820_v3  ;;  %v7410_v20 = vld [vmem:[#allocation2] sm:$0x3]  ;;  %v4958_v27 = vld [vmem:[%s8812_s2 + $0x1e8] sm:$0xff]  ;;  %v7427_v28 = vpack.c.bf16 %v97_v19, %v94_v18  ;;  %v4961_v30 = vld [vmem:[%s8812_s2 + $0x200] sm:$0xff] }
  0x15   :  { %5941 = vmatpush1.bf16.msra.mxu0 %v7298_v41  ;;  %v4951_v25 = vld [vmem:[%s8812_s2 + $0x1b0] sm:$0xff]  ;;  %v100_v32 = vld [vmem:[%s8812_s2 + $0x160] sm:$0xff]  ;;  %v103_v34 = vld [vmem:[%s8812_s2 + $0x178] sm:$0xff]  ;;  %v7445_v36 = vpack.c.bf16 %v4961_v30, %v4958_v27 }
  0x16   :  { %5943 = vmatprep.subr.bf16.mxu0 %v7301_v42  ;;  %8879 = vst [vmem:[#allocation18_spill] sm:$0xff] %v7427_v28  ;;  %v7441_v35 = vpack.c.bf16 %v4954_v26, %v4951_v25  ;;  %v4957_v38 = vld [vmem:[%s8812_s2 + $0x1e0] sm:$0xff]  ;;  %v4960_v39 = vld [vmem:[%s8812_s2 + $0x1f8] sm:$0xff]  ;;  %v7457_v43 = vpack.c.bf16 %v103_v34, %v100_v32  ;;  %v4967_v44 = vld [vmem:[%s8812_s2 + $0x230] sm:$0xff] }
  0x17   :  { %5965 = vmatpush3.bf16.msra.mxu1 %v7341_v55  ;;  %v4964_v40 = vld [vmem:[%s8812_s2 + $0x218] sm:$0xff]  ;;  %v4947_v45 = vld [vmem:[%s8812_s2 + $0x190] sm:$0xff]  ;;  %v4950_v47 = vld [vmem:[%s8812_s2 + $0x1a8] sm:$0xff]  ;;  %v7470_v48 = vpack.c.bf16 %v4960_v39, %v4957_v38 }
  0x18   :  { %5966 = vmatprep.subr.bf16.mxu1 %v8820_v3  ;;  %8880 = vst [vmem:[#allocation19_spill] sm:$0xff] %v7457_v43  ;;  %v7473_v49 = vpack.c.bf16 %v4967_v44, %v4964_v40  ;;  %v4963_v52 = vld [vmem:[%s8812_s2 + $0x210] sm:$0xff]  ;;  %v4966_v53 = vld [vmem:[%s8812_s2 + $0x228] sm:$0xff]  ;;  %v7485_v56 = vpack.c.bf16 %v4950_v47, %v4947_v45  ;;  %v4973_v57 = vld [vmem:[%s8812_s2 + $0x260] sm:$0xff] }
  0x19   :  { %5945 = vmatpush1.bf16.msra.mxu0 %v7326_v50  ;;  %v4970_v54 = vld [vmem:[%s8812_s2 + $0x248] sm:$0xff]  ;;  %v4953_v58 = vld [vmem:[%s8812_s2 + $0x1c0] sm:$0xff]  ;;  %v4956_v61 = vld [vmem:[%s8812_s2 + $0x1d8] sm:$0xff]  ;;  %v7498_v62 = vpack.c.bf16 %v4966_v53, %v4963_v52 }
  0x1a   :  { %5947 = vmatprep.subr.bf16.mxu0 %v7329_v51  ;;  %v7502_v63 = vpack.c.bf16 %v4973_v57, %v4970_v54  ;;  %v4969_v1 = vld [vmem:[%s8812_s2 + $0x240] sm:$0xff]  ;;  %v4972_v2 = vld [vmem:[%s8812_s2 + $0x258] sm:$0xff]  ;;  %v7514_v11 = vpack.c.bf16 %v4956_v61, %v4953_v58  ;;  %v4979_v12 = vld [vmem:[%s8812_s2 + $0x290] sm:$0xff] }
  0x1b   :  { %5968 = vmatpush3.bf16.msra.mxu1 %v7369_v0  ;;  %v4976_v6 = vld [vmem:[%s8812_s2 + $0x278] sm:$0xff]  ;;  %v4959_v13 = vld [vmem:[%s8812_s2 + $0x1f0] sm:$0xff]  ;;  %v4962_v17 = vld [vmem:[%s8812_s2 + $0x208] sm:$0xff]  ;;  %v7529_v18 = vpack.c.bf16 %v4972_v2, %v4969_v1 }
  0x1c   :  { %5969 = vmatprep.subr.bf16.mxu1 %v8820_v3  ;;  %v7532_v19 = vpack.c.bf16 %v4979_v12, %v4976_v6  ;;  %v4975_v25 = vld [vmem:[%s8812_s2 + $0x270] sm:$0xff]  ;;  %v4978_v26 = vld [vmem:[%s8812_s2 + $0x288] sm:$0xff]  ;;  %v7544_v30 = vpack.c.bf16 %v4962_v17, %v4959_v13  ;;  %v4985_v32 = vld [vmem:[%s8812_s2 + $0x2c0] sm:$0xff] }
  0x1d   :  { %5949 = vmatpush1.bf16.msra.mxu0 %v7354_v59  ;;  %v4982_v27 = vld [vmem:[%s8812_s2 + $0x2a8] sm:$0xff]  ;;  %v4965_v34 = vld [vmem:[%s8812_s2 + $0x220] sm:$0xff]  ;;  %v4968_v38 = vld [vmem:[%s8812_s2 + $0x238] sm:$0xff]  ;;  %v7557_v39 = vpack.c.bf16 %v4978_v26, %v4975_v25 }
  0x1e   :  { %5951 = vmatprep.subr.bf16.mxu0 %v7357_v60  ;;  %v7560_v40 = vpack.c.bf16 %v4985_v32, %v4982_v27  ;;  %v4981_v44 = vld [vmem:[%s8812_s2 + $0x2a0] sm:$0xff]  ;;  %v4984_v45 = vld [vmem:[%s8812_s2 + $0x2b8] sm:$0xff]  ;;  %v7572_v52 = vpack.c.bf16 %v4968_v38, %v4965_v34  ;;  %v4991_v53 = vld [vmem:[%s8812_s2 + $0x2f0] sm:$0xff] }
  0x1f   :  { %5971 = vmatpush3.bf16.msra.mxu1 %v7397_v14  ;;  %v4988_v47 = vld [vmem:[%s8812_s2 + $0x2d8] sm:$0xff]  ;;  %v4971_v54 = vld [vmem:[%s8812_s2 + $0x250] sm:$0xff]  ;;  %v4974_v57 = vld [vmem:[%s8812_s2 + $0x268] sm:$0xff]  ;;  %v7585_v58 = vpack.c.bf16 %v4984_v45, %v4981_v44 }
  0x20   :  { %5972 = vmatprep.subr.bf16.mxu1 %v8820_v3  ;;  %v7588_v61 = vpack.c.bf16 %v4991_v53, %v4988_v47  ;;  %v4987_v1 = vld [vmem:[%s8812_s2 + $0x2d0] sm:$0xff]  ;;  %v4990_v2 = vld [vmem:[%s8812_s2 + $0x2e8] sm:$0xff]  ;;  %v7597_v6 = vpack.c.bf16 %v4974_v57, %v4971_v54  ;;  %v4977_v12 = vld [vmem:[%s8812_s2 + $0x280] sm:$0xff]  ;;  %v155_v47 = vlaneseq  ;;  %v7145_v54 = vmov 1966171168  }
  0x21   :  { %5953 = vmatpush1.bf16.msra.mxu0 %v7382_v7  ;;  %v4980_v13 = vld [vmem:[%s8812_s2 + $0x298] sm:$0xff]  ;;  %v7607_v17 = vpack.c.bf16 %v4990_v2, %v4987_v1  ;;  %v4983_v26 = vld [vmem:[%s8812_s2 + $0x2b0] sm:$0xff]  ;;  %v4986_v27 = vld [vmem:[%s8812_s2 + $0x2c8] sm:$0xff]  ;;  %v336_v57 = vunpack.c.l.s4 %v7145_v54 }
  0x22   :  { %5979 = vmatprep.subr.bf16.mxu0 %v7385_v8  ;;  %v7611_v25 = vpack.c.bf16 %v4980_v13, %v4977_v12  ;;  %v7621_v32 = vld [vmem:[#allocation3] sm:$0x3]  ;;  %v7624_v34 = vpack.c.bf16 %v4986_v27, %v4983_v26  ;;  %v4989_v38 = vld [vmem:[%s8812_s2 + $0x2e0] sm:$0xff]  ;;  %v4992_v44 = vld [vmem:[%s8812_s2 + $0x2f8] sm:$0xff]  ;;  %v7677_v53 = vshrl.u32 %v155_v47, 7 }
  0x23   :  { %5974 = vmatpush3.bf16.msra.mxu1 %v7427_v28  ;;  %v7638_v45 = vpack.c.bf16 %v4992_v44, %v4989_v38  ;;  %v153_v2 = vld [vmem:[%s8813_s3] sm:$0x7]  ;;  %v337_v13 = vunpack.c.0.s8 %v336_v57 }
  0x24   :  { %258 = vmatmul.mubr.f32.vlgmr.msra.gmra.mrb[0].mxu0 %v7410_v20  ;;  %5975 = vmatprep.subr.bf16.mxu1 %v8820_v3  ;;  %v157_v1 = vsub.s32 0, %v7677_v53  ;;  %v161_v12 = vsub.s32 1, %v7677_v53 }
  0x25   :  { %5981 = vmatpush1.bf16.msra.mxu0 %v7412_v23  ;;  %556 = vmatprep.mubr.f32.mxu0 %v8818_v4  ;;  %v7689_v38 = vsub.s32 %v337_v13, %v7677_v53 }
  0x26   :  { %5983 = vmatprep.subr.bf16.mxu0 %v7415_v24  ;;  %v7684_v26 = vrot.slane %v153_v2, %v157_v1  ;;  %v7686_v27 = vrot.slane %v153_v2, %v161_v12 }
  0x27   :  { %5977 = vmatpush3.bf16.msra.mxu1 %v7457_v43 }
  0x28   :  { %6010 = vmatprep.subr.bf16.mxu1 %v8820_v3  ;;  %8881 = vst [vmem:[#allocation20_spill] sm:$0xff] %v7684_v26  ;;  %8882 = vst [vmem:[#allocation21_spill] sm:$0xff] %v7686_v27 }
  0x29   :  { %5985 = vmatpush1.bf16.msra.mxu0 %v7441_v35 }
  0x2a   :  { %5987 = vmatprep.subr.bf16.mxu0 %v7445_v36  ;;  %5395 = vmatmul.mubr.f32.vlgmr.msra.gmra.mrb[0].mxu1 %v7410_v20 }
  0x2b   :  { %6012 = vmatpush3.bf16.msra.mxu1 %v7485_v56  ;;  %5429 = vmatprep.mubr.msk.f32.mxu1 %vm7144_vm0, %v8818_v4 }
  0x2c   :  { %6013 = vmatprep.subr.bf16.mxu1 %v8820_v3 }
  0x2d   :  { %5989 = vmatpush1.bf16.msra.mxu0 %v7470_v48 }
  0x2e   :  { %5991 = vmatprep.subr.bf16.mxu0 %v7473_v49 }
  0x2f   :  { %6015 = vmatpush3.bf16.msra.mxu1 %v7514_v11 }
  0x30   :  { %6016 = vmatprep.subr.bf16.mxu1 %v8820_v3 }
  0x31   :  { %5993 = vmatpush1.bf16.msra.mxu0 %v7498_v62 }
  0x32   :  { %5995 = vmatprep.subr.bf16.mxu0 %v7502_v63 }
  0x33   :  { %6018 = vmatpush3.bf16.msra.mxu1 %v7544_v30 }
  0x34   :  { %6019 = vmatprep.subr.bf16.mxu1 %v8820_v3 }
  0x35   :  { %5997 = vmatpush1.bf16.msra.mxu0 %v7529_v18 }
  0x36   :  { %5999 = vmatprep.subr.bf16.mxu0 %v7532_v19 }
  0x37   :  { %6021 = vmatpush3.bf16.msra.mxu1 %v7572_v52 }
  0x38   :  { %6022 = vmatprep.subr.bf16.mxu1 %v8820_v3 }
  0x39   :  { %6001 = vmatpush1.bf16.msra.mxu0 %v7557_v39 }
  0x3a   :  { %6003 = vmatprep.subr.bf16.mxu0 %v7560_v40 }
  0x3b   :  { %6024 = vmatpush3.bf16.msra.mxu1 %v7597_v6 }
  0x3c   :  { %6025 = vmatprep.subr.bf16.mxu1 %v8820_v3 }
  0x3d   :  { %6005 = vmatpush1.bf16.msra.mxu0 %v7585_v58 }
  0x3e   :  { %6007 = vmatprep.subr.bf16.mxu0 %v7588_v61 }
  0x3f   :  { %6027 = vmatpush3.bf16.msra.mxu1 %v7611_v25 }
  0x40   :  { %6028 = vmatprep.subr.bf16.mxu1 %v8820_v3 }
  0x41   :  { %6009 = vmatpush1.bf16.msra.mxu0 %v7607_v17 }
  0x42   :  { %6035 = vmatprep.subr.bf16.mxu0 %v7189_v5 }
  0x43   :  { %6030 = vmatpush3.bf16.msra.mxu1 %v7624_v34 }
  0x44   :  { %557 = vmatmul.mubr.f32.vlgmr.msra.gmra.mrb[2].mxu0 %v7621_v32  ;;  %6031 = vmatprep.subr.bf16.mxu1 %v8820_v3 }
  0x45   :  { %6037 = vmatpush1.bf16.msra.mxu0 %v7202_v9  ;;  %873 = vmatprep.mubr.f32.mxu0 %v8818_v4 }
  0x46   :  { %6039 = vmatprep.subr.bf16.mxu0 %v7204_v10 }
  0x47   :  { %6033 = vmatpush3.bf16.msra.mxu1 %v7638_v45 }
  0x48   :  { %6066 = vmatprep.subr.bf16.mxu1 %v8820_v3 }
  0x49   :  { %6041 = vmatpush1.bf16.msra.mxu0 %v7220_v15 }
  0x4a   :  { %6043 = vmatprep.subr.bf16.mxu0 %v7223_v16  ;;  %5430 = vmatmul.mubr.f32.vlgmr.msra.gmra.mrb[2].mxu1 %v7621_v32 }
  0x4b   :  { %6068 = vmatpush3.bf16.msra.mxu1 %v7261_v29  ;;  %5464 = vmatprep.mubr.msk.f32.mxu1 %vm7144_vm0, %v8818_v4 }
  0x4c   :  { %6069 = vmatprep.subr.bf16.mxu1 %v8820_v3 }
  0x4d   :  { %6045 = vmatpush1.bf16.msra.mxu0 %v7238_v21 }
  0x4e   :  { %6047 = vmatprep.subr.bf16.mxu0 %v7241_v22 }
  0x4f   :  { %6071 = vmatpush3.bf16.msra.mxu1 %v7285_v37 }
  0x50   :  { %6072 = vmatprep.subr.bf16.mxu1 %v8820_v3 }
  0x51   :  { %6049 = vmatpush1.bf16.msra.mxu0 %v7267_v31 }
  0x52   :  { %6051 = vmatprep.subr.bf16.mxu0 %v7273_v33 }
  0x53   :  { %6074 = vmatpush3.bf16.msra.mxu1 %v7313_v46 }
  0x54   :  { %6075 = vmatprep.subr.bf16.mxu1 %v8820_v3 }
  0x55   :  { %6053 = vmatpush1.bf16.msra.mxu0 %v7298_v41 }
  0x56   :  { %6055 = vmatprep.subr.bf16.mxu0 %v7301_v42 }
  0x57   :  { %6077 = vmatpush3.bf16.msra.mxu1 %v7341_v55 }
  0x58   :  { %6078 = vmatprep.subr.bf16.mxu1 %v8820_v3 }
  0x59   :  { %6057 = vmatpush1.bf16.msra.mxu0 %v7326_v50 }
  0x5a   :  { %6059 = vmatprep.subr.bf16.mxu0 %v7329_v51 }
  0x5b   :  { %6080 = vmatpush3.bf16.msra.mxu1 %v7369_v0 }
  0x5c   :  { %6081 = vmatprep.subr.bf16.mxu1 %v8820_v3 }
  0x5d   :  { %6061 = vmatpush1.bf16.msra.mxu0 %v7354_v59 }
  0x5e   :  { %6063 = vmatprep.subr.bf16.mxu0 %v7357_v60 }
  0x5f   :  { %6083 = vmatpush3.bf16.msra.mxu1 %v7397_v14 }
  0x60   :  { %6084 = vmatprep.subr.bf16.mxu1 %v8820_v3 }
  0x61   :  { %6065 = vmatpush1.bf16.msra.mxu0 %v7382_v7 }
  0x62   :  { %6091 = vmatprep.subr.bf16.mxu0 %v7385_v8  ;;  %v7702_v8 = vld [vmem:[%s8814_s0 + $0x18] ss:$8 sm:$0x7] }
  0x63   :  { %6086 = vmatpush3.bf16.msra.mxu1 %v7427_v28 }
  0x64   :  { %6087 = vmatprep.subr.bf16.mxu1 %v8820_v3 }
  0x67   :  { %6089 = vmatpush3.bf16.msra.mxu1 %v7457_v43 }
  0x68   :  { %6122 = vmatprep.subr.bf16.mxu1 %v8820_v3  ;;  %v7696_v3 = vld [vmem:[%s8814_s0] ss:$8 sm:$0x7] }
  0xf7   :  { %v259_v44 = vpop.f32.mrb[0].mxu0 }
  0xf8   :  { %v260_v47 = vadd.f32 %v259_v44, %v7684_v26  ;;  %v261_v54 = vpop.f32.mrb[1].mxu0  ;;  %v375_v26 = vrot.slane %v7696_v3, 1 }
  0xf9   :  { %v262_v4 = vadd.f32 %v261_v54, %v7686_v27 }
  0xfa   :  { %v341_v57 = vrot.slane %v260_v47, %v7689_v38  ;;  %v376_v47 = vrot.slane %v7702_v8, 1 }
  0xfb   :  { %v386_v13 = vrot.slane %v262_v4, %v7689_v38 }
  0xfc   :  { %v342_v43 = vcombine.high %v341_v57, %v341_v57  ;;  %v349_v44 = vrot.slane %v341_v57, %v7689_v38 }
  0xfd   :  { %v387_v54 = vcombine.high %v386_v13, %v386_v13  ;;  %v394_v27 = vrot.slane %v386_v13, %v7689_v38  ;;  %v330_v4 = vpop.f32.mrb[0].mxu1  ;;  %v8848_v13 = vsub.s32 2, %v7677_v53 }
  0xfe   :  { %v356_v7 = vrot.slane %v342_v43, %v7689_v38  ;;  %v359_v60 = vadd.f32 %v349_v44, %v7696_v3  ;;  %v5396_v50 = vpop.f32.mrb[1].mxu1 }
  0xff   :  { %v401_v28 = vrot.slane %v387_v54, %v7689_v38  ;;  %v404_v14 = vadd.f32 %v394_v27, %v375_v26  ;;  %v7716_v44 = vrot.slane %v153_v2, %v8848_v13 }
 0x100   :  { %v360_v59 = vadd.f32 %v7702_v8, %v356_v7  ;;  %v4995_v51 = vmul.f32 -1.442695, %v359_v60 }
 0x101   :  { %v405_v42 = vadd.f32 %v401_v28, %v376_v47  ;;  %v4997_v0 = vmul.f32 -1.442695, %v404_v14  ;;  %8883 = vst [vmem:[#allocation22_spill] sm:$0xff] %v7716_v44  ;;  %v331_v60 = vadd.f32 %v330_v4, %v7716_v44 }
 0x102   :  { %6822 = vpow2.f32 %v4995_v51  ;;  %v4996_v57 = vmul.f32 -1.442695, %v360_v59 }
 0x103   :  { %v4998_v43 = vmul.f32 -1.442695, %v405_v42  ;;  %v425_v51 = vrot.slane %v331_v60, %v7689_v38  ;;  %v4993_v42 = vld [vmem:[%s8813_s3 + $0x3] sm:$0x7] }
 0x104   :  { %6824 = vpow2.f32 %v4996_v57  ;;  %v7723_v2 = vrot.slane %v4993_v42, %v157_v1 }
 0x105   :  { %6826 = vpow2.f32 %v4997_v0  ;;  %v426_v28 = vcombine.high %v425_v51, %v425_v51  ;;  %v7725_v0 = vrot.slane %v4993_v42, %v161_v12  ;;  %v433_v47 = vrot.slane %v425_v51, %v7689_v38  ;;  %v7736_v51 = vld [vmem:[%s8815_s1 + $0x7] ss:$8 sm:$0x7] }
 0x106   :  { %6828 = vpow2.f32 %v4998_v43  ;;  %8884 = vst [vmem:[#allocation23_spill] sm:$0xff] %v7723_v2  ;;  %v446_v12 = vrot.slane %v7702_v8, 2 }
 0x107   :  { %8885 = vst [vmem:[#allocation24_spill] sm:$0xff] %v7725_v0  ;;  %v440_v43 = vrot.slane %v426_v28, %v7689_v38 }
 0x10c   :  { %v6823_v54 = vpop.eup %6822 }
 0x10d   :  { %v367_v7 = vadd.f32 1.0, %v6823_v54  ;;  %v445_v54 = vrot.slane %v7696_v3, 2 }
 0x10e   :  { %v6825_v26 = vpop.eup %6824 }
 0x10f   :  { %v368_v50 = vadd.f32 1.0, %v6825_v26  ;;  %6830 = vrcp.f32 %v367_v7  ;;  %v6827_v59 = vpop.eup %6826 }
 0x110   :  { %v6829_v14 = vpop.eup %6828  ;;  %v412_v27 = vadd.f32 1.0, %v6827_v59 }
 0x111   :  { %6832 = vrcp.f32 %v368_v50  ;;  %v413_v4 = vadd.f32 1.0, %v6829_v14 }
 0x112   :  { %6834 = vrcp.f32 %v412_v27  ;;  %v7743_v27 = vld [vmem:[%s8815_s1 + $0x1f] ss:$8 sm:$0x7] }
 0x113   :  { %6836 = vrcp.f32 %v413_v4 }
 0x117   :  { %v558_v57 = vpop.f32.mrb[2].mxu0 }
 0x118   :  { %v559_v60 = vadd.f32 %v558_v57, %v7723_v2  ;;  %v560_v7 = vpop.f32.mrb[3].mxu0 }
 0x119   :  { %v6831_v26 = vpop.eup %6830  ;;  %v561_v50 = vadd.f32 %v560_v7, %v7725_v0  ;;  %v674_v7 = vrot.slane %v7736_v51, 1 }
 0x11a   :  { %v443_v1 = vmul.f32 %v6831_v26, %v433_v47  ;;  %v640_v59 = vrot.slane %v559_v60, %v7689_v38 }
 0x11b   :  { %v6833_v14 = vpop.eup %6832  ;;  %v685_v3 = vrot.slane %v561_v50, %v7689_v38  ;;  %v675_v50 = vrot.slane %v7743_v27, 1 }
 0x11c   :  { %v444_v28 = vmul.f32 %v6833_v14, %v440_v43  ;;  %v449_v57 = vadd.f32 %v445_v54, %v443_v1  ;;  %v641_v47 = vcombine.high %v640_v59, %v640_v59  ;;  %v648_v8 = vrot.slane %v640_v59, %v7689_v38 }
 0x11d   :  { %v686_v26 = vcombine.high %v685_v3, %v685_v3  ;;  %v693_v13 = vrot.slane %v685_v3, %v7689_v38  ;;  %v464_v54 = vrot.slane %v7410_v20, %v7689_v38  ;;  %v629_v0 = vpop.f32.mrb[2].mxu1 }
 0x11e   :  { %v450_v60 = vadd.f32 %v446_v12, %v444_v28  ;;  %6838 = vtanh.f32 %v449_v57  ;;  %v655_v4 = vrot.slane %v641_v47, %v7689_v38  ;;  %v658_v43 = vadd.f32 %v7736_v51, %v648_v8  ;;  %v5431_v3 = vpop.f32.mrb[3].mxu1  ;;  %v6835_v47 = vpop.eup %6834 }
 0x11f   :  { %v700_v1 = vrot.slane %v686_v26, %v7689_v38  ;;  %v703_v2 = vadd.f32 %v693_v13, %v674_v7  ;;  %v465_v28 = vcombine.high %v464_v54, %v464_v54  ;;  %v6837_v8 = vpop.eup %6836  ;;  %v472_v20 = vrot.slane %v464_v54, %v7689_v38 }
 0x120   :  { %6840 = vtanh.f32 %v450_v60  ;;  %v659_v59 = vadd.f32 %v7743_v27, %v655_v4  ;;  %v5001_v14 = vmul.f32 -1.442695, %v658_v43  ;;  %v453_v60 = vsub.f32 1.0, %v6835_v47 }
 0x121   :  { %v704_v57 = vadd.f32 %v700_v1, %v675_v50  ;;  %v5003_v44 = vmul.f32 -1.442695, %v703_v2  ;;  %v479_v41 = vrot.slane %v465_v28, %v7689_v38  ;;  %v8886_v4 = vsub.s32 2, %v7677_v53 }
 0x122   :  { %6842 = vpow2.f32 %v5001_v14  ;;  %v5002_v12 = vmul.f32 -1.442695, %v659_v59  ;;  %v454_v13 = vsub.f32 1.0, %v6837_v8  ;;  %v482_v59 = vmul.f32 %v6835_v47, %v472_v20 }
 0x123   :  { %v5004_v26 = vmul.f32 -1.442695, %v704_v57  ;;  %v7759_v43 = vrot.slane %v4993_v42, %v8886_v4  ;;  %v483_v14 = vmul.f32 %v6837_v8, %v479_v41 }
 0x124   :  { %6844 = vpow2.f32 %v5002_v12 }
 0x125   :  { %6846 = vpow2.f32 %v5003_v44  ;;  %v630_v54 = vadd.f32 %v629_v0, %v7759_v43 }
 0x126   :  { %6848 = vpow2.f32 %v5004_v26 }
 0x127   :  { %v724_v44 = vrot.slane %v630_v54, %v7689_v38 }
 0x128   :  { %v6839_v33 = vpop.eup %6838 }
 0x129   :  { %v455_v7 = vmul.f32 %v6839_v33, %v453_v60  ;;  %v725_v47 = vcombine.high %v724_v44, %v724_v44  ;;  %v732_v26 = vrot.slane %v724_v44, %v7689_v38  ;;  %v8887_v60 = vmov 0.0|0.0  }
 0x12a   :  { %v6841_v50 = vpop.eup %6840 }
 0x12b   :  { %v456_v1 = vmul.f32 %v6841_v50, %v454_v13  ;;  %v7761_v3 = vadd.f32 %v482_v59, %v455_v7  ;;  %v739_v13 = vrot.slane %v725_v47, %v7689_v38  ;;  %v744_v7 = vrot.slane %v7736_v51, 2 }
 0x12c   :  { %v6843_v2 = vpop.eup %6842  ;;  %v8888_v59 = vmov 0.0  }
 0x12d   :  { %v666_v12 = vadd.f32 1.0, %v6843_v2  ;;  %v7764_v28 = vadd.f32 %v483_v14, %v456_v1  ;;  %486 = vst [vmem:[%s8816_s4] sm:$0x1] %v7761_v3  ;;  %v745_v14 = vrot.slane %v7743_v27, 2  ;;  %v763_v27 = vrot.slane %v7621_v32, %v7689_v38 }
 0x12e   :  { %v6845_v53 = vpop.eup %6844 }
 0x12f   :  { %v667_v33 = vadd.f32 1.0, %v6845_v53  ;;  %6850 = vrcp.f32 %v666_v12  ;;  %487 = vst [vmem:[%s8816_s4 + $0x8] sm:$0x1] %v7764_v28  ;;  %v793_v41 = vcombine.low %v7761_v3, %v7764_v28  ;;  %v6847_v0 = vpop.eup %6846  ;;  %v764_v53 = vcombine.high %v763_v27, %v763_v27 }
 0x130   :  { %v6849_v8 = vpop.eup %6848  ;;  %v711_v20 = vadd.f32 1.0, %v6847_v0 }
 0x131   :  { %6852 = vrcp.f32 %v667_v33  ;;  %v800_v42 = vrot.slane %v793_v41, %v7689_v38  ;;  %v712_v4 = vadd.f32 1.0, %v6849_v8  ;;  %v771_v41 = vrot.slane %v763_v27, %v7689_v38  ;;  %v8893_v27 = vld [vmem:[#allocation9_spill] sm:$0xff] }
 0x132   :  { %6854 = vrcp.f32 %v711_v20  ;;  %v778_v32 = vrot.slane %v764_v53, %v7689_v38  ;;  %v8894_v53 = vld [vmem:[#allocation17_spill] sm:$0xff] }
 0x133   :  { %v807_v57 = vrot.slane %v800_v42, %v7689_v38  ;;  %6856 = vrcp.f32 %v712_v4 }
 0x135   :  { %874 = vmatmul.mubr.f32.vlgmr.msra.gmra.mrb[4].mxu0 %v807_v57  ;;  %5465 = vmatmul.mubr.f32.vlgmr.msra.gmra.mrb[4].mxu1 %v807_v57 }
 0x136   :  { %6093 = vmatpush1.bf16.msra.mxu0 %v7412_v23  ;;  %6124 = vmatpush3.bf16.msra.mxu1 %v7485_v56 }
 0x137   :  { %6095 = vmatprep.subr.bf16.mxu0 %v7415_v24  ;;  %6125 = vmatprep.subr.bf16.mxu1 %v8887_v60 }
 0x138   :  { %1165 = vmatprep.mubr.f32.mxu0 %v8888_v59  ;;  %5499 = vmatprep.mubr.msk.f32.mxu1 %vm7144_vm0, %v8888_v59 }
 0x139   :  { %v6851_v50 = vpop.eup %6850 }
 0x13a   :  { %v742_v1 = vmul.f32 %v6851_v50, %v732_v26  ;;  %6097 = vmatpush1.bf16.msra.mxu0 %v7441_v35  ;;  %6127 = vmatpush3.bf16.msra.mxu1 %v7514_v11 }
 0x13b   :  { %v6853_v2 = vpop.eup %6852  ;;  %6099 = vmatprep.subr.bf16.mxu0 %v7445_v36  ;;  %6128 = vmatprep.subr.bf16.mxu1 %v8887_v60 }
 0x13c   :  { %v743_v51 = vmul.f32 %v6853_v2, %v739_v13  ;;  %v748_v54 = vadd.f32 %v744_v7, %v742_v1  ;;  %v6855_v33 = vpop.eup %6854  ;;  %v8889_v2 = vld [vmem:[#allocation6_spill] sm:$0xff] }
 0x13d   :  { %v6857_v44 = vpop.eup %6856  ;;  %v752_v42 = vsub.f32 1.0, %v6855_v33  ;;  %v781_v8 = vmul.f32 %v6855_v33, %v771_v41  ;;  %v8895_v33 = vld [vmem:[#allocation10_spill] sm:$0xff]  ;;  %v8896_v41 = vld [vmem:[#allocation12_spill] sm:$0xff] }
 0x13e   :  { %v749_v12 = vadd.f32 %v745_v14, %v743_v51  ;;  %6858 = vtanh.f32 %v748_v54  ;;  %6101 = vmatpush1.bf16.msra.mxu0 %v7470_v48  ;;  %6130 = vmatpush3.bf16.msra.mxu1 %v7544_v30  ;;  %v753_v57 = vsub.f32 1.0, %v6857_v44  ;;  %v782_v4 = vmul.f32 %v6857_v44, %v778_v32  ;;  %v8890_v51 = vld [vmem:[#allocation7_spill] sm:$0xff]  ;;  %v8891_v54 = vld [vmem:[#allocation14_spill] sm:$0xff]  ;;  %v8898_v32 = vld [vmem:[#allocation13_spill] sm:$0xff] }
 0x13f   :  { %6103 = vmatprep.subr.bf16.mxu0 %v7473_v49  ;;  %6131 = vmatprep.subr.bf16.mxu1 %v8887_v60  ;;  %v8897_v44 = vld [vmem:[#allocation18_spill] sm:$0xff] }
 0x140   :  { %6860 = vtanh.f32 %v749_v12  ;;  %v8892_v12 = vld [vmem:[#allocation8_spill] sm:$0xff] }
 0x142   :  { %6105 = vmatpush1.bf16.msra.mxu0 %v7498_v62  ;;  %6133 = vmatpush3.bf16.msra.mxu1 %v7572_v52 }
 0x143   :  { %6107 = vmatprep.subr.bf16.mxu0 %v7502_v63  ;;  %6134 = vmatprep.subr.bf16.mxu1 %v8887_v60 }
 0x146   :  { %6109 = vmatpush1.bf16.msra.mxu0 %v7529_v18  ;;  %6136 = vmatpush3.bf16.msra.mxu1 %v7597_v6 }
 0x147   :  { %6111 = vmatprep.subr.bf16.mxu0 %v7532_v19  ;;  %6137 = vmatprep.subr.bf16.mxu1 %v8887_v60 }
 0x148   :  { %v6859_v0 = vpop.eup %6858 }
 0x149   :  { %v754_v47 = vmul.f32 %v6859_v0, %v752_v42  ;;  %v8899_v42 = vld [vmem:[#allocation15_spill] sm:$0xff] }
 0x14a   :  { %v6861_v20 = vpop.eup %6860  ;;  %6113 = vmatpush1.bf16.msra.mxu0 %v7557_v39  ;;  %6139 = vmatpush3.bf16.msra.mxu1 %v7611_v25  ;;  %v8900_v0 = vld [vmem:[#allocation19_spill] sm:$0xff] }
 0x14b   :  { %6115 = vmatprep.subr.bf16.mxu0 %v7560_v40  ;;  %6140 = vmatprep.subr.bf16.mxu1 %v8887_v60  ;;  %v755_v26 = vmul.f32 %v6861_v20, %v753_v57  ;;  %v7814_v13 = vadd.f32 %v781_v8, %v754_v47  ;;  %v8901_v57 = vld [vmem:[#allocation16_spill] sm:$0xff] }
 0x14c   :  { %v8902_v20 = vld [vmem:[#allocation20_spill] sm:$0xff] }
 0x14d   :  { %v7816_v7 = vadd.f32 %v782_v4, %v755_v26  ;;  %785 = vst [vmem:[%s8817_s5 + $0x7] sm:$0x1] %v7814_v13 }
 0x14e   :  { %6117 = vmatpush1.bf16.msra.mxu0 %v7585_v58  ;;  %6142 = vmatpush3.bf16.msra.mxu1 %v7624_v34 }
 0x14f   :  { %6119 = vmatprep.subr.bf16.mxu0 %v7588_v61  ;;  %6143 = vmatprep.subr.bf16.mxu1 %v8887_v60  ;;  %786 = vst [vmem:[%s8817_s5 + $0xf] sm:$0x1] %v7816_v7  ;;  %v1085_v50 = vcombine.low %v7814_v13, %v7816_v7 }
 0x151   :  { %v1092_v1 = vrot.slane %v1085_v50, %v7689_v38 }
 0x152   :  { %6121 = vmatpush1.bf16.msra.mxu0 %v7607_v17  ;;  %6145 = vmatpush3.bf16.msra.mxu1 %v7638_v45 }
 0x153   :  { %v1099_v14 = vrot.slane %v1092_v1, %v7689_v38  ;;  %6147 = vmatprep.subr.bf16.mxu0 %v7189_v5  ;;  %6178 = vmatprep.subr.bf16.mxu1 %v8887_v60  ;;  %v8903_v1 = vld [vmem:[#allocation21_spill] sm:$0xff] }
 0x155   :  { %1166 = vmatmul.mubr.f32.vlgmr.msra.gmra.mrb[6].mxu0 %v1099_v14  ;;  %5500 = vmatmul.mubr.f32.vlgmr.msra.gmra.mrb[6].mxu1 %v1099_v14 }
 0x156   :  { %6149 = vmatpush1.bf16.msra.mxu0 %v7202_v9  ;;  %6180 = vmatpush3.bf16.msra.mxu1 %v7261_v29 }
 0x157   :  { %6151 = vmatprep.subr.bf16.mxu0 %v7204_v10  ;;  %6181 = vmatprep.subr.bf16.mxu1 %v8887_v60 }
 0x158   :  { %1457 = vmatprep.mubr.f32.mxu0 %v8888_v59  ;;  %5534 = vmatprep.mubr.msk.f32.mxu1 %vm7144_vm0, %v8888_v59 }
 0x15a   :  { %6153 = vmatpush1.bf16.msra.mxu0 %v7220_v15  ;;  %6183 = vmatpush3.bf16.msra.mxu1 %v7285_v37 }
 0x15b   :  { %6155 = vmatprep.subr.bf16.mxu0 %v7223_v16  ;;  %6184 = vmatprep.subr.bf16.mxu1 %v8887_v60 }
 0x15e   :  { %6157 = vmatpush1.bf16.msra.mxu0 %v7238_v21  ;;  %6186 = vmatpush3.bf16.msra.mxu1 %v7313_v46 }
 0x15f   :  { %6159 = vmatprep.subr.bf16.mxu0 %v7241_v22  ;;  %6187 = vmatprep.subr.bf16.mxu1 %v8887_v60 }
 0x162   :  { %6161 = vmatpush1.bf16.msra.mxu0 %v7267_v31  ;;  %6189 = vmatpush3.bf16.msra.mxu1 %v7341_v55  ;;  %v8904_v31 = vld [vmem:[#allocation22_spill] sm:$0xff] }
 0x163   :  { %6163 = vmatprep.subr.bf16.mxu0 %v8889_v2  ;;  %6190 = vmatprep.subr.bf16.mxu1 %v8887_v60 }
 0x166   :  { %6165 = vmatpush1.bf16.msra.mxu0 %v8890_v51  ;;  %6192 = vmatpush3.bf16.msra.mxu1 %v8891_v54 }
 0x167   :  { %6167 = vmatprep.subr.bf16.mxu0 %v8892_v12  ;;  %6193 = vmatprep.subr.bf16.mxu1 %v8887_v60 }
 0x16a   :  { %6169 = vmatpush1.bf16.msra.mxu0 %v8893_v27  ;;  %6195 = vmatpush3.bf16.msra.mxu1 %v8894_v53 }
 0x16b   :  { %6171 = vmatprep.subr.bf16.mxu0 %v8895_v33  ;;  %6196 = vmatprep.subr.bf16.mxu1 %v8887_v60 }
 0x16e   :  { %6173 = vmatpush1.bf16.msra.mxu0 %v8896_v41  ;;  %6198 = vmatpush3.bf16.msra.mxu1 %v8897_v44 }
 0x16f   :  { %6175 = vmatprep.subr.bf16.mxu0 %v8898_v32  ;;  %6199 = vmatprep.subr.bf16.mxu1 %v8887_v60  ;;  %v5005_v32 = vld [vmem:[%s8814_s0 + $0x1] ss:$8 sm:$0x7] }
 0x172   :  { %6177 = vmatpush1.bf16.msra.mxu0 %v8899_v42  ;;  %6201 = vmatpush3.bf16.msra.mxu1 %v8900_v0 }
 0x173   :  { %6203 = vmatprep.subr.bf16.mxu0 %v8901_v57  ;;  %6234 = vmatprep.subr.bf16.mxu1 %v8887_v60  ;;  %v5006_v57 = vld [vmem:[%s8814_s0 + $0x19] ss:$8 sm:$0x7] }
 0x174   :  { %v992_v33 = vrot.slane %v5006_v57, 1 }
 0x208   :  { %v875_v47 = vpop.f32.mrb[4].mxu0  ;;  %v946_v8 = vpop.f32.mrb[4].mxu1 }
 0x209   :  { %v876_v26 = vadd.f32 %v875_v47, %v8902_v20  ;;  %v877_v4 = vpop.f32.mrb[5].mxu0  ;;  %v5466_v50 = vpop.f32.mrb[5].mxu1  ;;  %v991_v47 = vrot.slane %v5005_v32, 1 }
 0x20a   :  { %v878_v14 = vadd.f32 %v877_v4, %v8903_v1 }
 0x20b   :  { %v957_v42 = vrot.slane %v876_v26, %v7689_v38 }
 0x20c   :  { %v1002_v0 = vrot.slane %v878_v14, %v7689_v38 }
 0x20d   :  { %v958_v44 = vcombine.high %v957_v42, %v957_v42  ;;  %v965_v41 = vrot.slane %v957_v42, %v7689_v38 }
 0x20e   :  { %v1003_v20 = vcombine.high %v1002_v0, %v1002_v0  ;;  %v1010_v50 = vrot.slane %v1002_v0, %v7689_v38 }
 0x20f   :  { %v972_v4 = vrot.slane %v958_v44, %v7689_v38  ;;  %v975_v1 = vadd.f32 %v5005_v32, %v965_v41  ;;  %v947_v44 = vadd.f32 %v946_v8, %v8904_v31 }
 0x210   :  { %v1017_v53 = vrot.slane %v1003_v20, %v7689_v38  ;;  %v1020_v12 = vadd.f32 %v1010_v50, %v991_v47 }
 0x211   :  { %v976_v26 = vadd.f32 %v5006_v57, %v972_v4  ;;  %v5007_v27 = vmul.f32 -1.442695, %v975_v1  ;;  %v1041_v20 = vrot.slane %v947_v44, %v7689_v38 }
 0x212   :  { %v1021_v51 = vadd.f32 %v1017_v53, %v992_v33  ;;  %v5009_v14 = vmul.f32 -1.442695, %v1020_v12  ;;  %v8905_v33 = vld [vmem:[#allocation23_spill] sm:$0xff] }
 0x213   :  { %6862 = vpow2.f32 %v5007_v27  ;;  %v5008_v54 = vmul.f32 -1.442695, %v976_v26  ;;  %v1042_v27 = vcombine.high %v1041_v20, %v1041_v20 }
 0x214   :  { %v5010_v2 = vmul.f32 -1.442695, %v1021_v51  ;;  %v1049_v51 = vrot.slane %v1041_v20, %v7689_v38 }
 0x215   :  { %6864 = vpow2.f32 %v5008_v54  ;;  %v1056_v44 = vrot.slane %v1042_v27, %v7689_v38 }
 0x216   :  { %6866 = vpow2.f32 %v5009_v14 }
 0x217   :  { %6868 = vpow2.f32 %v5010_v2  ;;  %v1061_v2 = vrot.slane %v5005_v32, 2 }
 0x21d   :  { %v6863_v42 = vpop.eup %6862 }
 0x21e   :  { %v983_v55 = vadd.f32 1.0, %v6863_v42  ;;  %v1062_v42 = vrot.slane %v5006_v57, 2  ;;  %v7903_v57 = vld [vmem:[%s8815_s1 + $0x1e] ss:$8 sm:$0x7] }
 0x21f   :  { %v6865_v0 = vpop.eup %6864 }
 0x220   :  { %v984_v41 = vadd.f32 1.0, %v6865_v0  ;;  %6870 = vrcp.f32 %v983_v55  ;;  %v6867_v1 = vpop.eup %6866  ;;  %v8906_v55 = vld [vmem:[#allocation24_spill] sm:$0xff] }
 0x221   :  { %v6869_v47 = vpop.eup %6868  ;;  %v1028_v50 = vadd.f32 1.0, %v6867_v1  ;;  %v7896_v1 = vld [vmem:[%s8815_s1 + $0x6] ss:$8 sm:$0x7] }
 0x222   :  { %6872 = vrcp.f32 %v984_v41  ;;  %v1029_v53 = vadd.f32 1.0, %v6869_v47 }
 0x223   :  { %6874 = vrcp.f32 %v1028_v50 }
 0x224   :  { %6876 = vrcp.f32 %v1029_v53 }
 0x228   :  { %v1167_v54 = vpop.f32.mrb[6].mxu0  ;;  %v1238_v12 = vpop.f32.mrb[6].mxu1 }
 0x229   :  { %v1168_v4 = vadd.f32 %v1167_v54, %v8905_v33  ;;  %v1169_v26 = vpop.f32.mrb[7].mxu0  ;;  %v5501_v14 = vpop.f32.mrb[7].mxu1 }
 0x22a   :  { %v6871_v8 = vpop.eup %6870  ;;  %v1170_v0 = vadd.f32 %v1169_v26, %v8906_v55 }
 0x22b   :  { %v1059_v41 = vmul.f32 %v6871_v8, %v1049_v51  ;;  %v1249_v20 = vrot.slane %v1168_v4, %v7689_v38  ;;  %v1283_v51 = vrot.slane %v7896_v1, 1 }
 0x22c   :  { %v6873_v32 = vpop.eup %6872  ;;  %v1294_v47 = vrot.slane %v1170_v0, %v7689_v38 }
 0x22d   :  { %v1060_v54 = vmul.f32 %v6873_v32, %v1056_v44  ;;  %v1065_v14 = vadd.f32 %v1061_v2, %v1059_v41  ;;  %v1250_v27 = vcombine.high %v1249_v20, %v1249_v20  ;;  %v1257_v50 = vrot.slane %v1249_v20, %v7689_v38  ;;  %v6875_v31 = vpop.eup %6874 }
 0x22e   :  { %v1295_v26 = vcombine.high %v1294_v47, %v1294_v47  ;;  %v1302_v8 = vrot.slane %v1294_v47, %v7689_v38  ;;  %v1284_v2 = vrot.slane %v7903_v57, 1 }
 0x22f   :  { %v1066_v4 = vadd.f32 %v1062_v42, %v1060_v54  ;;  %6878 = vtanh.f32 %v1065_v14  ;;  %v1264_v53 = vrot.slane %v1250_v27, %v7689_v38  ;;  %v1267_v0 = vadd.f32 %v7896_v1, %v1257_v50  ;;  %v6877_v42 = vpop.eup %6876 }
 0x230   :  { %v1309_v44 = vrot.slane %v1295_v26, %v7689_v38  ;;  %v1312_v20 = vadd.f32 %v1302_v8, %v1283_v51  ;;  %v1069_v14 = vsub.f32 1.0, %v6875_v31  ;;  %v1070_v50 = vsub.f32 1.0, %v6877_v42 }
 0x231   :  { %6880 = vtanh.f32 %v1066_v4  ;;  %v1268_v41 = vadd.f32 %v7903_v57, %v1264_v53  ;;  %v5013_v32 = vmul.f32 -1.442695, %v1267_v0  ;;  %v1073_v26 = vmul.f32 %v6875_v31, %v7761_v3 }
 0x232   :  { %v1313_v33 = vadd.f32 %v1309_v44, %v1284_v2  ;;  %v5015_v47 = vmul.f32 -1.442695, %v1312_v20  ;;  %v1074_v51 = vmul.f32 %v6877_v42, %v7764_v28  ;;  %v1239_v44 = vadd.f32 %v1238_v12, %v7759_v43 }
 0x233   :  { %6882 = vpow2.f32 %v5013_v32  ;;  %v5014_v55 = vmul.f32 -1.442695, %v1268_v41 }
 0x234   :  { %v5016_v54 = vmul.f32 -1.442695, %v1313_v33  ;;  %v1333_v28 = vrot.slane %v1239_v44, %v7689_v38 }
 0x235   :  { %6884 = vpow2.f32 %v5014_v55 }
 0x236   :  { %6886 = vpow2.f32 %v5015_v47  ;;  %v1334_v12 = vcombine.high %v1333_v28, %v1333_v28  ;;  %v1341_v47 = vrot.slane %v1333_v28, %v7689_v38 }
 0x237   :  { %6888 = vpow2.f32 %v5016_v54  ;;  %v1353_v54 = vrot.slane %v7896_v1, 2 }
 0x239   :  { %v6879_v27 = vpop.eup %6878 }
 0x23a   :  { %v1071_v22 = vmul.f32 %v6879_v27, %v1069_v14 }
 0x23b   :  { %v6881_v4 = vpop.eup %6880 }
 0x23c   :  { %v1072_v53 = vmul.f32 %v6881_v4, %v1070_v50  ;;  %v7915_v8 = vadd.f32 %v1073_v26, %v1071_v22  ;;  %v1348_v50 = vrot.slane %v1334_v12, %v7689_v38  ;;  %v1354_v4 = vrot.slane %v7903_v57, 2 }
 0x23d   :  { %v6883_v0 = vpop.eup %6882 }
 0x23e   :  { %v1275_v2 = vadd.f32 1.0, %v6883_v0  ;;  %v7917_v55 = vadd.f32 %v1074_v51, %v1072_v53  ;;  %1077 = vst [vmem:[%s8816_s4 + $0x1] sm:$0x1] %v7915_v8 }
 0x23f   :  { %v6885_v33 = vpop.eup %6884 }
 0x240   :  { %v1276_v31 = vadd.f32 1.0, %v6885_v33  ;;  %6890 = vrcp.f32 %v1275_v2  ;;  %1078 = vst [vmem:[%s8816_s4 + $0x9] sm:$0x1] %v7917_v55  ;;  %v1377_v22 = vcombine.low %v7915_v8, %v7917_v55  ;;  %v6887_v41 = vpop.eup %6886 }
 0x241   :  { %v6889_v20 = vpop.eup %6888  ;;  %v1320_v42 = vadd.f32 1.0, %v6887_v41 }
 0x242   :  { %6892 = vrcp.f32 %v1276_v31  ;;  %v1384_v3 = vrot.slane %v1377_v22, %v7689_v38  ;;  %v1321_v14 = vadd.f32 1.0, %v6889_v20 }
 0x243   :  { %6894 = vrcp.f32 %v1320_v42 }
 0x244   :  { %v1391_v32 = vrot.slane %v1384_v3, %v7689_v38  ;;  %6896 = vrcp.f32 %v1321_v14  ;;  %v8909_v14 = vld [vmem:[#allocation11_spill] sm:$0xff] }
 0x246   :  { %1458 = vmatmul.mubr.f32.vlgmr.msra.gmra.mrb[8].mxu0 %v1391_v32  ;;  %5535 = vmatmul.mubr.f32.vlgmr.msra.gmra.mrb[8].mxu1 %v1391_v32 }
 0x247   :  { %6205 = vmatpush1.bf16.msra.mxu0 %v7412_v23  ;;  %6236 = vmatpush3.bf16.msra.mxu1 %v7485_v56 }
 0x248   :  { %6207 = vmatprep.subr.bf16.mxu0 %v7415_v24  ;;  %6237 = vmatprep.subr.bf16.mxu1 %v8887_v60 }
 0x249   :  { %1749 = vmatprep.mubr.f32.mxu0 %v8888_v59  ;;  %5569 = vmatprep.mubr.msk.f32.mxu1 %vm7144_vm0, %v8888_v59 }
 0x24a   :  { %v6891_v27 = vpop.eup %6890 }
 0x24b   :  { %v1351_v26 = vmul.f32 %v6891_v27, %v1341_v47  ;;  %6209 = vmatpush1.bf16.msra.mxu0 %v7441_v35  ;;  %6239 = vmatpush3.bf16.msra.mxu1 %v7514_v11  ;;  %v8907_v47 = vld [vmem:[#allocation4_spill] sm:$0xff]  ;;  %v8910_v27 = vld [vmem:[#allocation6_spill] sm:$0xff] }
 0x24c   :  { %v6893_v53 = vpop.eup %6892  ;;  %6211 = vmatprep.subr.bf16.mxu0 %v7445_v36  ;;  %6240 = vmatprep.subr.bf16.mxu1 %v8887_v60 }
 0x24d   :  { %v1352_v1 = vmul.f32 %v6893_v53, %v1348_v50  ;;  %v1357_v51 = vadd.f32 %v1353_v54, %v1351_v26  ;;  %v6895_v57 = vpop.eup %6894  ;;  %v8908_v54 = vld [vmem:[#allocation5_spill] sm:$0xff]  ;;  %v8911_v50 = vld [vmem:[#allocation7_spill] sm:$0xff]  ;;  %v8912_v26 = vld [vmem:[#allocation14_spill] sm:$0xff] }
 0x24e   :  { %v6897_v2 = vpop.eup %6896  ;;  %v1361_v33 = vsub.f32 1.0, %v6895_v57  ;;  %v1365_v3 = vmul.f32 %v6895_v57, %v7814_v13  ;;  %v8914_v53 = vld [vmem:[#allocation9_spill] sm:$0xff]  ;;  %v8918_v57 = vld [vmem:[#allocation18_spill] sm:$0xff] }
 0x24f   :  { %v1358_v0 = vadd.f32 %v1354_v4, %v1352_v1  ;;  %6898 = vtanh.f32 %v1357_v51  ;;  %6213 = vmatpush1.bf16.msra.mxu0 %v7470_v48  ;;  %6242 = vmatpush3.bf16.msra.mxu1 %v7544_v30  ;;  %v1362_v31 = vsub.f32 1.0, %v6897_v2  ;;  %v1366_v32 = vmul.f32 %v6897_v2, %v7816_v7  ;;  %v8913_v4 = vld [vmem:[#allocation8_spill] sm:$0xff]  ;;  %v8915_v1 = vld [vmem:[#allocation17_spill] sm:$0xff]  ;;  %v8916_v51 = vld [vmem:[#allocation10_spill] sm:$0xff] }
 0x250   :  { %6215 = vmatprep.subr.bf16.mxu0 %v7473_v49  ;;  %6243 = vmatprep.subr.bf16.mxu1 %v8887_v60  ;;  %v8919_v2 = vld [vmem:[#allocation13_spill] sm:$0xff] }
 0x251   :  { %6900 = vtanh.f32 %v1358_v0  ;;  %v8917_v0 = vld [vmem:[#allocation12_spill] sm:$0xff] }
 0x253   :  { %6217 = vmatpush1.bf16.msra.mxu0 %v7498_v62  ;;  %6245 = vmatpush3.bf16.msra.mxu1 %v7572_v52 }
 0x254   :  { %6219 = vmatprep.subr.bf16.mxu0 %v7502_v63  ;;  %6246 = vmatprep.subr.bf16.mxu1 %v8887_v60 }
 0x257   :  { %6221 = vmatpush1.bf16.msra.mxu0 %v7529_v18  ;;  %6248 = vmatpush3.bf16.msra.mxu1 %v7597_v6 }
 0x258   :  { %6223 = vmatprep.subr.bf16.mxu0 %v7532_v19  ;;  %6249 = vmatprep.subr.bf16.mxu1 %v8887_v60 }
 0x259   :  { %v6899_v44 = vpop.eup %6898 }
 0x25a   :  { %v1363_v22 = vmul.f32 %v6899_v44, %v1361_v33  ;;  %v8920_v33 = vld [vmem:[#allocation15_spill] sm:$0xff] }
 0x25b   :  { %v6901_v28 = vpop.eup %6900  ;;  %6225 = vmatpush1.bf16.msra.mxu0 %v7557_v39  ;;  %6251 = vmatpush3.bf16.msra.mxu1 %v7611_v25  ;;  %v8921_v44 = vld [vmem:[#allocation19_spill] sm:$0xff] }
 0x25c   :  { %6227 = vmatprep.subr.bf16.mxu0 %v7560_v40  ;;  %6252 = vmatprep.subr.bf16.mxu1 %v8887_v60  ;;  %v1364_v41 = vmul.f32 %v6901_v28, %v1362_v31  ;;  %v7966_v20 = vadd.f32 %v1365_v3, %v1363_v22  ;;  %v8922_v31 = vld [vmem:[#allocation16_spill] sm:$0xff] }
 0x25d   :  { %v8923_v28 = vld [vmem:[#allocation20_spill] sm:$0xff] }
 0x25e   :  { %v7968_v12 = vadd.f32 %v1366_v32, %v1364_v41  ;;  %1369 = vst [vmem:[%s8817_s5 + $0x6] sm:$0x1] %v7966_v20 }
 0x25f   :  { %6229 = vmatpush1.bf16.msra.mxu0 %v7585_v58  ;;  %6254 = vmatpush3.bf16.msra.mxu1 %v7624_v34 }
 0x260   :  { %6231 = vmatprep.subr.bf16.mxu0 %v7588_v61  ;;  %6255 = vmatprep.subr.bf16.mxu1 %v8887_v60  ;;  %1370 = vst [vmem:[%s8817_s5 + $0xe] sm:$0x1] %v7968_v12  ;;  %v1669_v13 = vcombine.low %v7966_v20, %v7968_v12 }
 0x262   :  { %v1676_v7 = vrot.slane %v1669_v13, %v7689_v38 }
 0x263   :  { %6233 = vmatpush1.bf16.msra.mxu0 %v7607_v17  ;;  %6257 = vmatpush3.bf16.msra.mxu1 %v7638_v45 }
 0x264   :  { %v1683_v42 = vrot.slane %v1676_v7, %v7689_v38  ;;  %6259 = vmatprep.subr.bf16.mxu0 %v7189_v5  ;;  %6290 = vmatprep.subr.bf16.mxu1 %v8887_v60  ;;  %v8924_v7 = vld [vmem:[#allocation21_spill] sm:$0xff] }
 0x266   :  { %1750 = vmatmul.mubr.f32.vlgmr.msra.gmra.mrb[10].mxu0 %v1683_v42  ;;  %5570 = vmatmul.mubr.f32.vlgmr.msra.gmra.mrb[10].mxu1 %v1683_v42 }
 0x267   :  { %6261 = vmatpush1.bf16.msra.mxu0 %v7202_v9  ;;  %6292 = vmatpush3.bf16.msra.mxu1 %v7261_v29 }
 0x268   :  { %6263 = vmatprep.subr.bf16.mxu0 %v7204_v10  ;;  %6293 = vmatprep.subr.bf16.mxu1 %v8887_v60 }
 0x269   :  { %2041 = vmatprep.mubr.f32.mxu0 %v8888_v59  ;;  %5604 = vmatprep.mubr.msk.f32.mxu1 %vm7144_vm0, %v8888_v59 }
 0x26b   :  { %6265 = vmatpush1.bf16.msra.mxu0 %v7220_v15  ;;  %6295 = vmatpush3.bf16.msra.mxu1 %v7285_v37 }
 0x26c   :  { %6267 = vmatprep.subr.bf16.mxu0 %v7223_v16  ;;  %6296 = vmatprep.subr.bf16.mxu1 %v8887_v60 }
 0x26f   :  { %6269 = vmatpush1.bf16.msra.mxu0 %v7238_v21  ;;  %6298 = vmatpush3.bf16.msra.mxu1 %v7313_v46 }
 0x270   :  { %6271 = vmatprep.subr.bf16.mxu0 %v8907_v47  ;;  %6299 = vmatprep.subr.bf16.mxu1 %v8887_v60 }
 0x273   :  { %6273 = vmatpush1.bf16.msra.mxu0 %v8908_v54  ;;  %6301 = vmatpush3.bf16.msra.mxu1 %v8909_v14  ;;  %v8925_v54 = vld [vmem:[#allocation22_spill] sm:$0xff] }
 0x274   :  { %6275 = vmatprep.subr.bf16.mxu0 %v8910_v27  ;;  %6302 = vmatprep.subr.bf16.mxu1 %v8887_v60 }
 0x277   :  { %6277 = vmatpush1.bf16.msra.mxu0 %v8911_v50  ;;  %6304 = vmatpush3.bf16.msra.mxu1 %v8912_v26 }
 0x278   :  { %6279 = vmatprep.subr.bf16.mxu0 %v8913_v4  ;;  %6305 = vmatprep.subr.bf16.mxu1 %v8887_v60 }
 0x27b   :  { %6281 = vmatpush1.bf16.msra.mxu0 %v8914_v53  ;;  %6307 = vmatpush3.bf16.msra.mxu1 %v8915_v1 }
 0x27c   :  { %6283 = vmatprep.subr.bf16.mxu0 %v8916_v51  ;;  %6308 = vmatprep.subr.bf16.mxu1 %v8887_v60 }
 0x27f   :  { %6285 = vmatpush1.bf16.msra.mxu0 %v8917_v0  ;;  %6310 = vmatpush3.bf16.msra.mxu1 %v8918_v57 }
 0x280   :  { %6287 = vmatprep.subr.bf16.mxu0 %v8919_v2  ;;  %6311 = vmatprep.subr.bf16.mxu1 %v8887_v60  ;;  %v5017_v2 = vld [vmem:[%s8814_s0 + $0x2] ss:$8 sm:$0x7] }
 0x283   :  { %6289 = vmatpush1.bf16.msra.mxu0 %v8920_v33  ;;  %6313 = vmatpush3.bf16.msra.mxu1 %v8921_v44 }
 0x284   :  { %6315 = vmatprep.subr.bf16.mxu0 %v8922_v31  ;;  %6346 = vmatprep.subr.bf16.mxu1 %v8887_v60  ;;  %v5018_v31 = vld [vmem:[%s8814_s0 + $0x1a] ss:$8 sm:$0x7] }
 0x285   :  { %v1576_v51 = vrot.slane %v5018_v31, 1 }
 0x319   :  { %v1459_v22 = vpop.f32.mrb[8].mxu0  ;;  %v1530_v3 = vpop.f32.mrb[8].mxu1 }
 0x31a   :  { %v1460_v41 = vadd.f32 %v1459_v22, %v8923_v28  ;;  %v1461_v32 = vpop.f32.mrb[9].mxu0  ;;  %v5536_v13 = vpop.f32.mrb[9].mxu1  ;;  %v1575_v22 = vrot.slane %v5017_v2, 1 }
 0x31b   :  { %v1462_v42 = vadd.f32 %v1461_v32, %v8924_v7 }
 0x31c   :  { %v1541_v33 = vrot.slane %v1460_v41, %v7689_v38 }
 0x31d   :  { %v1586_v44 = vrot.slane %v1462_v42, %v7689_v38 }
 0x31e   :  { %v1542_v57 = vcombine.high %v1541_v33, %v1541_v33  ;;  %v1549_v0 = vrot.slane %v1541_v33, %v7689_v38 }
 0x31f   :  { %v1587_v28 = vcombine.high %v1586_v44, %v1586_v44  ;;  %v1594_v13 = vrot.slane %v1586_v44, %v7689_v38 }
 0x320   :  { %v1556_v32 = vrot.slane %v1542_v57, %v7689_v38  ;;  %v1559_v7 = vadd.f32 %v5017_v2, %v1549_v0  ;;  %v1531_v57 = vadd.f32 %v1530_v3, %v8925_v54 }
 0x321   :  { %v1601_v1 = vrot.slane %v1587_v28, %v7689_v38  ;;  %v1604_v4 = vadd.f32 %v1594_v13, %v1575_v22 }
 0x322   :  { %v1560_v41 = vadd.f32 %v5018_v31, %v1556_v32  ;;  %v5019_v53 = vmul.f32 -1.442695, %v1559_v7  ;;  %v1625_v28 = vrot.slane %v1531_v57, %v7689_v38 }
 0x323   :  { %v1605_v50 = vadd.f32 %v1601_v1, %v1576_v51  ;;  %v5021_v42 = vmul.f32 -1.442695, %v1604_v4  ;;  %v8926_v51 = vld [vmem:[#allocation23_spill] sm:$0xff] }
 0x324   :  { %6902 = vpow2.f32 %v5019_v53  ;;  %v5020_v26 = vmul.f32 -1.442695, %v1560_v41  ;;  %v1626_v53 = vcombine.high %v1625_v28, %v1625_v28 }
 0x325   :  { %v5022_v27 = vmul.f32 -1.442695, %v1605_v50  ;;  %v1633_v50 = vrot.slane %v1625_v28, %v7689_v38 }
 0x326   :  { %6904 = vpow2.f32 %v5020_v26  ;;  %v1640_v57 = vrot.slane %v1626_v53, %v7689_v38 }
 0x327   :  { %6906 = vpow2.f32 %v5021_v42 }
 0x328   :  { %6908 = vpow2.f32 %v5022_v27  ;;  %v1645_v27 = vrot.slane %v5017_v2, 2 }
 0x32e   :  { %v6903_v33 = vpop.eup %6902 }
 0x32f   :  { %v1567_v14 = vadd.f32 1.0, %v6903_v33  ;;  %v1646_v33 = vrot.slane %v5018_v31, 2  ;;  %v8055_v31 = vld [vmem:[%s8815_s1 + $0x1d] ss:$8 sm:$0x7] }
 0x330   :  { %v6905_v44 = vpop.eup %6904 }
 0x331   :  { %v1568_v0 = vadd.f32 1.0, %v6905_v44  ;;  %6910 = vrcp.f32 %v1567_v14  ;;  %v6907_v7 = vpop.eup %6906  ;;  %v8927_v14 = vld [vmem:[#allocation24_spill] sm:$0xff] }
 0x332   :  { %v6909_v22 = vpop.eup %6908  ;;  %v1612_v13 = vadd.f32 1.0, %v6907_v7  ;;  %v8048_v7 = vld [vmem:[%s8815_s1 + $0x5] ss:$8 sm:$0x7] }
 0x333   :  { %6912 = vrcp.f32 %v1568_v0  ;;  %v1613_v1 = vadd.f32 1.0, %v6909_v22 }
 0x334   :  { %6914 = vrcp.f32 %v1612_v13 }
 0x335   :  { %6916 = vrcp.f32 %v1613_v1 }
 0x339   :  { %v1751_v26 = vpop.f32.mrb[10].mxu0  ;;  %v1822_v4 = vpop.f32.mrb[10].mxu1 }
 0x33a   :  { %v1752_v32 = vadd.f32 %v1751_v26, %v8926_v51  ;;  %v1753_v41 = vpop.f32.mrb[11].mxu0  ;;  %v5571_v42 = vpop.f32.mrb[11].mxu1 }
 0x33b   :  { %v6911_v3 = vpop.eup %6910  ;;  %v1754_v44 = vadd.f32 %v1753_v41, %v8927_v14 }
 0x33c   :  { %v1643_v0 = vmul.f32 %v6911_v3, %v1633_v50  ;;  %v1833_v28 = vrot.slane %v1752_v32, %v7689_v38  ;;  %v1867_v50 = vrot.slane %v8048_v7, 1 }
 0x33d   :  { %v6913_v2 = vpop.eup %6912  ;;  %v1878_v22 = vrot.slane %v1754_v44, %v7689_v38 }
 0x33e   :  { %v1644_v26 = vmul.f32 %v6913_v2, %v1640_v57  ;;  %v1649_v42 = vadd.f32 %v1645_v27, %v1643_v0  ;;  %v1834_v53 = vcombine.high %v1833_v28, %v1833_v28  ;;  %v1841_v13 = vrot.slane %v1833_v28, %v7689_v38  ;;  %v6915_v54 = vpop.eup %6914 }
 0x33f   :  { %v1879_v41 = vcombine.high %v1878_v22, %v1878_v22  ;;  %v1886_v3 = vrot.slane %v1878_v22, %v7689_v38  ;;  %v1868_v27 = vrot.slane %v8055_v31, 1 }
 0x340   :  { %v1650_v32 = vadd.f32 %v1646_v33, %v1644_v26  ;;  %6918 = vtanh.f32 %v1649_v42  ;;  %v1848_v1 = vrot.slane %v1834_v53, %v7689_v38  ;;  %v1851_v44 = vadd.f32 %v8048_v7, %v1841_v13  ;;  %v6917_v33 = vpop.eup %6916 }
 0x341   :  { %v1893_v57 = vrot.slane %v1879_v41, %v7689_v38  ;;  %v1896_v28 = vadd.f32 %v1886_v3, %v1867_v50  ;;  %v1653_v42 = vsub.f32 1.0, %v6915_v54  ;;  %v1654_v13 = vsub.f32 1.0, %v6917_v33 }
 0x342   :  { %6920 = vtanh.f32 %v1650_v32  ;;  %v1852_v0 = vadd.f32 %v8055_v31, %v1848_v1  ;;  %v5025_v2 = vmul.f32 -1.442695, %v1851_v44  ;;  %v1657_v41 = vmul.f32 %v6915_v54, %v7915_v8 }
 0x343   :  { %v1897_v51 = vadd.f32 %v1893_v57, %v1868_v27  ;;  %v5027_v22 = vmul.f32 -1.442695, %v1896_v28  ;;  %v1658_v50 = vmul.f32 %v6917_v33, %v7917_v55  ;;  %v1823_v57 = vadd.f32 %v1822_v4, %v7759_v43 }
 0x344   :  { %6922 = vpow2.f32 %v5025_v2  ;;  %v5026_v14 = vmul.f32 -1.442695, %v1852_v0 }
 0x345   :  { %v5028_v26 = vmul.f32 -1.442695, %v1897_v51  ;;  %v1917_v54 = vrot.slane %v1823_v57, %v7689_v38 }
 0x346   :  { %6924 = vpow2.f32 %v5026_v14 }
 0x347   :  { %6926 = vpow2.f32 %v5027_v22  ;;  %v1918_v4 = vcombine.high %v1917_v54, %v1917_v54  ;;  %v1925_v22 = vrot.slane %v1917_v54, %v7689_v38 }
 0x348   :  { %6928 = vpow2.f32 %v5028_v26  ;;  %v1937_v26 = vrot.slane %v8048_v7, 2 }
 0x34a   :  { %v6919_v53 = vpop.eup %6918 }
 0x34b   :  { %v1655_v47 = vmul.f32 %v6919_v53, %v1653_v42 }
 0x34c   :  { %v6921_v32 = vpop.eup %6920 }
 0x34d   :  { %v1656_v1 = vmul.f32 %v6921_v32, %v1654_v13  ;;  %v8067_v3 = vadd.f32 %v1657_v41, %v1655_v47  ;;  %v1932_v13 = vrot.slane %v1918_v4, %v7689_v38  ;;  %v1938_v32 = vrot.slane %v8055_v31, 2 }
 0x34e   :  { %v6923_v44 = vpop.eup %6922 }
 0x34f   :  { %v1859_v27 = vadd.f32 1.0, %v6923_v44  ;;  %v8069_v14 = vadd.f32 %v1658_v50, %v1656_v1  ;;  %1661 = vst [vmem:[%s8816_s4 + $0x2] sm:$0x1] %v8067_v3 }
 0x350   :  { %v6925_v51 = vpop.eup %6924 }
 0x351   :  { %v1860_v8 = vadd.f32 1.0, %v6925_v51  ;;  %6930 = vrcp.f32 %v1859_v27  ;;  %1662 = vst [vmem:[%s8816_s4 + $0xa] sm:$0x1] %v8069_v14  ;;  %v1961_v55 = vcombine.low %v8067_v3, %v8069_v14  ;;  %v6927_v0 = vpop.eup %6926 }
 0x352   :  { %v6929_v28 = vpop.eup %6928  ;;  %v1904_v33 = vadd.f32 1.0, %v6927_v0 }
 0x353   :  { %6932 = vrcp.f32 %v1860_v8  ;;  %v1968_v47 = vrot.slane %v1961_v55, %v7689_v38  ;;  %v1905_v42 = vadd.f32 1.0, %v6929_v28 }
 0x354   :  { %6934 = vrcp.f32 %v1904_v33 }
 0x355   :  { %v1975_v2 = vrot.slane %v1968_v47, %v7689_v38  ;;  %6936 = vrcp.f32 %v1905_v42  ;;  %v8930_v42 = vld [vmem:[#allocation11_spill] sm:$0xff] }
 0x357   :  { %2042 = vmatmul.mubr.f32.vlgmr.msra.gmra.mrb[12].mxu0 %v1975_v2  ;;  %5605 = vmatmul.mubr.f32.vlgmr.msra.gmra.mrb[12].mxu1 %v1975_v2 }
 0x358   :  { %6317 = vmatpush1.bf16.msra.mxu0 %v7412_v23  ;;  %6348 = vmatpush3.bf16.msra.mxu1 %v7485_v56 }
 0x359   :  { %6319 = vmatprep.subr.bf16.mxu0 %v7415_v24  ;;  %6349 = vmatprep.subr.bf16.mxu1 %v8887_v60 }
 0x35a   :  { %2333 = vmatprep.mubr.f32.mxu0 %v8888_v59  ;;  %5639 = vmatprep.mubr.msk.f32.mxu1 %vm7144_vm0, %v8888_v59 }
 0x35b   :  { %v6931_v53 = vpop.eup %6930 }
 0x35c   :  { %v1935_v41 = vmul.f32 %v6931_v53, %v1925_v22  ;;  %6321 = vmatpush1.bf16.msra.mxu0 %v7441_v35  ;;  %6351 = vmatpush3.bf16.msra.mxu1 %v7514_v11  ;;  %v8928_v22 = vld [vmem:[#allocation4_spill] sm:$0xff]  ;;  %v8931_v53 = vld [vmem:[#allocation6_spill] sm:$0xff] }
 0x35d   :  { %v6933_v1 = vpop.eup %6932  ;;  %6323 = vmatprep.subr.bf16.mxu0 %v7445_v36  ;;  %6352 = vmatprep.subr.bf16.mxu1 %v8887_v60 }
 0x35e   :  { %v1936_v7 = vmul.f32 %v6933_v1, %v1932_v13  ;;  %v1941_v50 = vadd.f32 %v1937_v26, %v1935_v41  ;;  %v6935_v31 = vpop.eup %6934  ;;  %v8929_v26 = vld [vmem:[#allocation5_spill] sm:$0xff]  ;;  %v8932_v13 = vld [vmem:[#allocation7_spill] sm:$0xff]  ;;  %v8933_v41 = vld [vmem:[#allocation14_spill] sm:$0xff] }
 0x35f   :  { %v6937_v27 = vpop.eup %6936  ;;  %v1945_v51 = vsub.f32 1.0, %v6935_v31  ;;  %v1949_v47 = vmul.f32 %v6935_v31, %v7966_v20  ;;  %v8935_v1 = vld [vmem:[#allocation9_spill] sm:$0xff]  ;;  %v8939_v31 = vld [vmem:[#allocation18_spill] sm:$0xff] }
 0x360   :  { %v1942_v44 = vadd.f32 %v1938_v32, %v1936_v7  ;;  %6938 = vtanh.f32 %v1941_v50  ;;  %6325 = vmatpush1.bf16.msra.mxu0 %v7470_v48  ;;  %6354 = vmatpush3.bf16.msra.mxu1 %v7544_v30  ;;  %v1946_v8 = vsub.f32 1.0, %v6937_v27  ;;  %v1950_v2 = vmul.f32 %v6937_v27, %v7968_v12  ;;  %v8934_v32 = vld [vmem:[#allocation8_spill] sm:$0xff]  ;;  %v8936_v7 = vld [vmem:[#allocation17_spill] sm:$0xff]  ;;  %v8937_v50 = vld [vmem:[#allocation10_spill] sm:$0xff] }
 0x361   :  { %6327 = vmatprep.subr.bf16.mxu0 %v7473_v49  ;;  %6355 = vmatprep.subr.bf16.mxu1 %v8887_v60  ;;  %v8940_v27 = vld [vmem:[#allocation13_spill] sm:$0xff] }
 0x362   :  { %6940 = vtanh.f32 %v1942_v44  ;;  %v8938_v44 = vld [vmem:[#allocation12_spill] sm:$0xff] }
 0x364   :  { %6329 = vmatpush1.bf16.msra.mxu0 %v7498_v62  ;;  %6357 = vmatpush3.bf16.msra.mxu1 %v7572_v52 }
 0x365   :  { %6331 = vmatprep.subr.bf16.mxu0 %v7502_v63  ;;  %6358 = vmatprep.subr.bf16.mxu1 %v8887_v60 }
 0x368   :  { %6333 = vmatpush1.bf16.msra.mxu0 %v7529_v18  ;;  %6360 = vmatpush3.bf16.msra.mxu1 %v7597_v6 }
 0x369   :  { %6335 = vmatprep.subr.bf16.mxu0 %v7532_v19  ;;  %6361 = vmatprep.subr.bf16.mxu1 %v8887_v60 }
 0x36a   :  { %v6939_v57 = vpop.eup %6938 }
 0x36b   :  { %v1947_v55 = vmul.f32 %v6939_v57, %v1945_v51  ;;  %v8941_v51 = vld [vmem:[#allocation15_spill] sm:$0xff] }
 0x36c   :  { %v6941_v54 = vpop.eup %6940  ;;  %6337 = vmatpush1.bf16.msra.mxu0 %v7557_v39  ;;  %6363 = vmatpush3.bf16.msra.mxu1 %v7611_v25  ;;  %v8942_v57 = vld [vmem:[#allocation19_spill] sm:$0xff] }
 0x36d   :  { %6339 = vmatprep.subr.bf16.mxu0 %v7560_v40  ;;  %6364 = vmatprep.subr.bf16.mxu1 %v8887_v60  ;;  %v1948_v0 = vmul.f32 %v6941_v54, %v1946_v8  ;;  %v8118_v28 = vadd.f32 %v1949_v47, %v1947_v55  ;;  %v8943_v8 = vld [vmem:[#allocation16_spill] sm:$0xff] }
 0x36e   :  { %v8944_v54 = vld [vmem:[#allocation20_spill] sm:$0xff] }
 0x36f   :  { %v8120_v4 = vadd.f32 %v1950_v2, %v1948_v0  ;;  %1953 = vst [vmem:[%s8817_s5 + $0x5] sm:$0x1] %v8118_v28 }
 0x370   :  { %6341 = vmatpush1.bf16.msra.mxu0 %v7585_v58  ;;  %6366 = vmatpush3.bf16.msra.mxu1 %v7624_v34 }
 0x371   :  { %6343 = vmatprep.subr.bf16.mxu0 %v7588_v61  ;;  %6367 = vmatprep.subr.bf16.mxu1 %v8887_v60  ;;  %1954 = vst [vmem:[%s8817_s5 + $0xd] sm:$0x1] %v8120_v4  ;;  %v2253_v20 = vcombine.low %v8118_v28, %v8120_v4 }
 0x373   :  { %v2260_v12 = vrot.slane %v2253_v20, %v7689_v38 }
 0x374   :  { %6345 = vmatpush1.bf16.msra.mxu0 %v7607_v17  ;;  %6369 = vmatpush3.bf16.msra.mxu1 %v7638_v45 }
 0x375   :  { %v2267_v33 = vrot.slane %v2260_v12, %v7689_v38  ;;  %6371 = vmatprep.subr.bf16.mxu0 %v7189_v5  ;;  %6402 = vmatprep.subr.bf16.mxu1 %v8887_v60  ;;  %v8945_v12 = vld [vmem:[#allocation21_spill] sm:$0xff] }
 0x377   :  { %2334 = vmatmul.mubr.f32.vlgmr.msra.gmra.mrb[14].mxu0 %v2267_v33  ;;  %5640 = vmatmul.mubr.f32.vlgmr.msra.gmra.mrb[14].mxu1 %v2267_v33 }
 0x378   :  { %6373 = vmatpush1.bf16.msra.mxu0 %v7202_v9  ;;  %6404 = vmatpush3.bf16.msra.mxu1 %v7261_v29 }
 0x379   :  { %6375 = vmatprep.subr.bf16.mxu0 %v7204_v10  ;;  %6405 = vmatprep.subr.bf16.mxu1 %v8887_v60 }
 0x37a   :  { %2625 = vmatprep.mubr.f32.mxu0 %v8888_v59  ;;  %5674 = vmatprep.mubr.msk.f32.mxu1 %vm7144_vm0, %v8888_v59 }
 0x37c   :  { %6377 = vmatpush1.bf16.msra.mxu0 %v7220_v15  ;;  %6407 = vmatpush3.bf16.msra.mxu1 %v7285_v37 }
 0x37d   :  { %6379 = vmatprep.subr.bf16.mxu0 %v7223_v16  ;;  %6408 = vmatprep.subr.bf16.mxu1 %v8887_v60 }
 0x380   :  { %6381 = vmatpush1.bf16.msra.mxu0 %v7238_v21  ;;  %6410 = vmatpush3.bf16.msra.mxu1 %v7313_v46 }
 0x381   :  { %6383 = vmatprep.subr.bf16.mxu0 %v8928_v22  ;;  %6411 = vmatprep.subr.bf16.mxu1 %v8887_v60 }
 0x384   :  { %6385 = vmatpush1.bf16.msra.mxu0 %v8929_v26  ;;  %6413 = vmatpush3.bf16.msra.mxu1 %v8930_v42  ;;  %v8946_v26 = vld [vmem:[#allocation22_spill] sm:$0xff] }
 0x385   :  { %6387 = vmatprep.subr.bf16.mxu0 %v8931_v53  ;;  %6414 = vmatprep.subr.bf16.mxu1 %v8887_v60 }
 0x388   :  { %6389 = vmatpush1.bf16.msra.mxu0 %v8932_v13  ;;  %6416 = vmatpush3.bf16.msra.mxu1 %v8933_v41 }
 0x389   :  { %6391 = vmatprep.subr.bf16.mxu0 %v8934_v32  ;;  %6417 = vmatprep.subr.bf16.mxu1 %v8887_v60 }
 0x38c   :  { %6393 = vmatpush1.bf16.msra.mxu0 %v8935_v1  ;;  %6419 = vmatpush3.bf16.msra.mxu1 %v8936_v7 }
 0x38d   :  { %6395 = vmatprep.subr.bf16.mxu0 %v8937_v50  ;;  %6420 = vmatprep.subr.bf16.mxu1 %v8887_v60 }
 0x390   :  { %6397 = vmatpush1.bf16.msra.mxu0 %v8938_v44  ;;  %6422 = vmatpush3.bf16.msra.mxu1 %v8939_v31 }
 0x391   :  { %6399 = vmatprep.subr.bf16.mxu0 %v8940_v27  ;;  %6423 = vmatprep.subr.bf16.mxu1 %v8887_v60  ;;  %v5029_v27 = vld [vmem:[%s8814_s0 + $0x3] ss:$8 sm:$0x7] }
 0x394   :  { %6401 = vmatpush1.bf16.msra.mxu0 %v8941_v51  ;;  %6425 = vmatpush3.bf16.msra.mxu1 %v8942_v57 }
 0x395   :  { %6427 = vmatprep.subr.bf16.mxu0 %v8943_v8  ;;  %6458 = vmatprep.subr.bf16.mxu1 %v8887_v60  ;;  %v5030_v8 = vld [vmem:[%s8814_s0 + $0x1b] ss:$8 sm:$0x7] }
 0x396   :  { %v2160_v50 = vrot.slane %v5030_v8, 1 }
 0x42a   :  { %v2043_v55 = vpop.f32.mrb[12].mxu0  ;;  %v2114_v47 = vpop.f32.mrb[12].mxu1 }
 0x42b   :  { %v2044_v0 = vadd.f32 %v2043_v55, %v8944_v54  ;;  %v2045_v2 = vpop.f32.mrb[13].mxu0  ;;  %v5606_v20 = vpop.f32.mrb[13].mxu1  ;;  %v2159_v55 = vrot.slane %v5029_v27, 1 }
 0x42c   :  { %v2046_v33 = vadd.f32 %v2045_v2, %v8945_v12 }
 0x42d   :  { %v2125_v51 = vrot.slane %v2044_v0, %v7689_v38 }
 0x42e   :  { %v2170_v57 = vrot.slane %v2046_v33, %v7689_v38 }
 0x42f   :  { %v2126_v31 = vcombine.high %v2125_v51, %v2125_v51  ;;  %v2133_v44 = vrot.slane %v2125_v51, %v7689_v38 }
 0x430   :  { %v2171_v54 = vcombine.high %v2170_v57, %v2170_v57  ;;  %v2178_v20 = vrot.slane %v2170_v57, %v7689_v38 }
 0x431   :  { %v2140_v2 = vrot.slane %v2126_v31, %v7689_v38  ;;  %v2143_v12 = vadd.f32 %v5029_v27, %v2133_v44  ;;  %v2115_v31 = vadd.f32 %v2114_v47, %v8946_v26 }
 0x432   :  { %v2185_v7 = vrot.slane %v2171_v54, %v7689_v38  ;;  %v2188_v32 = vadd.f32 %v2178_v20, %v2159_v55 }
 0x433   :  { %v2144_v0 = vadd.f32 %v5030_v8, %v2140_v2  ;;  %v5031_v1 = vmul.f32 -1.442695, %v2143_v12  ;;  %v2209_v54 = vrot.slane %v2115_v31, %v7689_v38 }
 0x434   :  { %v2189_v13 = vadd.f32 %v2185_v7, %v2160_v50  ;;  %v5033_v33 = vmul.f32 -1.442695, %v2188_v32  ;;  %v8947_v50 = vld [vmem:[#allocation23_spill] sm:$0xff] }
 0x435   :  { %6942 = vpow2.f32 %v5031_v1  ;;  %v5032_v41 = vmul.f32 -1.442695, %v2144_v0  ;;  %v2210_v1 = vcombine.high %v2209_v54, %v2209_v54 }
 0x436   :  { %v5034_v53 = vmul.f32 -1.442695, %v2189_v13  ;;  %v2217_v13 = vrot.slane %v2209_v54, %v7689_v38 }
 0x437   :  { %6944 = vpow2.f32 %v5032_v41  ;;  %v2224_v31 = vrot.slane %v2210_v1, %v7689_v38 }
 0x438   :  { %6946 = vpow2.f32 %v5033_v33 }
 0x439   :  { %6948 = vpow2.f32 %v5034_v53  ;;  %v2229_v53 = vrot.slane %v5029_v27, 2 }
 0x43f   :  { %v6943_v51 = vpop.eup %6942 }
 0x440   :  { %v2151_v42 = vadd.f32 1.0, %v6943_v51  ;;  %v2230_v51 = vrot.slane %v5030_v8, 2  ;;  %v8207_v8 = vld [vmem:[%s8815_s1 + $0x1c] ss:$8 sm:$0x7] }
 0x441   :  { %v6945_v57 = vpop.eup %6944 }
 0x442   :  { %v2152_v44 = vadd.f32 1.0, %v6945_v57  ;;  %6950 = vrcp.f32 %v2151_v42  ;;  %v6947_v12 = vpop.eup %6946  ;;  %v8948_v42 = vld [vmem:[#allocation24_spill] sm:$0xff] }
 0x443   :  { %v6949_v55 = vpop.eup %6948  ;;  %v2196_v20 = vadd.f32 1.0, %v6947_v12  ;;  %v8200_v12 = vld [vmem:[%s8815_s1 + $0x4] ss:$8 sm:$0x7] }
 0x444   :  { %6952 = vrcp.f32 %v2152_v44  ;;  %v2197_v7 = vadd.f32 1.0, %v6949_v55 }
 0x445   :  { %6954 = vrcp.f32 %v2196_v20 }
 0x446   :  { %6956 = vrcp.f32 %v2197_v7 }
 0x44a   :  { %v2335_v41 = vpop.f32.mrb[14].mxu0  ;;  %v2406_v32 = vpop.f32.mrb[14].mxu1 }
 0x44b   :  { %v2336_v2 = vadd.f32 %v2335_v41, %v8947_v50  ;;  %v2337_v0 = vpop.f32.mrb[15].mxu0  ;;  %v5641_v33 = vpop.f32.mrb[15].mxu1 }
 0x44c   :  { %v6951_v47 = vpop.eup %6950  ;;  %v2338_v57 = vadd.f32 %v2337_v0, %v8948_v42 }
 0x44d   :  { %v2227_v44 = vmul.f32 %v6951_v47, %v2217_v13  ;;  %v2417_v54 = vrot.slane %v2336_v2, %v7689_v38  ;;  %v2451_v13 = vrot.slane %v8200_v12, 1 }
 0x44e   :  { %v6953_v27 = vpop.eup %6952  ;;  %v2462_v55 = vrot.slane %v2338_v57, %v7689_v38 }
 0x44f   :  { %v2228_v41 = vmul.f32 %v6953_v27, %v2224_v31  ;;  %v2233_v33 = vadd.f32 %v2229_v53, %v2227_v44  ;;  %v2418_v1 = vcombine.high %v2417_v54, %v2417_v54  ;;  %v2425_v20 = vrot.slane %v2417_v54, %v7689_v38  ;;  %v6955_v26 = vpop.eup %6954 }
 0x450   :  { %v2463_v0 = vcombine.high %v2462_v55, %v2462_v55  ;;  %v2470_v47 = vrot.slane %v2462_v55, %v7689_v38  ;;  %v2452_v53 = vrot.slane %v8207_v8, 1 }
 0x451   :  { %v2234_v2 = vadd.f32 %v2230_v51, %v2228_v41  ;;  %6958 = vtanh.f32 %v2233_v33  ;;  %v2432_v7 = vrot.slane %v2418_v1, %v7689_v38  ;;  %v2435_v57 = vadd.f32 %v8200_v12, %v2425_v20  ;;  %v6957_v51 = vpop.eup %6956 }
 0x452   :  { %v2477_v31 = vrot.slane %v2463_v0, %v7689_v38  ;;  %v2480_v54 = vadd.f32 %v2470_v47, %v2451_v13  ;;  %v2237_v33 = vsub.f32 1.0, %v6955_v26  ;;  %v2238_v20 = vsub.f32 1.0, %v6957_v51 }
 0x453   :  { %6960 = vtanh.f32 %v2234_v2  ;;  %v2436_v44 = vadd.f32 %v8207_v8, %v2432_v7  ;;  %v5037_v27 = vmul.f32 -1.442695, %v2435_v57  ;;  %v2241_v0 = vmul.f32 %v6955_v26, %v8067_v3 }
 0x454   :  { %v2481_v50 = vadd.f32 %v2477_v31, %v2452_v53  ;;  %v5039_v55 = vmul.f32 -1.442695, %v2480_v54  ;;  %v2242_v13 = vmul.f32 %v6957_v51, %v8069_v14  ;;  %v2407_v31 = vadd.f32 %v2406_v32, %v7759_v43 }
 0x455   :  { %6962 = vpow2.f32 %v5037_v27  ;;  %v5038_v42 = vmul.f32 -1.442695, %v2436_v44 }
 0x456   :  { %v5040_v41 = vmul.f32 -1.442695, %v2481_v50  ;;  %v2501_v26 = vrot.slane %v2407_v31, %v7689_v38 }
 0x457   :  { %6964 = vpow2.f32 %v5038_v42 }
 0x458   :  { %6966 = vpow2.f32 %v5039_v55  ;;  %v2502_v32 = vcombine.high %v2501_v26, %v2501_v26  ;;  %v2509_v55 = vrot.slane %v2501_v26, %v7689_v38 }
 0x459   :  { %6968 = vpow2.f32 %v5040_v41  ;;  %v2521_v41 = vrot.slane %v8200_v12, 2 }
 0x45b   :  { %v6959_v1 = vpop.eup %6958 }
 0x45c   :  { %v2239_v22 = vmul.f32 %v6959_v1, %v2237_v33 }
 0x45d   :  { %v6961_v2 = vpop.eup %6960 }
 0x45e   :  { %v2240_v7 = vmul.f32 %v6961_v2, %v2238_v20  ;;  %v8219_v47 = vadd.f32 %v2241_v0, %v2239_v22  ;;  %v2516_v20 = vrot.slane %v2502_v32, %v7689_v38  ;;  %v2522_v2 = vrot.slane %v8207_v8, 2 }
 0x45f   :  { %v6963_v57 = vpop.eup %6962 }
 0x460   :  { %v2443_v53 = vadd.f32 1.0, %v6963_v57  ;;  %v8221_v42 = vadd.f32 %v2242_v13, %v2240_v7  ;;  %2245 = vst [vmem:[%s8816_s4 + $0x3] sm:$0x1] %v8219_v47 }
 0x461   :  { %v6965_v50 = vpop.eup %6964 }
 0x462   :  { %v2444_v3 = vadd.f32 1.0, %v6965_v50  ;;  %6970 = vrcp.f32 %v2443_v53  ;;  %2246 = vst [vmem:[%s8816_s4 + $0xb] sm:$0x1] %v8221_v42  ;;  %v2545_v14 = vcombine.low %v8219_v47, %v8221_v42  ;;  %v6967_v44 = vpop.eup %6966 }
 0x463   :  { %v6969_v54 = vpop.eup %6968  ;;  %v2488_v51 = vadd.f32 1.0, %v6967_v44 }
 0x464   :  { %6972 = vrcp.f32 %v2444_v3  ;;  %v2552_v22 = vrot.slane %v2545_v14, %v7689_v38  ;;  %v2489_v33 = vadd.f32 1.0, %v6969_v54 }
 0x465   :  { %6974 = vrcp.f32 %v2488_v51 }
 0x466   :  { %v2559_v27 = vrot.slane %v2552_v22, %v7689_v38  ;;  %6976 = vrcp.f32 %v2489_v33  ;;  %v8951_v33 = vld [vmem:[#allocation11_spill] sm:$0xff] }
 0x468   :  { %2626 = vmatmul.mubr.f32.vlgmr.msra.gmra.mrb[16].mxu0 %v2559_v27  ;;  %5675 = vmatmul.mubr.f32.vlgmr.msra.gmra.mrb[16].mxu1 %v2559_v27 }
 0x469   :  { %6429 = vmatpush1.bf16.msra.mxu0 %v7412_v23  ;;  %6460 = vmatpush3.bf16.msra.mxu1 %v7485_v56 }
 0x46a   :  { %6431 = vmatprep.subr.bf16.mxu0 %v7415_v24  ;;  %6461 = vmatprep.subr.bf16.mxu1 %v8887_v60 }
 0x46b   :  { %2917 = vmatprep.mubr.f32.mxu0 %v8888_v59  ;;  %5709 = vmatprep.mubr.msk.f32.mxu1 %vm7144_vm0, %v8888_v59 }
 0x46c   :  { %v6971_v1 = vpop.eup %6970 }
 0x46d   :  { %v2519_v0 = vmul.f32 %v6971_v1, %v2509_v55  ;;  %6433 = vmatpush1.bf16.msra.mxu0 %v7441_v35  ;;  %6463 = vmatpush3.bf16.msra.mxu1 %v7514_v11  ;;  %v8949_v55 = vld [vmem:[#allocation4_spill] sm:$0xff]  ;;  %v8952_v1 = vld [vmem:[#allocation6_spill] sm:$0xff] }
 0x46e   :  { %v6973_v7 = vpop.eup %6972  ;;  %6435 = vmatprep.subr.bf16.mxu0 %v7445_v36  ;;  %6464 = vmatprep.subr.bf16.mxu1 %v8887_v60 }
 0x46f   :  { %v2520_v12 = vmul.f32 %v6973_v7, %v2516_v20  ;;  %v2525_v13 = vadd.f32 %v2521_v41, %v2519_v0  ;;  %v6975_v8 = vpop.eup %6974  ;;  %v8950_v41 = vld [vmem:[#allocation5_spill] sm:$0xff]  ;;  %v8953_v20 = vld [vmem:[#allocation7_spill] sm:$0xff]  ;;  %v8954_v0 = vld [vmem:[#allocation14_spill] sm:$0xff] }
 0x470   :  { %v6977_v53 = vpop.eup %6976  ;;  %v2529_v50 = vsub.f32 1.0, %v6975_v8  ;;  %v2533_v22 = vmul.f32 %v6975_v8, %v8118_v28  ;;  %v8956_v7 = vld [vmem:[#allocation9_spill] sm:$0xff]  ;;  %v8960_v8 = vld [vmem:[#allocation18_spill] sm:$0xff] }
 0x471   :  { %v2526_v57 = vadd.f32 %v2522_v2, %v2520_v12  ;;  %6978 = vtanh.f32 %v2525_v13  ;;  %6437 = vmatpush1.bf16.msra.mxu0 %v7470_v48  ;;  %6466 = vmatpush3.bf16.msra.mxu1 %v7544_v30  ;;  %v2530_v3 = vsub.f32 1.0, %v6977_v53  ;;  %v2534_v27 = vmul.f32 %v6977_v53, %v8120_v4  ;;  %v8955_v2 = vld [vmem:[#allocation8_spill] sm:$0xff]  ;;  %v8957_v12 = vld [vmem:[#allocation17_spill] sm:$0xff]  ;;  %v8958_v13 = vld [vmem:[#allocation10_spill] sm:$0xff] }
 0x472   :  { %6439 = vmatprep.subr.bf16.mxu0 %v7473_v49  ;;  %6467 = vmatprep.subr.bf16.mxu1 %v8887_v60  ;;  %v8961_v53 = vld [vmem:[#allocation13_spill] sm:$0xff] }
 0x473   :  { %6980 = vtanh.f32 %v2526_v57  ;;  %v8959_v57 = vld [vmem:[#allocation12_spill] sm:$0xff] }
 0x475   :  { %6441 = vmatpush1.bf16.msra.mxu0 %v7498_v62  ;;  %6469 = vmatpush3.bf16.msra.mxu1 %v7572_v52 }
 0x476   :  { %6443 = vmatprep.subr.bf16.mxu0 %v7502_v63  ;;  %6470 = vmatprep.subr.bf16.mxu1 %v8887_v60 }
 0x479   :  { %6445 = vmatpush1.bf16.msra.mxu0 %v7529_v18  ;;  %6472 = vmatpush3.bf16.msra.mxu1 %v7597_v6 }
 0x47a   :  { %6447 = vmatprep.subr.bf16.mxu0 %v7532_v19  ;;  %6473 = vmatprep.subr.bf16.mxu1 %v8887_v60 }
 0x47b   :  { %v6979_v31 = vpop.eup %6978 }
 0x47c   :  { %v2531_v14 = vmul.f32 %v6979_v31, %v2529_v50  ;;  %v8962_v50 = vld [vmem:[#allocation15_spill] sm:$0xff] }
 0x47d   :  { %v6981_v26 = vpop.eup %6980  ;;  %6449 = vmatpush1.bf16.msra.mxu0 %v7557_v39  ;;  %6475 = vmatpush3.bf16.msra.mxu1 %v7611_v25  ;;  %v8963_v31 = vld [vmem:[#allocation19_spill] sm:$0xff] }
 0x47e   :  { %6451 = vmatprep.subr.bf16.mxu0 %v7560_v40  ;;  %6476 = vmatprep.subr.bf16.mxu1 %v8887_v60  ;;  %v2532_v44 = vmul.f32 %v6981_v26, %v2530_v3  ;;  %v8270_v54 = vadd.f32 %v2533_v22, %v2531_v14  ;;  %v8964_v3 = vld [vmem:[#allocation16_spill] sm:$0xff] }
 0x47f   :  { %v8965_v26 = vld [vmem:[#allocation20_spill] sm:$0xff] }
 0x480   :  { %v8272_v32 = vadd.f32 %v2534_v27, %v2532_v44  ;;  %2537 = vst [vmem:[%s8817_s5 + $0x4] sm:$0x1] %v8270_v54 }
 0x481   :  { %6453 = vmatpush1.bf16.msra.mxu0 %v7585_v58  ;;  %6478 = vmatpush3.bf16.msra.mxu1 %v7624_v34 }
 0x482   :  { %6455 = vmatprep.subr.bf16.mxu0 %v7588_v61  ;;  %6479 = vmatprep.subr.bf16.mxu1 %v8887_v60  ;;  %2538 = vst [vmem:[%s8817_s5 + $0xc] sm:$0x1] %v8272_v32  ;;  %v2837_v28 = vcombine.low %v8270_v54, %v8272_v32 }
 0x484   :  { %v2844_v4 = vrot.slane %v2837_v28, %v7689_v38 }
 0x485   :  { %6457 = vmatpush1.bf16.msra.mxu0 %v7607_v17  ;;  %6481 = vmatpush3.bf16.msra.mxu1 %v7638_v45 }
 0x486   :  { %v2851_v51 = vrot.slane %v2844_v4, %v7689_v38  ;;  %6483 = vmatprep.subr.bf16.mxu0 %v7189_v5  ;;  %6514 = vmatprep.subr.bf16.mxu1 %v8887_v60  ;;  %v8966_v4 = vld [vmem:[#allocation21_spill] sm:$0xff] }
 0x488   :  { %2918 = vmatmul.mubr.f32.vlgmr.msra.gmra.mrb[18].mxu0 %v2851_v51  ;;  %5710 = vmatmul.mubr.f32.vlgmr.msra.gmra.mrb[18].mxu1 %v2851_v51 }
 0x489   :  { %6485 = vmatpush1.bf16.msra.mxu0 %v7202_v9  ;;  %6516 = vmatpush3.bf16.msra.mxu1 %v7261_v29 }
 0x48a   :  { %6487 = vmatprep.subr.bf16.mxu0 %v7204_v10  ;;  %6517 = vmatprep.subr.bf16.mxu1 %v8887_v60 }
 0x48b   :  { %3209 = vmatprep.mubr.f32.mxu0 %v8888_v59  ;;  %5744 = vmatprep.mubr.msk.f32.mxu1 %vm7144_vm0, %v8888_v59 }
 0x48d   :  { %6489 = vmatpush1.bf16.msra.mxu0 %v7220_v15  ;;  %6519 = vmatpush3.bf16.msra.mxu1 %v7285_v37 }
 0x48e   :  { %6491 = vmatprep.subr.bf16.mxu0 %v7223_v16  ;;  %6520 = vmatprep.subr.bf16.mxu1 %v8887_v60 }
 0x491   :  { %6493 = vmatpush1.bf16.msra.mxu0 %v7238_v21  ;;  %6522 = vmatpush3.bf16.msra.mxu1 %v7313_v46 }
 0x492   :  { %6495 = vmatprep.subr.bf16.mxu0 %v8949_v55  ;;  %6523 = vmatprep.subr.bf16.mxu1 %v8887_v60 }
 0x495   :  { %6497 = vmatpush1.bf16.msra.mxu0 %v8950_v41  ;;  %6525 = vmatpush3.bf16.msra.mxu1 %v8951_v33  ;;  %v8967_v41 = vld [vmem:[#allocation22_spill] sm:$0xff] }
 0x496   :  { %6499 = vmatprep.subr.bf16.mxu0 %v8952_v1  ;;  %6526 = vmatprep.subr.bf16.mxu1 %v8887_v60 }
 0x499   :  { %6501 = vmatpush1.bf16.msra.mxu0 %v8953_v20  ;;  %6528 = vmatpush3.bf16.msra.mxu1 %v8954_v0 }
 0x49a   :  { %6503 = vmatprep.subr.bf16.mxu0 %v8955_v2  ;;  %6529 = vmatprep.subr.bf16.mxu1 %v8887_v60 }
 0x49d   :  { %6505 = vmatpush1.bf16.msra.mxu0 %v8956_v7  ;;  %6531 = vmatpush3.bf16.msra.mxu1 %v8957_v12 }
 0x49e   :  { %6507 = vmatprep.subr.bf16.mxu0 %v8958_v13  ;;  %6532 = vmatprep.subr.bf16.mxu1 %v8887_v60 }
 0x4a1   :  { %6509 = vmatpush1.bf16.msra.mxu0 %v8959_v57  ;;  %6534 = vmatpush3.bf16.msra.mxu1 %v8960_v8 }
 0x4a2   :  { %6511 = vmatprep.subr.bf16.mxu0 %v8961_v53  ;;  %6535 = vmatprep.subr.bf16.mxu1 %v8887_v60  ;;  %v5041_v53 = vld [vmem:[%s8814_s0 + $0x4] ss:$8 sm:$0x7] }
 0x4a5   :  { %6513 = vmatpush1.bf16.msra.mxu0 %v8962_v50  ;;  %6537 = vmatpush3.bf16.msra.mxu1 %v8963_v31 }
 0x4a6   :  { %6539 = vmatprep.subr.bf16.mxu0 %v8964_v3  ;;  %6570 = vmatprep.subr.bf16.mxu1 %v8887_v60  ;;  %v5042_v3 = vld [vmem:[%s8814_s0 + $0x1c] ss:$8 sm:$0x7] }
 0x4a7   :  { %v2744_v13 = vrot.slane %v5042_v3, 1 }
 0x53b   :  { %v2627_v14 = vpop.f32.mrb[16].mxu0  ;;  %v2698_v22 = vpop.f32.mrb[16].mxu1 }
 0x53c   :  { %v2628_v44 = vadd.f32 %v2627_v14, %v8965_v26  ;;  %v2629_v27 = vpop.f32.mrb[17].mxu0  ;;  %v5676_v28 = vpop.f32.mrb[17].mxu1  ;;  %v2743_v14 = vrot.slane %v5041_v53, 1 }
 0x53d   :  { %v2630_v51 = vadd.f32 %v2629_v27, %v8966_v4 }
 0x53e   :  { %v2709_v50 = vrot.slane %v2628_v44, %v7689_v38 }
 0x53f   :  { %v2754_v31 = vrot.slane %v2630_v51, %v7689_v38 }
 0x540   :  { %v2710_v8 = vcombine.high %v2709_v50, %v2709_v50  ;;  %v2717_v57 = vrot.slane %v2709_v50, %v7689_v38 }
 0x541   :  { %v2755_v26 = vcombine.high %v2754_v31, %v2754_v31  ;;  %v2762_v28 = vrot.slane %v2754_v31, %v7689_v38 }
 0x542   :  { %v2724_v27 = vrot.slane %v2710_v8, %v7689_v38  ;;  %v2727_v4 = vadd.f32 %v5041_v53, %v2717_v57  ;;  %v2699_v8 = vadd.f32 %v2698_v22, %v8967_v41 }
 0x543   :  { %v2769_v12 = vrot.slane %v2755_v26, %v7689_v38  ;;  %v2772_v2 = vadd.f32 %v2762_v28, %v2743_v14 }
 0x544   :  { %v2728_v44 = vadd.f32 %v5042_v3, %v2724_v27  ;;  %v5043_v7 = vmul.f32 -1.442695, %v2727_v4  ;;  %v2793_v26 = vrot.slane %v2699_v8, %v7689_v38 }
 0x545   :  { %v2773_v20 = vadd.f32 %v2769_v12, %v2744_v13  ;;  %v5045_v51 = vmul.f32 -1.442695, %v2772_v2  ;;  %v8968_v13 = vld [vmem:[#allocation23_spill] sm:$0xff] }
 0x546   :  { %6982 = vpow2.f32 %v5043_v7  ;;  %v5044_v0 = vmul.f32 -1.442695, %v2728_v44  ;;  %v2794_v7 = vcombine.high %v2793_v26, %v2793_v26 }
 0x547   :  { %v5046_v1 = vmul.f32 -1.442695, %v2773_v20  ;;  %v2801_v20 = vrot.slane %v2793_v26, %v7689_v38 }
 0x548   :  { %6984 = vpow2.f32 %v5044_v0  ;;  %v2808_v8 = vrot.slane %v2794_v7, %v7689_v38 }
 0x549   :  { %6986 = vpow2.f32 %v5045_v51 }
 0x54a   :  { %6988 = vpow2.f32 %v5046_v1  ;;  %v2813_v1 = vrot.slane %v5041_v53, 2 }
 0x550   :  { %v6983_v50 = vpop.eup %6982 }
 0x551   :  { %v2735_v33 = vadd.f32 1.0, %v6983_v50  ;;  %v2814_v50 = vrot.slane %v5042_v3, 2  ;;  %v8359_v3 = vld [vmem:[%s8815_s1 + $0x1b] ss:$8 sm:$0x7] }
 0x552   :  { %v6985_v31 = vpop.eup %6984 }
 0x553   :  { %v2736_v57 = vadd.f32 1.0, %v6985_v31  ;;  %6990 = vrcp.f32 %v2735_v33  ;;  %v6987_v4 = vpop.eup %6986  ;;  %v8969_v33 = vld [vmem:[#allocation24_spill] sm:$0xff] }
 0x554   :  { %v6989_v14 = vpop.eup %6988  ;;  %v2780_v28 = vadd.f32 1.0, %v6987_v4  ;;  %v8352_v4 = vld [vmem:[%s8815_s1 + $0x3] ss:$8 sm:$0x7] }
 0x555   :  { %6992 = vrcp.f32 %v2736_v57  ;;  %v2781_v12 = vadd.f32 1.0, %v6989_v14 }
 0x556   :  { %6994 = vrcp.f32 %v2780_v28 }
 0x557   :  { %6996 = vrcp.f32 %v2781_v12 }
 0x55b   :  { %v2919_v0 = vpop.f32.mrb[18].mxu0  ;;  %v2990_v2 = vpop.f32.mrb[18].mxu1 }
 0x55c   :  { %v2920_v27 = vadd.f32 %v2919_v0, %v8968_v13  ;;  %v2921_v44 = vpop.f32.mrb[19].mxu0  ;;  %v5711_v51 = vpop.f32.mrb[19].mxu1 }
 0x55d   :  { %v6991_v22 = vpop.eup %6990  ;;  %v2922_v31 = vadd.f32 %v2921_v44, %v8969_v33 }
 0x55e   :  { %v2811_v57 = vmul.f32 %v6991_v22, %v2801_v20  ;;  %v3001_v26 = vrot.slane %v2920_v27, %v7689_v38  ;;  %v3035_v20 = vrot.slane %v8352_v4, 1 }
 0x55f   :  { %v6993_v53 = vpop.eup %6992  ;;  %v3046_v14 = vrot.slane %v2922_v31, %v7689_v38 }
 0x560   :  { %v2812_v0 = vmul.f32 %v6993_v53, %v2808_v8  ;;  %v2817_v51 = vadd.f32 %v2813_v1, %v2811_v57  ;;  %v3002_v7 = vcombine.high %v3001_v26, %v3001_v26  ;;  %v3009_v28 = vrot.slane %v3001_v26, %v7689_v38  ;;  %v6995_v41 = vpop.eup %6994 }
 0x561   :  { %v3047_v44 = vcombine.high %v3046_v14, %v3046_v14  ;;  %v3054_v22 = vrot.slane %v3046_v14, %v7689_v38  ;;  %v3036_v1 = vrot.slane %v8359_v3, 1 }
 0x562   :  { %v2818_v27 = vadd.f32 %v2814_v50, %v2812_v0  ;;  %6998 = vtanh.f32 %v2817_v51  ;;  %v3016_v12 = vrot.slane %v3002_v7, %v7689_v38  ;;  %v3019_v31 = vadd.f32 %v8352_v4, %v3009_v28  ;;  %v6997_v50 = vpop.eup %6996 }
 0x563   :  { %v3061_v8 = vrot.slane %v3047_v44, %v7689_v38  ;;  %v3064_v26 = vadd.f32 %v3054_v22, %v3035_v20  ;;  %v2821_v51 = vsub.f32 1.0, %v6995_v41  ;;  %v2822_v28 = vsub.f32 1.0, %v6997_v50 }
 0x564   :  { %7000 = vtanh.f32 %v2818_v27  ;;  %v3020_v57 = vadd.f32 %v8359_v3, %v3016_v12  ;;  %v5049_v53 = vmul.f32 -1.442695, %v3019_v31  ;;  %v2825_v44 = vmul.f32 %v6995_v41, %v8219_v47 }
 0x565   :  { %v3065_v13 = vadd.f32 %v3061_v8, %v3036_v1  ;;  %v5051_v14 = vmul.f32 -1.442695, %v3064_v26  ;;  %v2826_v20 = vmul.f32 %v6997_v50, %v8221_v42  ;;  %v2991_v8 = vadd.f32 %v2990_v2, %v7759_v43 }
 0x566   :  { %7002 = vpow2.f32 %v5049_v53  ;;  %v5050_v33 = vmul.f32 -1.442695, %v3020_v57 }
 0x567   :  { %v5052_v0 = vmul.f32 -1.442695, %v3065_v13  ;;  %v3085_v41 = vrot.slane %v2991_v8, %v7689_v38 }
 0x568   :  { %7004 = vpow2.f32 %v5050_v33 }
 0x569   :  { %7006 = vpow2.f32 %v5051_v14  ;;  %v3086_v2 = vcombine.high %v3085_v41, %v3085_v41  ;;  %v3093_v14 = vrot.slane %v3085_v41, %v7689_v38 }
 0x56a   :  { %7008 = vpow2.f32 %v5052_v0  ;;  %v3105_v0 = vrot.slane %v8352_v4, 2 }
 0x56c   :  { %v6999_v7 = vpop.eup %6998 }
 0x56d   :  { %v2823_v55 = vmul.f32 %v6999_v7, %v2821_v51 }
 0x56e   :  { %v7001_v27 = vpop.eup %7000 }
 0x56f   :  { %v2824_v12 = vmul.f32 %v7001_v27, %v2822_v28  ;;  %v8371_v22 = vadd.f32 %v2825_v44, %v2823_v55  ;;  %v3100_v28 = vrot.slane %v3086_v2, %v7689_v38  ;;  %v3106_v27 = vrot.slane %v8359_v3, 2 }
 0x570   :  { %v7003_v31 = vpop.eup %7002 }
 0x571   :  { %v3027_v1 = vadd.f32 1.0, %v7003_v31  ;;  %v8373_v33 = vadd.f32 %v2826_v20, %v2824_v12  ;;  %2829 = vst [vmem:[%s8816_s4 + $0x4] sm:$0x1] %v8371_v22 }
 0x572   :  { %v7005_v13 = vpop.eup %7004 }
 0x573   :  { %v3028_v47 = vadd.f32 1.0, %v7005_v13  ;;  %7010 = vrcp.f32 %v3027_v1  ;;  %2830 = vst [vmem:[%s8816_s4 + $0xc] sm:$0x1] %v8373_v33  ;;  %v3129_v42 = vcombine.low %v8371_v22, %v8373_v33  ;;  %v7007_v57 = vpop.eup %7006 }
 0x574   :  { %v7009_v26 = vpop.eup %7008  ;;  %v3072_v50 = vadd.f32 1.0, %v7007_v57 }
 0x575   :  { %7012 = vrcp.f32 %v3028_v47  ;;  %v3136_v55 = vrot.slane %v3129_v42, %v7689_v38  ;;  %v3073_v51 = vadd.f32 1.0, %v7009_v26 }
 0x576   :  { %7014 = vrcp.f32 %v3072_v50 }
 0x577   :  { %v3143_v53 = vrot.slane %v3136_v55, %v7689_v38  ;;  %7016 = vrcp.f32 %v3073_v51  ;;  %v8972_v51 = vld [vmem:[#allocation11_spill] sm:$0xff] }
 0x579   :  { %3210 = vmatmul.mubr.f32.vlgmr.msra.gmra.mrb[20].mxu0 %v3143_v53  ;;  %5745 = vmatmul.mubr.f32.vlgmr.msra.gmra.mrb[20].mxu1 %v3143_v53 }
 0x57a   :  { %6541 = vmatpush1.bf16.msra.mxu0 %v7412_v23  ;;  %6572 = vmatpush3.bf16.msra.mxu1 %v7485_v56 }
 0x57b   :  { %6543 = vmatprep.subr.bf16.mxu0 %v7415_v24  ;;  %6573 = vmatprep.subr.bf16.mxu1 %v8887_v60 }
 0x57c   :  { %3501 = vmatprep.mubr.f32.mxu0 %v8888_v59  ;;  %5779 = vmatprep.mubr.msk.f32.mxu1 %vm7144_vm0, %v8888_v59 }
 0x57d   :  { %v7011_v7 = vpop.eup %7010 }
 0x57e   :  { %v3103_v44 = vmul.f32 %v7011_v7, %v3093_v14  ;;  %6545 = vmatpush1.bf16.msra.mxu0 %v7441_v35  ;;  %6575 = vmatpush3.bf16.msra.mxu1 %v7514_v11  ;;  %v8970_v14 = vld [vmem:[#allocation4_spill] sm:$0xff]  ;;  %v8973_v7 = vld [vmem:[#allocation6_spill] sm:$0xff] }
 0x57f   :  { %v7013_v12 = vpop.eup %7012  ;;  %6547 = vmatprep.subr.bf16.mxu0 %v7445_v36  ;;  %6576 = vmatprep.subr.bf16.mxu1 %v8887_v60 }
 0x580   :  { %v3104_v4 = vmul.f32 %v7013_v12, %v3100_v28  ;;  %v3109_v20 = vadd.f32 %v3105_v0, %v3103_v44  ;;  %v7015_v3 = vpop.eup %7014  ;;  %v8971_v0 = vld [vmem:[#allocation5_spill] sm:$0xff]  ;;  %v8974_v28 = vld [vmem:[#allocation7_spill] sm:$0xff]  ;;  %v8975_v44 = vld [vmem:[#allocation14_spill] sm:$0xff] }
 0x581   :  { %v7017_v1 = vpop.eup %7016  ;;  %v3113_v13 = vsub.f32 1.0, %v7015_v3  ;;  %v3117_v55 = vmul.f32 %v7015_v3, %v8270_v54  ;;  %v8977_v12 = vld [vmem:[#allocation9_spill] sm:$0xff]  ;;  %v8981_v3 = vld [vmem:[#allocation18_spill] sm:$0xff] }
 0x582   :  { %v3110_v31 = vadd.f32 %v3106_v27, %v3104_v4  ;;  %7018 = vtanh.f32 %v3109_v20  ;;  %6549 = vmatpush1.bf16.msra.mxu0 %v7470_v48  ;;  %6578 = vmatpush3.bf16.msra.mxu1 %v7544_v30  ;;  %v3114_v47 = vsub.f32 1.0, %v7017_v1  ;;  %v3118_v53 = vmul.f32 %v7017_v1, %v8272_v32  ;;  %v8976_v27 = vld [vmem:[#allocation8_spill] sm:$0xff]  ;;  %v8978_v4 = vld [vmem:[#allocation17_spill] sm:$0xff]  ;;  %v8979_v20 = vld [vmem:[#allocation10_spill] sm:$0xff] }
 0x583   :  { %6551 = vmatprep.subr.bf16.mxu0 %v7473_v49  ;;  %6579 = vmatprep.subr.bf16.mxu1 %v8887_v60  ;;  %v8982_v1 = vld [vmem:[#allocation13_spill] sm:$0xff] }
 0x584   :  { %7020 = vtanh.f32 %v3110_v31  ;;  %v8980_v31 = vld [vmem:[#allocation12_spill] sm:$0xff] }
 0x586   :  { %6553 = vmatpush1.bf16.msra.mxu0 %v7498_v62  ;;  %6581 = vmatpush3.bf16.msra.mxu1 %v7572_v52 }
 0x587   :  { %6555 = vmatprep.subr.bf16.mxu0 %v7502_v63  ;;  %6582 = vmatprep.subr.bf16.mxu1 %v8887_v60 }
 0x58a   :  { %6557 = vmatpush1.bf16.msra.mxu0 %v7529_v18  ;;  %6584 = vmatpush3.bf16.msra.mxu1 %v7597_v6 }
 0x58b   :  { %6559 = vmatprep.subr.bf16.mxu0 %v7532_v19  ;;  %6585 = vmatprep.subr.bf16.mxu1 %v8887_v60 }
 0x58c   :  { %v7019_v8 = vpop.eup %7018 }
 0x58d   :  { %v3115_v42 = vmul.f32 %v7019_v8, %v3113_v13  ;;  %v8983_v13 = vld [vmem:[#allocation15_spill] sm:$0xff] }
 0x58e   :  { %v7021_v41 = vpop.eup %7020  ;;  %6561 = vmatpush1.bf16.msra.mxu0 %v7557_v39  ;;  %6587 = vmatpush3.bf16.msra.mxu1 %v7611_v25  ;;  %v8984_v8 = vld [vmem:[#allocation19_spill] sm:$0xff] }
 0x58f   :  { %6563 = vmatprep.subr.bf16.mxu0 %v7560_v40  ;;  %6588 = vmatprep.subr.bf16.mxu1 %v8887_v60  ;;  %v3116_v57 = vmul.f32 %v7021_v41, %v3114_v47  ;;  %v8422_v26 = vadd.f32 %v3117_v55, %v3115_v42  ;;  %v8985_v47 = vld [vmem:[#allocation16_spill] sm:$0xff] }
 0x590   :  { %v8986_v41 = vld [vmem:[#allocation20_spill] sm:$0xff] }
 0x591   :  { %v8424_v2 = vadd.f32 %v3118_v53, %v3116_v57  ;;  %3121 = vst [vmem:[%s8817_s5 + $0x3] sm:$0x1] %v8422_v26 }
 0x592   :  { %6565 = vmatpush1.bf16.msra.mxu0 %v7585_v58  ;;  %6590 = vmatpush3.bf16.msra.mxu1 %v7624_v34 }
 0x593   :  { %6567 = vmatprep.subr.bf16.mxu0 %v7588_v61  ;;  %6591 = vmatprep.subr.bf16.mxu1 %v8887_v60  ;;  %3122 = vst [vmem:[%s8817_s5 + $0xb] sm:$0x1] %v8424_v2  ;;  %v3421_v54 = vcombine.low %v8422_v26, %v8424_v2 }
 0x595   :  { %v3428_v32 = vrot.slane %v3421_v54, %v7689_v38 }
 0x596   :  { %6569 = vmatpush1.bf16.msra.mxu0 %v7607_v17  ;;  %6593 = vmatpush3.bf16.msra.mxu1 %v7638_v45 }
 0x597   :  { %v3435_v50 = vrot.slane %v3428_v32, %v7689_v38  ;;  %6595 = vmatprep.subr.bf16.mxu0 %v7189_v5  ;;  %6626 = vmatprep.subr.bf16.mxu1 %v8887_v60  ;;  %v8987_v32 = vld [vmem:[#allocation21_spill] sm:$0xff] }
 0x599   :  { %3502 = vmatmul.mubr.f32.vlgmr.msra.gmra.mrb[22].mxu0 %v3435_v50  ;;  %5780 = vmatmul.mubr.f32.vlgmr.msra.gmra.mrb[22].mxu1 %v3435_v50 }
 0x59a   :  { %6597 = vmatpush1.bf16.msra.mxu0 %v7202_v9  ;;  %6628 = vmatpush3.bf16.msra.mxu1 %v7261_v29 }
 0x59b   :  { %6599 = vmatprep.subr.bf16.mxu0 %v7204_v10  ;;  %6629 = vmatprep.subr.bf16.mxu1 %v8887_v60 }
 0x59c   :  { %3793 = vmatprep.mubr.f32.mxu0 %v8888_v59  ;;  %5814 = vmatprep.mubr.msk.f32.mxu1 %vm7144_vm0, %v8888_v59 }
 0x59e   :  { %6601 = vmatpush1.bf16.msra.mxu0 %v7220_v15  ;;  %6631 = vmatpush3.bf16.msra.mxu1 %v7285_v37 }
 0x59f   :  { %6603 = vmatprep.subr.bf16.mxu0 %v7223_v16  ;;  %6632 = vmatprep.subr.bf16.mxu1 %v8887_v60 }
 0x5a2   :  { %6605 = vmatpush1.bf16.msra.mxu0 %v7238_v21  ;;  %6634 = vmatpush3.bf16.msra.mxu1 %v7313_v46 }
 0x5a3   :  { %6607 = vmatprep.subr.bf16.mxu0 %v8970_v14  ;;  %6635 = vmatprep.subr.bf16.mxu1 %v8887_v60 }
 0x5a6   :  { %6609 = vmatpush1.bf16.msra.mxu0 %v8971_v0  ;;  %6637 = vmatpush3.bf16.msra.mxu1 %v8972_v51  ;;  %v8988_v0 = vld [vmem:[#allocation22_spill] sm:$0xff] }
 0x5a7   :  { %6611 = vmatprep.subr.bf16.mxu0 %v8973_v7  ;;  %6638 = vmatprep.subr.bf16.mxu1 %v8887_v60 }
 0x5aa   :  { %6613 = vmatpush1.bf16.msra.mxu0 %v8974_v28  ;;  %6640 = vmatpush3.bf16.msra.mxu1 %v8975_v44 }
 0x5ab   :  { %6615 = vmatprep.subr.bf16.mxu0 %v8976_v27  ;;  %6641 = vmatprep.subr.bf16.mxu1 %v8887_v60 }
 0x5ae   :  { %6617 = vmatpush1.bf16.msra.mxu0 %v8977_v12  ;;  %6643 = vmatpush3.bf16.msra.mxu1 %v8978_v4 }
 0x5af   :  { %6619 = vmatprep.subr.bf16.mxu0 %v8979_v20  ;;  %6644 = vmatprep.subr.bf16.mxu1 %v8887_v60 }
 0x5b2   :  { %6621 = vmatpush1.bf16.msra.mxu0 %v8980_v31  ;;  %6646 = vmatpush3.bf16.msra.mxu1 %v8981_v3 }
 0x5b3   :  { %6623 = vmatprep.subr.bf16.mxu0 %v8982_v1  ;;  %6647 = vmatprep.subr.bf16.mxu1 %v8887_v60  ;;  %v5053_v1 = vld [vmem:[%s8814_s0 + $0x5] ss:$8 sm:$0x7] }
 0x5b6   :  { %6625 = vmatpush1.bf16.msra.mxu0 %v8983_v13  ;;  %6649 = vmatpush3.bf16.msra.mxu1 %v8984_v8 }
 0x5b7   :  { %6651 = vmatprep.subr.bf16.mxu0 %v8985_v47  ;;  %6682 = vmatprep.subr.bf16.mxu1 %v8887_v60  ;;  %v5054_v47 = vld [vmem:[%s8814_s0 + $0x1d] ss:$8 sm:$0x7] }
 0x5b8   :  { %v3328_v20 = vrot.slane %v5054_v47, 1 }
 0x64c   :  { %v3211_v42 = vpop.f32.mrb[20].mxu0  ;;  %v3282_v55 = vpop.f32.mrb[20].mxu1 }
 0x64d   :  { %v3212_v57 = vadd.f32 %v3211_v42, %v8986_v41  ;;  %v3213_v53 = vpop.f32.mrb[21].mxu0  ;;  %v5746_v54 = vpop.f32.mrb[21].mxu1  ;;  %v3327_v42 = vrot.slane %v5053_v1, 1 }
 0x64e   :  { %v3214_v50 = vadd.f32 %v3213_v53, %v8987_v32 }
 0x64f   :  { %v3293_v13 = vrot.slane %v3212_v57, %v7689_v38 }
 0x650   :  { %v3338_v8 = vrot.slane %v3214_v50, %v7689_v38 }
 0x651   :  { %v3294_v3 = vcombine.high %v3293_v13, %v3293_v13  ;;  %v3301_v31 = vrot.slane %v3293_v13, %v7689_v38 }
 0x652   :  { %v3339_v41 = vcombine.high %v3338_v8, %v3338_v8  ;;  %v3346_v54 = vrot.slane %v3338_v8, %v7689_v38 }
 0x653   :  { %v3308_v53 = vrot.slane %v3294_v3, %v7689_v38  ;;  %v3311_v32 = vadd.f32 %v5053_v1, %v3301_v31  ;;  %v3283_v3 = vadd.f32 %v3282_v55, %v8988_v0 }
 0x654   :  { %v3353_v4 = vrot.slane %v3339_v41, %v7689_v38  ;;  %v3356_v27 = vadd.f32 %v3346_v54, %v3327_v42 }
 0x655   :  { %v3312_v57 = vadd.f32 %v5054_v47, %v3308_v53  ;;  %v5055_v12 = vmul.f32 -1.442695, %v3311_v32  ;;  %v3377_v41 = vrot.slane %v3283_v3, %v7689_v38 }
 0x656   :  { %v3357_v28 = vadd.f32 %v3353_v4, %v3328_v20  ;;  %v5057_v50 = vmul.f32 -1.442695, %v3356_v27  ;;  %v8989_v20 = vld [vmem:[#allocation23_spill] sm:$0xff] }
 0x657   :  { %7022 = vpow2.f32 %v5055_v12  ;;  %v5056_v44 = vmul.f32 -1.442695, %v3312_v57  ;;  %v3378_v12 = vcombine.high %v3377_v41, %v3377_v41 }
 0x658   :  { %v5058_v7 = vmul.f32 -1.442695, %v3357_v28  ;;  %v3385_v28 = vrot.slane %v3377_v41, %v7689_v38 }
 0x659   :  { %7024 = vpow2.f32 %v5056_v44  ;;  %v3392_v3 = vrot.slane %v3378_v12, %v7689_v38 }
 0x65a   :  { %7026 = vpow2.f32 %v5057_v50 }
 0x65b   :  { %7028 = vpow2.f32 %v5058_v7  ;;  %v3397_v7 = vrot.slane %v5053_v1, 2 }
 0x661   :  { %v7023_v13 = vpop.eup %7022 }
 0x662   :  { %v3319_v51 = vadd.f32 1.0, %v7023_v13  ;;  %v3398_v13 = vrot.slane %v5054_v47, 2  ;;  %v8511_v47 = vld [vmem:[%s8815_s1 + $0x1a] ss:$8 sm:$0x7] }
 0x663   :  { %v7025_v8 = vpop.eup %7024 }
 0x664   :  { %v3320_v31 = vadd.f32 1.0, %v7025_v8  ;;  %7030 = vrcp.f32 %v3319_v51  ;;  %v7027_v32 = vpop.eup %7026  ;;  %v8990_v51 = vld [vmem:[#allocation24_spill] sm:$0xff] }
 0x665   :  { %v7029_v42 = vpop.eup %7028  ;;  %v3364_v54 = vadd.f32 1.0, %v7027_v32  ;;  %v8504_v32 = vld [vmem:[%s8815_s1 + $0x2] ss:$8 sm:$0x7] }
 0x666   :  { %7032 = vrcp.f32 %v3320_v31  ;;  %v3365_v4 = vadd.f32 1.0, %v7029_v42 }
 0x667   :  { %7034 = vrcp.f32 %v3364_v54 }
 0x668   :  { %7036 = vrcp.f32 %v3365_v4 }
 0x66c   :  { %v3503_v44 = vpop.f32.mrb[22].mxu0  ;;  %v3574_v27 = vpop.f32.mrb[22].mxu1 }
 0x66d   :  { %v3504_v53 = vadd.f32 %v3503_v44, %v8989_v20  ;;  %v3505_v57 = vpop.f32.mrb[23].mxu0  ;;  %v5781_v50 = vpop.f32.mrb[23].mxu1 }
 0x66e   :  { %v7031_v55 = vpop.eup %7030  ;;  %v3506_v8 = vadd.f32 %v3505_v57, %v8990_v51 }
 0x66f   :  { %v3395_v31 = vmul.f32 %v7031_v55, %v3385_v28  ;;  %v3585_v41 = vrot.slane %v3504_v53, %v7689_v38  ;;  %v3619_v28 = vrot.slane %v8504_v32, 1 }
 0x670   :  { %v7033_v1 = vpop.eup %7032  ;;  %v3630_v42 = vrot.slane %v3506_v8, %v7689_v38 }
 0x671   :  { %v3396_v44 = vmul.f32 %v7033_v1, %v3392_v3  ;;  %v3401_v50 = vadd.f32 %v3397_v7, %v3395_v31  ;;  %v3586_v12 = vcombine.high %v3585_v41, %v3585_v41  ;;  %v3593_v54 = vrot.slane %v3585_v41, %v7689_v38  ;;  %v7035_v0 = vpop.eup %7034 }
 0x672   :  { %v3631_v57 = vcombine.high %v3630_v42, %v3630_v42  ;;  %v3638_v55 = vrot.slane %v3630_v42, %v7689_v38  ;;  %v3620_v7 = vrot.slane %v8511_v47, 1 }
 0x673   :  { %v3402_v53 = vadd.f32 %v3398_v13, %v3396_v44  ;;  %7038 = vtanh.f32 %v3401_v50  ;;  %v3600_v4 = vrot.slane %v3586_v12, %v7689_v38  ;;  %v3603_v8 = vadd.f32 %v8504_v32, %v3593_v54  ;;  %v7037_v13 = vpop.eup %7036 }
 0x674   :  { %v3645_v3 = vrot.slane %v3631_v57, %v7689_v38  ;;  %v3648_v41 = vadd.f32 %v3638_v55, %v3619_v28  ;;  %v3405_v50 = vsub.f32 1.0, %v7035_v0  ;;  %v3406_v54 = vsub.f32 1.0, %v7037_v13 }
 0x675   :  { %7040 = vtanh.f32 %v3402_v53  ;;  %v3604_v31 = vadd.f32 %v8511_v47, %v3600_v4  ;;  %v5061_v1 = vmul.f32 -1.442695, %v3603_v8  ;;  %v3409_v57 = vmul.f32 %v7035_v0, %v8371_v22 }
 0x676   :  { %v3649_v20 = vadd.f32 %v3645_v3, %v3620_v7  ;;  %v5063_v42 = vmul.f32 -1.442695, %v3648_v41  ;;  %v3410_v28 = vmul.f32 %v7037_v13, %v8373_v33  ;;  %v3575_v3 = vadd.f32 %v3574_v27, %v7759_v43 }
 0x677   :  { %7042 = vpow2.f32 %v5061_v1  ;;  %v5062_v51 = vmul.f32 -1.442695, %v3604_v31 }
 0x678   :  { %v5064_v44 = vmul.f32 -1.442695, %v3649_v20  ;;  %v3669_v0 = vrot.slane %v3575_v3, %v7689_v38 }
 0x679   :  { %7044 = vpow2.f32 %v5062_v51 }
 0x67a   :  { %7046 = vpow2.f32 %v5063_v42  ;;  %v3670_v27 = vcombine.high %v3669_v0, %v3669_v0  ;;  %v3677_v42 = vrot.slane %v3669_v0, %v7689_v38 }
 0x67b   :  { %7048 = vpow2.f32 %v5064_v44  ;;  %v3689_v44 = vrot.slane %v8504_v32, 2 }
 0x67d   :  { %v7039_v12 = vpop.eup %7038 }
 0x67e   :  { %v3407_v14 = vmul.f32 %v7039_v12, %v3405_v50 }
 0x67f   :  { %v7041_v53 = vpop.eup %7040 }
 0x680   :  { %v3408_v4 = vmul.f32 %v7041_v53, %v3406_v54  ;;  %v8523_v55 = vadd.f32 %v3409_v57, %v3407_v14  ;;  %v3684_v54 = vrot.slane %v3670_v27, %v7689_v38  ;;  %v3690_v53 = vrot.slane %v8511_v47, 2 }
 0x681   :  { %v7043_v8 = vpop.eup %7042 }
 0x682   :  { %v3611_v7 = vadd.f32 1.0, %v7043_v8  ;;  %v8525_v51 = vadd.f32 %v3410_v28, %v3408_v4  ;;  %3413 = vst [vmem:[%s8816_s4 + $0x5] sm:$0x1] %v8523_v55 }
 0x683   :  { %v7045_v20 = vpop.eup %7044 }
 0x684   :  { %v3612_v22 = vadd.f32 1.0, %v7045_v20  ;;  %7050 = vrcp.f32 %v3611_v7  ;;  %3414 = vst [vmem:[%s8816_s4 + $0xd] sm:$0x1] %v8525_v51  ;;  %v3713_v33 = vcombine.low %v8523_v55, %v8525_v51  ;;  %v7047_v31 = vpop.eup %7046 }
 0x685   :  { %v7049_v41 = vpop.eup %7048  ;;  %v3656_v13 = vadd.f32 1.0, %v7047_v31 }
 0x686   :  { %7052 = vrcp.f32 %v3612_v22  ;;  %v3720_v14 = vrot.slane %v3713_v33, %v7689_v38  ;;  %v3657_v50 = vadd.f32 1.0, %v7049_v41 }
 0x687   :  { %7054 = vrcp.f32 %v3656_v13 }
 0x688   :  { %v3727_v1 = vrot.slane %v3720_v14, %v7689_v38  ;;  %7056 = vrcp.f32 %v3657_v50  ;;  %v9002_v50 = vld [vmem:[#allocation18_spill] sm:$0xff] }
 0x68a   :  { %3794 = vmatmul.mubr.f32.vlgmr.msra.gmra.mrb[24].mxu0 %v3727_v1  ;;  %5815 = vmatmul.mubr.f32.vlgmr.msra.gmra.mrb[24].mxu1 %v3727_v1 }
 0x68b   :  { %6653 = vmatpush1.bf16.msra.mxu0 %v7412_v23  ;;  %6684 = vmatpush3.bf16.msra.mxu1 %v7485_v56 }
 0x68c   :  { %6655 = vmatprep.subr.bf16.mxu0 %v7415_v24  ;;  %6685 = vmatprep.subr.bf16.mxu1 %v8887_v60 }
 0x68d   :  { %4085 = vmatprep.mubr.f32.mxu0 %v8888_v59  ;;  %5849 = vmatprep.mubr.msk.f32.mxu1 %vm7144_vm0, %v8888_v59 }
 0x68e   :  { %v7051_v12 = vpop.eup %7050 }
 0x68f   :  { %v3687_v57 = vmul.f32 %v7051_v12, %v3677_v42  ;;  %6657 = vmatpush1.bf16.msra.mxu0 %v7441_v35  ;;  %6687 = vmatpush3.bf16.msra.mxu1 %v7514_v11  ;;  %v9000_v42 = vld [vmem:[#allocation10_spill] sm:$0xff]  ;;  %v9003_v12 = vld [vmem:[#allocation13_spill] sm:$0xff] }
 0x690   :  { %v7053_v4 = vpop.eup %7052  ;;  %6659 = vmatprep.subr.bf16.mxu0 %v7445_v36  ;;  %6688 = vmatprep.subr.bf16.mxu1 %v8887_v60 }
 0x691   :  { %v3688_v32 = vmul.f32 %v7053_v4, %v3684_v54  ;;  %v3693_v28 = vadd.f32 %v3689_v44, %v3687_v57  ;;  %v7055_v47 = vpop.eup %7054  ;;  %v9001_v44 = vld [vmem:[#allocation12_spill] sm:$0xff]  ;;  %v9004_v54 = vld [vmem:[#allocation15_spill] sm:$0xff] }
 0x692   :  { %v7057_v7 = vpop.eup %7056  ;;  %v3697_v20 = vsub.f32 1.0, %v7055_v47  ;;  %v3701_v14 = vmul.f32 %v7055_v47, %v8422_v26  ;;  %v9005_v57 = vld [vmem:[#allocation19_spill] sm:$0xff] }
 0x693   :  { %v3694_v8 = vadd.f32 %v3690_v53, %v3688_v32  ;;  %7058 = vtanh.f32 %v3693_v28  ;;  %6661 = vmatpush1.bf16.msra.mxu0 %v7470_v48  ;;  %6690 = vmatpush3.bf16.msra.mxu1 %v7544_v30  ;;  %v3698_v22 = vsub.f32 1.0, %v7057_v7  ;;  %v3702_v1 = vmul.f32 %v7057_v7, %v8424_v2  ;;  %v9006_v53 = vld [vmem:[#allocation16_spill] sm:$0xff] }
 0x694   :  { %6663 = vmatprep.subr.bf16.mxu0 %v7473_v49  ;;  %6691 = vmatprep.subr.bf16.mxu1 %v8887_v60  ;;  %v9007_v28 = vld [vmem:[#allocation20_spill] sm:$0xff] }
 0x695   :  { %7060 = vtanh.f32 %v3694_v8 }
 0x697   :  { %6665 = vmatpush1.bf16.msra.mxu0 %v7498_v62  ;;  %6693 = vmatpush3.bf16.msra.mxu1 %v7572_v52 }
 0x698   :  { %6667 = vmatprep.subr.bf16.mxu0 %v7502_v63  ;;  %6694 = vmatprep.subr.bf16.mxu1 %v8887_v60 }
 0x69b   :  { %6669 = vmatpush1.bf16.msra.mxu0 %v7529_v18  ;;  %6696 = vmatpush3.bf16.msra.mxu1 %v7597_v6 }
 0x69c   :  { %6671 = vmatprep.subr.bf16.mxu0 %v7532_v19  ;;  %6697 = vmatprep.subr.bf16.mxu1 %v8887_v60 }
 0x69d   :  { %v7059_v3 = vpop.eup %7058 }
 0x69e   :  { %v3699_v33 = vmul.f32 %v7059_v3, %v3697_v20  ;;  %v9008_v20 = vld [vmem:[#allocation21_spill] sm:$0xff] }
 0x69f   :  { %v7061_v0 = vpop.eup %7060  ;;  %6673 = vmatpush1.bf16.msra.mxu0 %v7557_v39  ;;  %6699 = vmatpush3.bf16.msra.mxu1 %v7611_v25 }
 0x6a0   :  { %6675 = vmatprep.subr.bf16.mxu0 %v7560_v40  ;;  %6700 = vmatprep.subr.bf16.mxu1 %v8887_v60  ;;  %v3700_v31 = vmul.f32 %v7061_v0, %v3698_v22  ;;  %v8574_v41 = vadd.f32 %v3701_v14, %v3699_v33  ;;  %v5065_v22 = vld [vmem:[%s8814_s0 + $0x6] ss:$8 sm:$0x7] }
 0x6a1   :  { %v5066_v14 = vld [vmem:[%s8814_s0 + $0x1e] ss:$8 sm:$0x7] }
 0x6a2   :  { %v8576_v27 = vadd.f32 %v3702_v1, %v3700_v31  ;;  %3705 = vst [vmem:[%s8817_s5 + $0x2] sm:$0x1] %v8574_v41 }
 0x6a3   :  { %6677 = vmatpush1.bf16.msra.mxu0 %v7585_v58  ;;  %6702 = vmatpush3.bf16.msra.mxu1 %v7624_v34 }
 0x6a4   :  { %6679 = vmatprep.subr.bf16.mxu0 %v7588_v61  ;;  %6703 = vmatprep.subr.bf16.mxu1 %v8887_v60  ;;  %3706 = vst [vmem:[%s8817_s5 + $0xa] sm:$0x1] %v8576_v27  ;;  %v4005_v26 = vcombine.low %v8574_v41, %v8576_v27 }
 0x6a6   :  { %v4012_v2 = vrot.slane %v4005_v26, %v7689_v38  ;;  %v3911_v26 = vrot.slane %v5065_v22, 1 }
 0x6a7   :  { %6681 = vmatpush1.bf16.msra.mxu0 %v7607_v17  ;;  %6705 = vmatpush3.bf16.msra.mxu1 %v7638_v45 }
 0x6a8   :  { %v4019_v13 = vrot.slane %v4012_v2, %v7689_v38  ;;  %6707 = vmatprep.subr.bf16.mxu0 %v7189_v5  ;;  %6738 = vmatprep.subr.bf16.mxu1 %v8887_v60  ;;  %v8991_v5 = vld [vmem:[#allocation4_spill] sm:$0xff] }
 0x6aa   :  { %4086 = vmatmul.mubr.f32.vlgmr.msra.gmra.mrb[26].mxu0 %v4019_v13  ;;  %5850 = vmatmul.mubr.f32.vlgmr.msra.gmra.mrb[26].mxu1 %v4019_v13 }
 0x6ab   :  { %6709 = vmatpush1.bf16.msra.mxu0 %v7202_v9  ;;  %6740 = vmatpush3.bf16.msra.mxu1 %v7261_v29  ;;  %v8992_v9 = vld [vmem:[#allocation5_spill] sm:$0xff]  ;;  %v8994_v29 = vld [vmem:[#allocation6_spill] sm:$0xff] }
 0x6ac   :  { %6711 = vmatprep.subr.bf16.mxu0 %v7204_v10  ;;  %6741 = vmatprep.subr.bf16.mxu1 %v8887_v60  ;;  %v8993_v10 = vld [vmem:[#allocation11_spill] sm:$0xff] }
 0x6ad   :  { %4377 = vmatprep.mubr.f32.mxu0 %v8888_v59  ;;  %5884 = vmatprep.mubr.msk.f32.mxu1 %vm7144_vm0, %v8888_v59 }
 0x6af   :  { %6713 = vmatpush1.bf16.msra.mxu0 %v7220_v15  ;;  %6743 = vmatpush3.bf16.msra.mxu1 %v7285_v37  ;;  %v8995_v15 = vld [vmem:[#allocation7_spill] sm:$0xff]  ;;  %v8997_v37 = vld [vmem:[#allocation8_spill] sm:$0xff] }
 0x6b0   :  { %6715 = vmatprep.subr.bf16.mxu0 %v7223_v16  ;;  %6744 = vmatprep.subr.bf16.mxu1 %v8887_v60  ;;  %v8996_v16 = vld [vmem:[#allocation14_spill] sm:$0xff] }
 0x6b3   :  { %6717 = vmatpush1.bf16.msra.mxu0 %v7238_v21  ;;  %6746 = vmatpush3.bf16.msra.mxu1 %v7313_v46  ;;  %v8998_v21 = vld [vmem:[#allocation9_spill] sm:$0xff] }
 0x6b4   :  { %6719 = vmatprep.subr.bf16.mxu0 %v8991_v5  ;;  %6747 = vmatprep.subr.bf16.mxu1 %v8887_v60  ;;  %v8999_v46 = vld [vmem:[#allocation17_spill] sm:$0xff] }
 0x6b7   :  { %6721 = vmatpush1.bf16.msra.mxu0 %v8992_v9  ;;  %6749 = vmatpush3.bf16.msra.mxu1 %v8993_v10  ;;  %v3912_v10 = vrot.slane %v5066_v14, 1 }
 0x6b8   :  { %6723 = vmatprep.subr.bf16.mxu0 %v8994_v29  ;;  %6750 = vmatprep.subr.bf16.mxu1 %v8887_v60 }
 0x6bb   :  { %6725 = vmatpush1.bf16.msra.mxu0 %v8995_v15  ;;  %6752 = vmatpush3.bf16.msra.mxu1 %v8996_v16 }
 0x6bc   :  { %6727 = vmatprep.subr.bf16.mxu0 %v8997_v37  ;;  %6753 = vmatprep.subr.bf16.mxu1 %v8887_v60 }
 0x6bf   :  { %6729 = vmatpush1.bf16.msra.mxu0 %v8998_v21  ;;  %6755 = vmatpush3.bf16.msra.mxu1 %v8999_v46 }
 0x6c0   :  { %6731 = vmatprep.subr.bf16.mxu0 %v9000_v42  ;;  %6756 = vmatprep.subr.bf16.mxu1 %v8887_v60 }
 0x6c3   :  { %6733 = vmatpush1.bf16.msra.mxu0 %v9001_v44  ;;  %6758 = vmatpush3.bf16.msra.mxu1 %v9002_v50 }
 0x6c4   :  { %6735 = vmatprep.subr.bf16.mxu0 %v9003_v12  ;;  %6759 = vmatprep.subr.bf16.mxu1 %v8887_v60 }
 0x6c7   :  { %6737 = vmatpush1.bf16.msra.mxu0 %v9004_v54  ;;  %6761 = vmatpush3.bf16.msra.mxu1 %v9005_v57  ;;  %v9009_v57 = vld [vmem:[#allocation22_spill] sm:$0xff] }
 0x6c8   :  { %6763 = vmatprep.subr.bf16.mxu0 %v9006_v53  ;;  %6794 = vmatprep.subr.bf16.mxu1 %v8887_v60 }
 0x75d   :  { %v3795_v4 = vpop.f32.mrb[24].mxu0  ;;  %v3866_v32 = vpop.f32.mrb[24].mxu1 }
 0x75e   :  { %v3796_v8 = vadd.f32 %v3795_v4, %v9007_v28  ;;  %v3797_v47 = vpop.f32.mrb[25].mxu0  ;;  %v5816_v7 = vpop.f32.mrb[25].mxu1  ;;  %v3867_v53 = vadd.f32 %v3866_v32, %v9009_v57 }
 0x75f   :  { %v3798_v3 = vadd.f32 %v3797_v47, %v9008_v20 }
 0x760   :  { %v3877_v33 = vrot.slane %v3796_v8, %v7689_v38  ;;  %v3961_v8 = vrot.slane %v3867_v53, %v7689_v38 }
 0x761   :  { %v3922_v0 = vrot.slane %v3798_v3, %v7689_v38 }
 0x762   :  { %v3878_v31 = vcombine.high %v3877_v33, %v3877_v33  ;;  %v3885_v1 = vrot.slane %v3877_v33, %v7689_v38  ;;  %v3962_v3 = vcombine.high %v3961_v8, %v3961_v8 }
 0x763   :  { %v3923_v2 = vcombine.high %v3922_v0, %v3922_v0  ;;  %v3930_v13 = vrot.slane %v3922_v0, %v7689_v38 }
 0x764   :  { %v3892_v5 = vrot.slane %v3878_v31, %v7689_v38  ;;  %v3895_v9 = vadd.f32 %v5065_v22, %v3885_v1 }
 0x765   :  { %v3937_v29 = vrot.slane %v3923_v2, %v7689_v38  ;;  %v3940_v37 = vadd.f32 %v3930_v13, %v3911_v26  ;;  %v3969_v26 = vrot.slane %v3961_v8, %v7689_v38  ;;  %v3981_v2 = vrot.slane %v5065_v22, 2  ;;  %v9010_v13 = vld [vmem:[#allocation23_spill] sm:$0xff] }
 0x766   :  { %v3896_v15 = vadd.f32 %v5066_v14, %v3892_v5  ;;  %v5067_v16 = vmul.f32 -1.442695, %v3895_v9 }
 0x767   :  { %v3941_v46 = vadd.f32 %v3937_v29, %v3912_v10  ;;  %v5069_v42 = vmul.f32 -1.442695, %v3940_v37  ;;  %v3982_v29 = vrot.slane %v5066_v14, 2  ;;  %v3976_v37 = vrot.slane %v3962_v3, %v7689_v38  ;;  %v8663_v14 = vld [vmem:[%s8815_s1 + $0x19] ss:$8 sm:$0x7] }
 0x768   :  { %7062 = vpow2.f32 %v5067_v16  ;;  %v5068_v21 = vmul.f32 -1.442695, %v3896_v15  ;;  %v9011_v15 = vld [vmem:[#allocation24_spill] sm:$0xff] }
 0x769   :  { %v5070_v44 = vmul.f32 -1.442695, %v3941_v46  ;;  %v8656_v46 = vld [vmem:[%s8815_s1 + $0x1] ss:$8 sm:$0x7] }
 0x76a   :  { %7064 = vpow2.f32 %v5068_v21 }
 0x76b   :  { %7066 = vpow2.f32 %v5069_v42 }
 0x76c   :  { %7068 = vpow2.f32 %v5070_v44 }
 0x772   :  { %v7063_v50 = vpop.eup %7062 }
 0x773   :  { %v3903_v12 = vadd.f32 1.0, %v7063_v50 }
 0x774   :  { %v7065_v54 = vpop.eup %7064 }
 0x775   :  { %v3904_v4 = vadd.f32 1.0, %v7065_v54  ;;  %7070 = vrcp.f32 %v3903_v12  ;;  %v7067_v47 = vpop.eup %7066 }
 0x776   :  { %v7069_v7 = vpop.eup %7068  ;;  %v3948_v33 = vadd.f32 1.0, %v7067_v47 }
 0x777   :  { %7072 = vrcp.f32 %v3904_v4  ;;  %v3949_v0 = vadd.f32 1.0, %v7069_v7  ;;  %v4203_v4 = vrot.slane %v8656_v46, 1 }
 0x778   :  { %7074 = vrcp.f32 %v3948_v33 }
 0x779   :  { %7076 = vrcp.f32 %v3949_v0  ;;  %v4204_v0 = vrot.slane %v8663_v14, 1 }
 0x77d   :  { %v4087_v31 = vpop.f32.mrb[26].mxu0  ;;  %v4158_v1 = vpop.f32.mrb[26].mxu1 }
 0x77e   :  { %v4088_v5 = vadd.f32 %v4087_v31, %v9010_v13  ;;  %v4089_v9 = vpop.f32.mrb[27].mxu0  ;;  %v5851_v10 = vpop.f32.mrb[27].mxu1 }
 0x77f   :  { %v7071_v32 = vpop.eup %7070  ;;  %v4090_v16 = vadd.f32 %v4089_v9, %v9011_v15 }
 0x780   :  { %v3979_v21 = vmul.f32 %v7071_v32, %v3969_v26  ;;  %v4169_v42 = vrot.slane %v4088_v5, %v7689_v38 }
 0x781   :  { %v7073_v22 = vpop.eup %7072  ;;  %v4214_v44 = vrot.slane %v4090_v16, %v7689_v38 }
 0x782   :  { %v3980_v50 = vmul.f32 %v7073_v22, %v3976_v37  ;;  %v3985_v12 = vadd.f32 %v3981_v2, %v3979_v21  ;;  %v4170_v54 = vcombine.high %v4169_v42, %v4169_v42  ;;  %v4177_v53 = vrot.slane %v4169_v42, %v7689_v38  ;;  %v7075_v32 = vpop.eup %7074 }
 0x783   :  { %v4215_v8 = vcombine.high %v4214_v44, %v4214_v44  ;;  %v4222_v47 = vrot.slane %v4214_v44, %v7689_v38  ;;  %v3989_v21 = vsub.f32 1.0, %v7075_v32 }
 0x784   :  { %v3986_v7 = vadd.f32 %v3982_v29, %v3980_v50  ;;  %7078 = vtanh.f32 %v3985_v12  ;;  %v4184_v3 = vrot.slane %v4170_v54, %v7689_v38  ;;  %v4187_v33 = vadd.f32 %v8656_v46, %v4177_v53  ;;  %v7077_v29 = vpop.eup %7076 }
 0x785   :  { %v4229_v31 = vrot.slane %v4215_v8, %v7689_v38  ;;  %v4232_v5 = vadd.f32 %v4222_v47, %v4203_v4  ;;  %v3990_v22 = vsub.f32 1.0, %v7077_v29  ;;  %v3993_v50 = vmul.f32 %v7075_v32, %v8523_v55 }
 0x786   :  { %7080 = vtanh.f32 %v3986_v7  ;;  %v4188_v26 = vadd.f32 %v8663_v14, %v4184_v3  ;;  %v5073_v2 = vmul.f32 -1.442695, %v4187_v33  ;;  %v3994_v53 = vmul.f32 %v7077_v29, %v8525_v51 }
 0x787   :  { %v4233_v10 = vadd.f32 %v4229_v31, %v4204_v0  ;;  %v5075_v16 = vmul.f32 -1.442695, %v4232_v5  ;;  %v4159_v33 = vadd.f32 %v4158_v1, %v7759_v43  ;;  %v4273_v32 = vrot.slane %v8656_v46, 2 }
 0x788   :  { %7082 = vpow2.f32 %v5073_v2  ;;  %v5074_v9 = vmul.f32 -1.442695, %v4188_v26 }
 0x789   :  { %v5076_v37 = vmul.f32 -1.442695, %v4233_v10  ;;  %v4253_v31 = vrot.slane %v4159_v33, %v7689_v38 }
 0x78a   :  { %7084 = vpow2.f32 %v5074_v9 }
 0x78b   :  { %7086 = vpow2.f32 %v5075_v16  ;;  %v4254_v1 = vcombine.high %v4253_v31, %v4253_v31  ;;  %v4261_v10 = vrot.slane %v4253_v31, %v7689_v38 }
 0x78c   :  { %7088 = vpow2.f32 %v5076_v37 }
 0x78d   :  { %v4268_v37 = vrot.slane %v4254_v1, %v7689_v38 }
 0x78e   :  { %v7079_v42 = vpop.eup %7078 }
 0x78f   :  { %v3991_v44 = vmul.f32 %v7079_v42, %v3989_v21 }
 0x790   :  { %v7081_v12 = vpop.eup %7080 }
 0x791   :  { %v3992_v54 = vmul.f32 %v7081_v12, %v3990_v22  ;;  %v8675_v4 = vadd.f32 %v3993_v50, %v3991_v44 }
 0x792   :  { %v7083_v8 = vpop.eup %7082 }
 0x793   :  { %v4195_v47 = vadd.f32 1.0, %v7083_v8  ;;  %v8677_v7 = vadd.f32 %v3994_v53, %v3992_v54  ;;  %3997 = vst [vmem:[%s8816_s4 + $0x6] sm:$0x1] %v8675_v4 }
 0x794   :  { %v7085_v3 = vpop.eup %7084 }
 0x795   :  { %v4196_v55 = vadd.f32 1.0, %v7085_v3  ;;  %7090 = vrcp.f32 %v4195_v47  ;;  %3998 = vst [vmem:[%s8816_s4 + $0xe] sm:$0x1] %v8677_v7  ;;  %v4297_v51 = vcombine.low %v8675_v4, %v8677_v7  ;;  %v7087_v26 = vpop.eup %7086 }
 0x796   :  { %v7089_v5 = vpop.eup %7088  ;;  %v4240_v9 = vadd.f32 1.0, %v7087_v26 }
 0x797   :  { %7092 = vrcp.f32 %v4196_v55  ;;  %v4304_v0 = vrot.slane %v4297_v51, %v7689_v38  ;;  %v4241_v29 = vadd.f32 1.0, %v7089_v5 }
 0x798   :  { %7094 = vrcp.f32 %v4240_v9 }
 0x799   :  { %v4311_v2 = vrot.slane %v4304_v0, %v7689_v38  ;;  %7096 = vrcp.f32 %v4241_v29 }
 0x79b   :  { %4378 = vmatmul.mubr.f32.vlgmr.msra.gmra.mrb[28].mxu0 %v4311_v2  ;;  %5885 = vmatmul.mubr.f32.vlgmr.msra.gmra.mrb[28].mxu1 %v4311_v2 }
 0x79c   :  { %6765 = vmatpush1.bf16.msra.mxu0 %v7412_v23  ;;  %6796 = vmatpush3.bf16.msra.mxu1 %v7485_v56  ;;  %v4274_v56 = vrot.slane %v8663_v14, 2  ;;  %v5077_v14 = vld [vmem:[%s8814_s0 + $0x7] ss:$8 sm:$0x7] }
 0x79d   :  { %6767 = vmatprep.subr.bf16.mxu0 %v7415_v24  ;;  %6797 = vmatprep.subr.bf16.mxu1 %v8887_v60 }
 0x79e   :  { %4668 = vmatprep.mubr.f32.mxu0 %v8888_v59  ;;  %5919 = vmatprep.mubr.msk.f32.mxu1 %vm7144_vm0, %v8888_v59 }
 0x79f   :  { %v7091_v16 = vpop.eup %7090 }
 0x7a0   :  { %v4271_v23 = vmul.f32 %v7091_v16, %v4261_v10  ;;  %6769 = vmatpush1.bf16.msra.mxu0 %v7441_v35  ;;  %6799 = vmatpush3.bf16.msra.mxu1 %v7514_v11 }
 0x7a1   :  { %v7093_v24 = vpop.eup %7092  ;;  %6771 = vmatprep.subr.bf16.mxu0 %v7445_v36  ;;  %6800 = vmatprep.subr.bf16.mxu1 %v8887_v60 }
 0x7a2   :  { %v4272_v46 = vmul.f32 %v7093_v24, %v4268_v37  ;;  %v4277_v21 = vadd.f32 %v4273_v32, %v4271_v23  ;;  %v7095_v35 = vpop.eup %7094 }
 0x7a3   :  { %v7097_v36 = vpop.eup %7096 }
 0x7a4   :  { %v4278_v59 = vadd.f32 %v4274_v56, %v4272_v46  ;;  %7098 = vtanh.f32 %v4277_v21  ;;  %6773 = vmatpush1.bf16.msra.mxu0 %v7470_v48  ;;  %6802 = vmatpush3.bf16.msra.mxu1 %v7544_v30  ;;  %v4281_v48 = vsub.f32 1.0, %v7095_v35  ;;  %v4282_v11 = vsub.f32 1.0, %v7097_v36 }
 0x7a5   :  { %6775 = vmatprep.subr.bf16.mxu0 %v7473_v49  ;;  %6803 = vmatprep.subr.bf16.mxu1 %v8887_v60  ;;  %v4285_v30 = vmul.f32 %v7095_v35, %v8574_v41  ;;  %v4565_v21 = vrot.slane %v5077_v14, 2 }
 0x7a6   :  { %7100 = vtanh.f32 %v4278_v59 }
 0x7a8   :  { %6777 = vmatpush1.bf16.msra.mxu0 %v7498_v62  ;;  %6805 = vmatpush3.bf16.msra.mxu1 %v7572_v52 }
 0x7a9   :  { %6779 = vmatprep.subr.bf16.mxu0 %v7502_v63  ;;  %6806 = vmatprep.subr.bf16.mxu1 %v8887_v60 }
 0x7ac   :  { %6781 = vmatpush1.bf16.msra.mxu0 %v7529_v18  ;;  %6808 = vmatpush3.bf16.msra.mxu1 %v7597_v6  ;;  %v4286_v18 = vmul.f32 %v7097_v36, %v8576_v27 }
 0x7ad   :  { %6783 = vmatprep.subr.bf16.mxu0 %v7532_v19  ;;  %6809 = vmatprep.subr.bf16.mxu1 %v8887_v60 }
 0x7ae   :  { %v7099_v49 = vpop.eup %7098 }
 0x7af   :  { %v4283_v62 = vmul.f32 %v7099_v49, %v4281_v48 }
 0x7b0   :  { %v7101_v52 = vpop.eup %7100  ;;  %6785 = vmatpush1.bf16.msra.mxu0 %v7557_v39  ;;  %6811 = vmatpush3.bf16.msra.mxu1 %v7611_v25 }
 0x7b1   :  { %6787 = vmatprep.subr.bf16.mxu0 %v7560_v40  ;;  %6812 = vmatprep.subr.bf16.mxu1 %v8887_v60  ;;  %v4284_v63 = vmul.f32 %v7101_v52, %v4282_v11  ;;  %v8726_v19 = vadd.f32 %v4285_v30, %v4283_v62  ;;  %v8771_v30 = vld [vmem:[%s8815_s1] ss:$8 sm:$0x7] }
 0x7b3   :  { %v8728_v6 = vadd.f32 %v4286_v18, %v4284_v63  ;;  %4289 = vst [vmem:[%s8817_s5 + $0x1] sm:$0x1] %v8726_v19 }
 0x7b4   :  { %6789 = vmatpush1.bf16.msra.mxu0 %v7585_v58  ;;  %6814 = vmatpush3.bf16.msra.mxu1 %v7624_v34 }
 0x7b5   :  { %6791 = vmatprep.subr.bf16.mxu0 %v7588_v61  ;;  %6815 = vmatprep.subr.bf16.mxu1 %v8887_v60  ;;  %4290 = vst [vmem:[%s8817_s5 + $0x9] sm:$0x1] %v8728_v6  ;;  %v4588_v39 = vcombine.low %v8726_v19, %v8728_v6 }
 0x7b7   :  { %v4595_v40 = vrot.slane %v4588_v39, %v7689_v38 }
 0x7b8   :  { %6793 = vmatpush1.bf16.msra.mxu0 %v7607_v17  ;;  %6817 = vmatpush3.bf16.msra.mxu1 %v7638_v45  ;;  %v5078_v45 = vld [vmem:[%s8814_s0 + $0x1f] ss:$8 sm:$0x7] }
 0x7b9   :  { %v4602_v58 = vrot.slane %v4595_v40, %v7689_v38  ;;  %v4496_v53 = vrot.slane %v5078_v45, 1  ;;  %v4566_v48 = vrot.slane %v5078_v45, 2 }
 0x7bb   :  { %4669 = vmatmul.mubr.f32.vlgmr.msra.gmra.mrb[30].mxu0 %v4602_v58  ;;  %5920 = vmatmul.mubr.f32.vlgmr.msra.gmra.mrb[30].mxu1 %v4602_v58 }
 0x86e   :  { %v4379_v61 = vpop.f32.mrb[28].mxu0  ;;  %v4450_v25 = vpop.f32.mrb[28].mxu1 }
 0x86f   :  { %v4380_v34 = vadd.f32 %v4379_v61, %v9007_v28  ;;  %v4381_v60 = vpop.f32.mrb[29].mxu0  ;;  %v5886_v41 = vpop.f32.mrb[29].mxu1  ;;  %v4495_v28 = vrot.slane %v5077_v14, 1  ;;  %v4451_v1 = vadd.f32 %v4450_v25, %v9009_v57  ;;  %v4786_v61 = vrot.slane %v8771_v30, 1 }
 0x870   :  { %v4382_v27 = vadd.f32 %v4381_v60, %v9008_v20 }
 0x871   :  { %v4461_v17 = vrot.slane %v4380_v34, %v7689_v38  ;;  %v4545_v10 = vrot.slane %v4451_v1, %v7689_v38 }
 0x872   :  { %v4506_v42 = vrot.slane %v4382_v27, %v7689_v38 }
 0x873   :  { %v4462_v22 = vcombine.high %v4461_v17, %v4461_v17  ;;  %v4469_v44 = vrot.slane %v4461_v17, %v7689_v38  ;;  %v4546_v16 = vcombine.high %v4545_v10, %v4545_v10  ;;  %v4553_v46 = vrot.slane %v4545_v10, %v7689_v38 }
 0x874   :  { %v4507_v50 = vcombine.high %v4506_v42, %v4506_v42  ;;  %v4514_v12 = vrot.slane %v4506_v42, %v7689_v38 }
 0x875   :  { %v4476_v20 = vrot.slane %v4462_v22, %v7689_v38  ;;  %v4479_v54 = vadd.f32 %v5077_v14, %v4469_v44  ;;  %v4560_v11 = vrot.slane %v4546_v16, %v7689_v38 }
 0x876   :  { %v4521_v8 = vrot.slane %v4507_v50, %v7689_v38  ;;  %v4524_v33 = vadd.f32 %v4514_v12, %v4495_v28 }
 0x877   :  { %v4480_v47 = vadd.f32 %v5078_v45, %v4476_v20  ;;  %v5079_v3 = vmul.f32 -1.442695, %v4479_v54 }
 0x878   :  { %v4525_v51 = vadd.f32 %v4521_v8, %v4496_v53  ;;  %v5081_v0 = vmul.f32 -1.442695, %v4524_v33 }
 0x879   :  { %7102 = vpow2.f32 %v5079_v3  ;;  %v5080_v55 = vmul.f32 -1.442695, %v4480_v47 }
 0x87a   :  { %v5082_v31 = vmul.f32 -1.442695, %v4525_v51 }
 0x87b   :  { %7104 = vpow2.f32 %v5080_v55 }
 0x87c   :  { %7106 = vpow2.f32 %v5081_v0 }
 0x87d   :  { %7108 = vpow2.f32 %v5082_v31 }
 0x883   :  { %v7103_v26 = vpop.eup %7102 }
 0x884   :  { %v4487_v2 = vadd.f32 1.0, %v7103_v26 }
 0x885   :  { %v7105_v5 = vpop.eup %7104 }
 0x886   :  { %v4488_v9 = vadd.f32 1.0, %v7105_v5  ;;  %7110 = vrcp.f32 %v4487_v2  ;;  %v7107_v32 = vpop.eup %7106 }
 0x887   :  { %v7109_v29 = vpop.eup %7108  ;;  %v4532_v37 = vadd.f32 1.0, %v7107_v32 }
 0x888   :  { %7112 = vrcp.f32 %v4488_v9  ;;  %v4533_v23 = vadd.f32 1.0, %v7109_v29 }
 0x889   :  { %7114 = vrcp.f32 %v4532_v37 }
 0x88a   :  { %7116 = vrcp.f32 %v4533_v23 }
 0x88e   :  { %v4670_v56 = vpop.f32.mrb[30].mxu0  ;;  %v4741_v24 = vpop.f32.mrb[30].mxu1 }
 0x88f   :  { %v4671_v59 = vadd.f32 %v4670_v56, %v9010_v13  ;;  %v4672_v35 = vpop.f32.mrb[31].mxu0  ;;  %v5921_v36 = vpop.f32.mrb[31].mxu1  ;;  %v4742_v9 = vadd.f32 %v4741_v24, %v7759_v43  ;;  %v4856_v43 = vrot.slane %v8771_v30, 2 }
 0x890   :  { %v7111_v57 = vpop.eup %7110  ;;  %v4673_v49 = vadd.f32 %v4672_v35, %v9011_v15  ;;  %v8778_v15 = vld [vmem:[%s8815_s1 + $0x18] ss:$8 sm:$0x7] }
 0x891   :  { %v4563_v62 = vmul.f32 %v7111_v57, %v4553_v46  ;;  %v4752_v52 = vrot.slane %v4671_v59, %v7689_v38  ;;  %v4787_v41 = vrot.slane %v8778_v15, 1  ;;  %v4836_v32 = vrot.slane %v4742_v9, %v7689_v38 }
 0x892   :  { %v7113_v63 = vpop.eup %7112  ;;  %v4797_v13 = vrot.slane %v4673_v49, %v7689_v38  ;;  %v4857_v35 = vrot.slane %v8778_v15, 2 }
 0x893   :  { %v4564_v18 = vmul.f32 %v7113_v63, %v4560_v11  ;;  %v4569_v39 = vadd.f32 %v4565_v21, %v4563_v62  ;;  %v4753_v40 = vcombine.high %v4752_v52, %v4752_v52  ;;  %v4760_v58 = vrot.slane %v4752_v52, %v7689_v38  ;;  %v7115_v50 = vpop.eup %7114 }
 0x894   :  { %v4798_v27 = vcombine.high %v4797_v13, %v4797_v13  ;;  %v4805_v14 = vrot.slane %v4797_v13, %v7689_v38  ;;  %v7117_v12 = vpop.eup %7116  ;;  %v4573_v54 = vsub.f32 1.0, %v7115_v50  ;;  %v4577_v33 = vmul.f32 %v7115_v50, %v8675_v4 }
 0x895   :  { %v4570_v25 = vadd.f32 %v4566_v48, %v4564_v18  ;;  %7118 = vtanh.f32 %v4569_v39  ;;  %v4767_v34 = vrot.slane %v4753_v40, %v7689_v38  ;;  %v4770_v60 = vadd.f32 %v4760_v58, %v8771_v30 }
 0x896   :  { %v4812_v42 = vrot.slane %v4798_v27, %v7689_v38  ;;  %v4815_v22 = vadd.f32 %v4805_v14, %v4786_v61  ;;  %v4574_v47 = vsub.f32 1.0, %v7117_v12  ;;  %v4578_v0 = vmul.f32 %v7117_v12, %v8677_v7 }
 0x897   :  { %7120 = vtanh.f32 %v4570_v25  ;;  %v4771_v17 = vadd.f32 %v8778_v15, %v4767_v34  ;;  %v5084_v45 = vmul.f32 -1.442695, %v4770_v60  ;;  %v4837_v37 = vcombine.high %v4836_v32, %v4836_v32 }
 0x898   :  { %v4816_v28 = vadd.f32 %v4812_v42, %v4787_v41  ;;  %v5086_v20 = vmul.f32 -1.442695, %v4815_v22  ;;  %v4844_v56 = vrot.slane %v4836_v32, %v7689_v38 }
 0x899   :  { %7122 = vpow2.f32 %v5084_v45  ;;  %v5085_v44 = vmul.f32 -1.442695, %v4771_v17  ;;  %v4851_v21 = vrot.slane %v4837_v37, %v7689_v38 }
 0x89a   :  { %v5087_v53 = vmul.f32 -1.442695, %v4816_v28 }
 0x89b   :  { %7124 = vpow2.f32 %v5085_v44 }
 0x89c   :  { %7126 = vpow2.f32 %v5086_v20 }
 0x89d   :  { %7128 = vpow2.f32 %v5087_v53 }
 0x89f   :  { %v7119_v8 = vpop.eup %7118 }
 0x8a0   :  { %v4575_v3 = vmul.f32 %v7119_v8, %v4573_v54 }
 0x8a1   :  { %v7121_v55 = vpop.eup %7120 }
 0x8a2   :  { %v4576_v51 = vmul.f32 %v7121_v55, %v4574_v47  ;;  %v4579_v31 = vadd.f32 %v4577_v33, %v4575_v3 }
 0x8a3   :  { %v7123_v26 = vpop.eup %7122 }
 0x8a4   :  { %v4580_v2 = vadd.f32 %v4578_v0, %v4576_v51  ;;  %4581 = vst [vmem:[%s8816_s4 + $0x7] sm:$0x1] %v4579_v31  ;;  %v4778_v5 = vadd.f32 1.0, %v7123_v26 }
 0x8a5   :  { %v7125_v1 = vpop.eup %7124 }
 0x8a6   :  { %4582 = vst [vmem:[%s8816_s4 + $0xf] sm:$0x1] %v4580_v2  ;;  %v4876_v4 = vcombine.low %v4579_v31, %v4580_v2  ;;  %v4779_v10 = vadd.f32 1.0, %v7125_v1  ;;  %7130 = vrcp.f32 %v4778_v5  ;;  %v7127_v29 = vpop.eup %7126 }
 0x8a7   :  { %v7129_v16 = vpop.eup %7128  ;;  %v4823_v23 = vadd.f32 1.0, %v7127_v29 }
 0x8a8   :  { %v4883_v7 = vrot.slane %v4876_v4, %v7689_v38  ;;  %7132 = vrcp.f32 %v4779_v10  ;;  %v4824_v24 = vadd.f32 1.0, %v7129_v16 }
 0x8a9   :  { %7134 = vrcp.f32 %v4823_v23 }
 0x8aa   :  { %5088 = vst.sshfl [vmem:[#allocation2] sm:$0x5 pattern:$0x73625140] %v4883_v7  ;;  %7136 = vrcp.f32 %v4824_v24 }
 0x8b0   :  { %v7131_v46 = vpop.eup %7130 }
 0x8b1   :  { %v4854_v59 = vmul.f32 %v7131_v46, %v4844_v56 }
 0x8b2   :  { %v7133_v36 = vpop.eup %7132 }
 0x8b3   :  { %v4855_v57 = vmul.f32 %v7133_v36, %v4851_v21  ;;  %v4860_v48 = vadd.f32 %v4856_v43, %v4854_v59  ;;  %v7135_v11 = vpop.eup %7134 }
 0x8b4   :  { %v7137_v62 = vpop.eup %7136  ;;  %v4864_v52 = vsub.f32 1.0, %v7135_v11  ;;  %v4868_v18 = vmul.f32 %v7135_v11, %v8726_v19 }
 0x8b5   :  { %v4861_v49 = vadd.f32 %v4857_v35, %v4855_v57  ;;  %7138 = vtanh.f32 %v4860_v48  ;;  %v4865_v30 = vsub.f32 1.0, %v7137_v62  ;;  %v4869_v15 = vmul.f32 %v7137_v62, %v8728_v6 }
 0x8b7   :  { %7140 = vtanh.f32 %v4861_v49 }
 0x8bf   :  { %v7139_v63 = vpop.eup %7138 }
 0x8c0   :  { %v4866_v13 = vmul.f32 %v7139_v63, %v4864_v52 }
 0x8c1   :  { %v7141_v39 = vpop.eup %7140 }
 0x8c2   :  { %v4867_v40 = vmul.f32 %v7141_v39, %v4865_v30  ;;  %v4870_v58 = vadd.f32 %v4868_v18, %v4866_v13 }
 0x8c4   :  { %v4871_v61 = vadd.f32 %v4869_v15, %v4867_v40  ;;  %4872 = vst [vmem:[%s8817_s5] sm:$0x1] %v4870_v58 }
 0x8c6   :  { %4873 = vst [vmem:[%s8817_s5 + $0x8] sm:$0x1] %v4871_v61  ;;  %v4895_v25 = vcombine.low %v4870_v58, %v4871_v61 }
 0x8c8   :  { %v4902_v34 = vrot.slane %v4895_v25, %v7689_v38 }
 0x8ca   :  { %5089 = vst.sshfl [vmem:[#allocation3] sm:$0x5 pattern:$0x73625140] %v4902_v34 }

</bundles_post_ra>
